<compile_context>
chip_gen: v5e
topology: v5e:2x2
jax: 0.10.0
libtpu: 0.0.40
codegen_flags: <defaults>
</compile_context>

<pallas_src>
import math
import functools

import jax
import jax.numpy as jnp
from jax.experimental import pallas as pl
from jax.experimental.pallas import tpu as pltpu


# ----------------------------------------------------------------------------
# Tiling / padding helpers
# ----------------------------------------------------------------------------

TM, TK = 256, 512


def _default_vmem_limit():
    # v5e/v6e: 128 MiB physical -> ~100 MiB budget; v7x: 64 MiB -> 48 MiB.
    try:
        cap = int(pltpu.get_tpu_info().vmem_capacity_bytes)
        return max(32 * 1024 * 1024, min(cap - 16 * 1024 * 1024, 100 * 1024 * 1024))
    except Exception:
        return 48 * 1024 * 1024


VMEM_LIMIT = _default_vmem_limit()


def _rup(x, m):
    return (x + m - 1) // m * m


def _tile_m(M, tmax=TM):
    """Row-tile size; prefer >=2 grid steps (megacore) when M allows it."""
    tm = min(tmax, _rup(M, 8))
    if tm == _rup(M, 8) and M > 8:
        tm = _rup((M + 1) // 2, 8)
    return min(tm, tmax)


def _pad_rows(x, Mp):
    return x if x.shape[0] == Mp else jnp.pad(x, ((0, Mp - x.shape[0]), (0, 0)))


def _layernorm_rows(h, gamma, beta, eps):
    mean = jnp.mean(h, axis=-1, keepdims=True)
    var = jnp.mean((h - mean) ** 2, axis=-1, keepdims=True)
    return (h - mean) * jax.lax.rsqrt(var + eps) * gamma + beta


# ----------------------------------------------------------------------------
# In-kernel multi-head attention helper (values only, no refs)
# ----------------------------------------------------------------------------

def _mha(q, k, v, bias_row, nhead, scale, causal):
    """q: (Sq, D) f32, k/v: (Sk, D) f32, bias_row: (1, Sk) additive f32.
    Returns (Sq, D) f32, heads packed lane-dense."""
    Sq, D = q.shape
    Sk = k.shape[0]
    Dh = D // nhead

    if causal:
        row = jax.lax.broadcasted_iota(jnp.int32, (Sq, Sk), 0)
        col = jax.lax.broadcasted_iota(jnp.int32, (Sq, Sk), 1)
        causal_mask = col > row          # built once, reused across heads

    qb = (q * scale).astype(jnp.bfloat16)
    kb = k.astype(jnp.bfloat16)
    vb = v.astype(jnp.bfloat16)

    outs = []
    for h in range(nhead):
        qh = qb[:, h * Dh:(h + 1) * Dh]                        # (Sq, Dh)
        kh = kb[:, h * Dh:(h + 1) * Dh]                        # (Sk, Dh)
        vh = vb[:, h * Dh:(h + 1) * Dh]                        # (Sk, Dh)
        s = jax.lax.dot_general(qh, kh, (((1,), (1,)), ((), ())),
                                preferred_element_type=jnp.float32)  # (Sq, Sk)
        s = s + bias_row
        if causal:
            s = jnp.where(causal_mask, jnp.float32(-1e9), s)
        m = jnp.max(s, axis=-1, keepdims=True)
        p = jnp.exp(s - m)
        denom = jnp.sum(p, axis=-1, keepdims=True)
        p = p * pl.reciprocal(denom, approx=True)
        outs.append(jnp.dot(p.astype(jnp.bfloat16), vh,
                            preferred_element_type=jnp.float32))      # (Sq, Dh)
    return jnp.concatenate(outs, axis=-1)                             # (Sq, D)


# ----------------------------------------------------------------------------
# Pallas kernels
# ----------------------------------------------------------------------------

def _self_attn_block_kernel(x_ref, wqkv_ref, bqkv_ref, wo_ref, bo_ref,
                            bias_ref, g_ref, beta_ref, o_ref, *,
                            nhead, scale, causal, eps):
    # Fused: qkv = x@Wqkv+b; MHA; proj = attn@Wo+bo; LN(proj + x)
    x = x_ref[0]                                                   # (S, D) bf16
    D = x.shape[-1]
    qkv = jnp.dot(x, wqkv_ref[...],
                  preferred_element_type=jnp.float32) + bqkv_ref[...]  # (S, 3D)
    q = qkv[:, :D]
    k = qkv[:, D:2 * D]
    v = qkv[:, 2 * D:]
    attn = _mha(q, k, v, bias_ref[0], nhead, scale, causal)        # (S, D) f32
    proj = jnp.dot(attn.astype(jnp.bfloat16), wo_ref[...],
                   preferred_element_type=jnp.float32) + bo_ref[...]
    h = proj + x.astype(jnp.float32)
    o_ref[0] = _layernorm_rows(h, g_ref[...], beta_ref[...], eps).astype(o_ref.dtype)


def _cross_attn_block_kernel(y_ref, mem_ref, wq_ref, bq_ref, wkv_ref, bkv_ref,
                             wo_ref, bo_ref, bias_ref, g_ref, beta_ref, o_ref, *,
                             nhead, scale, eps):
    y = y_ref[0]                                                   # (Sq, D) bf16
    mem = mem_ref[0]                                               # (Sk, D) bf16
    D = y.shape[-1]
    q = jnp.dot(y, wq_ref[...],
                preferred_element_type=jnp.float32) + bq_ref[...]
    kv = jnp.dot(mem, wkv_ref[...],
                 preferred_element_type=jnp.float32) + bkv_ref[...]
    k = kv[:, :D]
    v = kv[:, D:]
    attn = _mha(q, k, v, bias_ref[0], nhead, scale, causal=False)  # (Sq, D) f32
    proj = jnp.dot(attn.astype(jnp.bfloat16), wo_ref[...],
                   preferred_element_type=jnp.float32) + bo_ref[...]
    h = proj + y.astype(jnp.float32)
    o_ref[0] = _layernorm_rows(h, g_ref[...], beta_ref[...], eps).astype(o_ref.dtype)


def _ffn_block_kernel(x_ref, w1_ref, b1_ref, w2_ref, b2_ref, g_ref, beta_ref,
                      o_ref, *, eps):
    # Fused FFN: LN(x + relu(x@W1+b1)@W2+b2); hidden never leaves VMEM.
    x = x_ref[...]                                                 # (tm, D) bf16
    h = jnp.dot(x, w1_ref[...], preferred_element_type=jnp.float32) + b1_ref[...]
    h = jnp.maximum(h, 0.0)
    y = jnp.dot(h.astype(jnp.bfloat16), w2_ref[...],
                preferred_element_type=jnp.float32) + b2_ref[...]
    y = y + x.astype(jnp.float32)
    o_ref[...] = _layernorm_rows(y, g_ref[...], beta_ref[...], eps).astype(o_ref.dtype)


def _ln_kernel(x_ref, g_ref, b_ref, o_ref, *, eps):
    x = x_ref[...].astype(jnp.float32)
    o_ref[...] = _layernorm_rows(x, g_ref[...], b_ref[...], eps).astype(o_ref.dtype)


def _matmul_noacc_kernel(x_ref, w_ref, b_ref, o_ref):
    acc = jnp.dot(x_ref[...], w_ref[...], preferred_element_type=jnp.float32)
    o_ref[...] = (acc + b_ref[...]).astype(o_ref.dtype)


def _matmul_acc_kernel(x_ref, w_ref, b_ref, o_ref, acc_ref):
    @pl.when(pl.program_id(2) == 0)
    def _():
        acc_ref[...] = jnp.zeros_like(acc_ref)

    acc_ref[...] += jnp.dot(x_ref[...], w_ref[...],
                            preferred_element_type=jnp.float32)

    @pl.when(pl.program_id(2) == pl.num_programs(2) - 1)
    def _():
        o_ref[...] = (acc_ref[...] + b_ref[...]).astype(o_ref.dtype)


# ----------------------------------------------------------------------------
# Kernel wrappers
# ----------------------------------------------------------------------------

def self_attn_block(x, p, nhead, pad_bias, causal, ln_g, ln_b, eps=1e-5):
    """x: (B, S, D) bf16, pad_bias: (B, 1, S) f32. Returns (B, S, D) bf16."""
    B, S, D = x.shape
    scale = 1.0 / math.sqrt(D // nhead)
    kernel = functools.partial(_self_attn_block_kernel, nhead=nhead,
                               scale=scale, causal=causal, eps=eps)
    return pl.pallas_call(
        kernel,
        out_shape=jax.ShapeDtypeStruct((B, S, D), jnp.bfloat16),
        grid=(B,),
        in_specs=[
            pl.BlockSpec((1, S, D), lambda b: (b, 0, 0)),
            pl.BlockSpec((D, 3 * D), lambda b: (0, 0)),
            pl.BlockSpec((1, 3 * D), lambda b: (0, 0)),
            pl.BlockSpec((D, D), lambda b: (0, 0)),
            pl.BlockSpec((1, D), lambda b: (0, 0)),
            pl.BlockSpec((1, 1, S), lambda b: (b, 0, 0)),
            pl.BlockSpec((1, D), lambda b: (0, 0)),
            pl.BlockSpec((1, D), lambda b: (0, 0)),
        ],
        out_specs=pl.BlockSpec((1, S, D), lambda b: (b, 0, 0)),
        compiler_params=pltpu.CompilerParams(
            dimension_semantics=("parallel",),
            vmem_limit_bytes=VMEM_LIMIT),
    )(x, p["w_qkv"], p["b_qkv"], p["wo"], p["bo"], pad_bias, ln_g, ln_b)


def cross_attn_block(y, memory, p, nhead, pad_bias, ln_g, ln_b, eps=1e-5):
    """y: (B, Sq, D) bf16, memory: (B, Sk, D) bf16, pad_bias: (B, 1, Sk) f32."""
    B, Sq, D = y.shape
    Sk = memory.shape[1]
    scale = 1.0 / math.sqrt(D // nhead)
    kernel = functools.partial(_cross_attn_block_kernel, nhead=nhead,
                               scale=scale, eps=eps)
    return pl.pallas_call(
        kernel,
        out_shape=jax.ShapeDtypeStruct((B, Sq, D), jnp.bfloat16),
        grid=(B,),
        in_specs=[
            pl.BlockSpec((1, Sq, D), lambda b: (b, 0, 0)),
            pl.BlockSpec((1, Sk, D), lambda b: (b, 0, 0)),
            pl.BlockSpec((D, D), lambda b: (0, 0)),
            pl.BlockSpec((1, D), lambda b: (0, 0)),
            pl.BlockSpec((D, 2 * D), lambda b: (0, 0)),
            pl.BlockSpec((1, 2 * D), lambda b: (0, 0)),
            pl.BlockSpec((D, D), lambda b: (0, 0)),
            pl.BlockSpec((1, D), lambda b: (0, 0)),
            pl.BlockSpec((1, 1, Sk), lambda b: (b, 0, 0)),
            pl.BlockSpec((1, D), lambda b: (0, 0)),
            pl.BlockSpec((1, D), lambda b: (0, 0)),
        ],
        out_specs=pl.BlockSpec((1, Sq, D), lambda b: (b, 0, 0)),
        compiler_params=pltpu.CompilerParams(
            dimension_semantics=("parallel",),
            vmem_limit_bytes=VMEM_LIMIT),
    )(y, memory, p["wq"], p["bq"], p["w_kv"], p["b_kv"],
      p["wo"], p["bo"], pad_bias, ln_g, ln_b)


def ffn_block(x, p, ln_g, ln_b, eps=1e-5):
    """x: (B, S, D) bf16. Returns (B, S, D) bf16."""
    B, S, D = x.shape
    M = B * S
    F = p["lin1_w"].shape[1]
    tm = _tile_m(M)
    Mp = _rup(M, tm)
    xp = _pad_rows(x.reshape(M, D), Mp)
    out = pl.pallas_call(
        functools.partial(_ffn_block_kernel, eps=eps),
        out_shape=jax.ShapeDtypeStruct((Mp, D), jnp.bfloat16),
        grid=(Mp // tm,),
        in_specs=[
            pl.BlockSpec((tm, D), lambda i: (i, 0)),
            pl.BlockSpec((D, F), lambda i: (0, 0)),
            pl.BlockSpec((1, F), lambda i: (0, 0)),
            pl.BlockSpec((F, D), lambda i: (0, 0)),
            pl.BlockSpec((1, D), lambda i: (0, 0)),
            pl.BlockSpec((1, D), lambda i: (0, 0)),
            pl.BlockSpec((1, D), lambda i: (0, 0)),
        ],
        out_specs=pl.BlockSpec((tm, D), lambda i: (i, 0)),
        compiler_params=pltpu.CompilerParams(
            dimension_semantics=("parallel",),
            vmem_limit_bytes=VMEM_LIMIT),
    )(xp, p["lin1_w"], p["lin1_b"], p["lin2_w"], p["lin2_b"], ln_g, ln_b)
    return out[:M].reshape(B, S, D)


def layernorm(x, g, b, eps=1e-5):
    """x: (B, S, D) bf16 -> (B, S, D) bf16 (stats in f32)."""
    B, S, D = x.shape
    M = B * S
    tm = _tile_m(M)
    Mp = _rup(M, tm)
    xp = _pad_rows(x.reshape(M, D), Mp)
    out = pl.pallas_call(
        functools.partial(_ln_kernel, eps=eps),
        out_shape=jax.ShapeDtypeStruct((Mp, D), jnp.bfloat16),
        grid=(Mp // tm,),
        in_specs=[
            pl.BlockSpec((tm, D), lambda i: (i, 0)),
            pl.BlockSpec((1, D), lambda i: (0, 0)),
            pl.BlockSpec((1, D), lambda i: (0, 0)),
        ],
        out_specs=pl.BlockSpec((tm, D), lambda i: (i, 0)),
        compiler_params=pltpu.CompilerParams(
            dimension_semantics=("parallel",),
            vmem_limit_bytes=VMEM_LIMIT),
    )(xp, g, b)
    return out[:M].reshape(B, S, D)


def matmul(x, w, b):
    """x: (M, K) bf16, w: (K, N) bf16 (N % 128 == 0), b: (1, N) f32 -> (M, N) f32."""
    M, K = x.shape
    N = w.shape[1]
    tm = _tile_m(M)
    tn = 256 if N % 256 == 0 else 128
    tn = min(tn, N)
    Mp = _rup(M, tm)
    xp = _pad_rows(x, Mp)

    if K <= TK:
        # Single K step: no scratch accumulator, no init/finalize passes.
        out = pl.pallas_call(
            _matmul_noacc_kernel,
            out_shape=jax.ShapeDtypeStruct((Mp, N), jnp.float32),
            grid=(Mp // tm, N // tn),
            in_specs=[
                pl.BlockSpec((tm, K), lambda i, j: (i, 0)),
                pl.BlockSpec((K, tn), lambda i, j: (0, j)),
                pl.BlockSpec((1, tn), lambda i, j: (0, j)),
            ],
            out_specs=pl.BlockSpec((tm, tn), lambda i, j: (i, j)),
            compiler_params=pltpu.CompilerParams(
                dimension_semantics=("parallel", "parallel"),
                vmem_limit_bytes=VMEM_LIMIT),
        )(xp, w, b)
    else:
        tk = TK
        Kp = _rup(K, tk)
        if Kp != K:
            xp = jnp.pad(xp, ((0, 0), (0, Kp - K)))
            w = jnp.pad(w, ((0, Kp - K), (0, 0)))
        out = pl.pallas_call(
            _matmul_acc_kernel,
            out_shape=jax.ShapeDtypeStruct((Mp, N), jnp.float32),
            grid=(Mp // tm, N // tn, Kp // tk),
            in_specs=[
                pl.BlockSpec((tm, tk), lambda i, j, k: (i, k)),
                pl.BlockSpec((tk, tn), lambda i, j, k: (k, j)),
                pl.BlockSpec((1, tn), lambda i, j, k: (0, j)),
            ],
            out_specs=pl.BlockSpec((tm, tn), lambda i, j, k: (i, j)),
            scratch_shapes=[pltpu.VMEM((tm, tn), jnp.float32)],
            compiler_params=pltpu.CompilerParams(
                dimension_semantics=("parallel", "parallel", "arbitrary"),
                vmem_limit_bytes=VMEM_LIMIT),
        )(xp, w, b)
    return out[:M]


# ----------------------------------------------------------------------------
# Model glue (embedding / pos-enc / layer loop in plain JAX)
# ----------------------------------------------------------------------------

def positional_encoding(max_len, d_model):
    pos = jnp.arange(max_len, dtype=jnp.float32)[:, None]
    div = jnp.exp(jnp.arange(0, d_model, 2, dtype=jnp.float32)
                  * (-math.log(10000.0) / d_model))
    pe = jnp.zeros((max_len, d_model), jnp.float32)
    pe = pe.at[:, 0::2].set(jnp.sin(pos * div))
    pe = pe.at[:, 1::2].set(jnp.cos(pos * div))
    return pe


def make_pad_bias(pad_mask):
    """pad_mask: (B, Sk) bool, True = pad. Returns additive (B, 1, Sk) f32."""
    return jnp.where(pad_mask, -1e9, 0.0).astype(jnp.float32)[:, None, :]


def forward(params, src, tgt, *, nhead, vocab_size):
    """src, tgt: int32 token ids (B, Ss), (B, St). Returns logits (B, St, vocab)."""
    B, Ss = src.shape
    St = tgt.shape[1]
    emb = params["embedding"]
    pe = params["pe"]

    # TODO(synk): dropout (p=0.1) treated as identity (eval-mode semantics).
    src_emb = (jnp.take(emb, src, axis=0) + pe[:Ss][None]).astype(jnp.bfloat16)
    tgt_emb = (jnp.take(emb, tgt, axis=0) + pe[:St][None]).astype(jnp.bfloat16)

    src_bias = make_pad_bias(src == 0)    # (B, 1, Ss)
    tgt_bias = make_pad_bias(tgt == 0)    # (B, 1, St)

    # Encoder
    x = src_emb
    for lp in params["enc_layers"]:
        x = self_attn_block(x, lp["self_attn"], nhead, src_bias, False,
                            lp["norm1_g"], lp["norm1_b"])
        x = ffn_block(x, lp, lp["norm2_g"], lp["norm2_b"])
    memory = layernorm(x, params["enc_norm_g"], params["enc_norm_b"])

    # Decoder
    y = tgt_emb
    for lp in params["dec_layers"]:
        y = self_attn_block(y, lp["self_attn"], nhead, tgt_bias, True,
                            lp["norm1_g"], lp["norm1_b"])
        y = cross_attn_block(y, memory, lp["cross_attn"], nhead, src_bias,
                             lp["norm2_g"], lp["norm2_b"])
        y = ffn_block(y, lp, lp["norm3_g"], lp["norm3_b"])
    y = layernorm(y, params["dec_norm_g"], params["dec_norm_b"])

    D = y.shape[-1]
    logits = matmul(y.reshape(B * St, D), params["fc_w"], params["fc_b"])
    return logits[:, :vocab_size].reshape(B, St, vocab_size)


# ----------------------------------------------------------------------------
# Deterministic parameter init (shapes follow the PyTorch module's __init__)
# Matmul weights bf16 + pre-padded; biases / LN params / embedding f32.
# ----------------------------------------------------------------------------

def init_params(key, vocab_size, d_model, nhead, num_layers, dim_ff, max_len):
    keys = iter(jax.random.split(key, 1024))

    def dense(shape, scale=0.05):
        return (jax.random.normal(next(keys), shape, jnp.float32) * scale
                ).astype(jnp.bfloat16)

    def bias(n, scale=0.05):
        return jax.random.normal(next(keys), (1, n), jnp.float32) * scale

    def ln_g(d):
        return jnp.ones((1, d), jnp.float32)

    def ln_b(d):
        return jnp.zeros((1, d), jnp.float32)

    def self_attn_params():
        return dict(
            w_qkv=dense((d_model, 3 * d_model)), b_qkv=bias(3 * d_model),
            wo=dense((d_model, d_model)), bo=bias(d_model),
        )

    def cross_attn_params():
        return dict(
            wq=dense((d_model, d_model)), bq=bias(d_model),
            w_kv=dense((d_model, 2 * d_model)), b_kv=bias(2 * d_model),
            wo=dense((d_model, d_model)), bo=bias(d_model),
        )

    emb = jax.random.normal(next(keys), (vocab_size, d_model), jnp.float32) * 0.5
    emb = emb.at[0].set(0.0)  # padding_idx=0 row is zeros

    def enc_layer_params():
        return dict(
            self_attn=self_attn_params(),
            norm1_g=ln_g(d_model), norm1_b=ln_b(d_model),
            norm2_g=ln_g(d_model), norm2_b=ln_b(d_model),
            lin1_w=dense((d_model, dim_ff)), lin1_b=bias(dim_ff),
            lin2_w=dense((dim_ff, d_model)), lin2_b=bias(d_model),
        )

    def dec_layer_params():
        return dict(
            self_attn=self_attn_params(),
            cross_attn=cross_attn_params(),
            norm1_g=ln_g(d_model), norm1_b=ln_b(d_model),
            norm2_g=ln_g(d_model), norm2_b=ln_b(d_model),
            norm3_g=ln_g(d_model), norm3_b=ln_b(d_model),
            lin1_w=dense((d_model, dim_ff)), lin1_b=bias(dim_ff),
            lin2_w=dense((dim_ff, d_model)), lin2_b=bias(d_model),
        )

    # fc_out weight/bias pre-padded to a lane-dense multiple of 128 once.
    vp = _rup(vocab_size, 128)
    fc_w = jnp.pad(dense((d_model, vocab_size)), ((0, 0), (0, vp - vocab_size)))
    fc_b = jnp.pad(bias(vocab_size), ((0, 0), (0, vp - vocab_size)))

    return dict(
        embedding=emb,
        pe=positional_encoding(max_len, d_model),
        enc_layers=[enc_layer_params() for _ in range(num_layers)],
        dec_layers=[dec_layer_params() for _ in range(num_layers)],
        enc_norm_g=ln_g(d_model), enc_norm_b=ln_b(d_model),
        dec_norm_g=ln_g(d_model), dec_norm_b=ln_b(d_model),
        fc_w=fc_w, fc_b=fc_b,
    )


# ----------------------------------------------------------------------------
# Main
# ----------------------------------------------------------------------------

if __name__ == "__main__":
    # Small, module-consistent shapes.
    VOCAB = 50
    D_MODEL = 32
    NHEAD = 4
    NUM_LAYERS = 2
    DIM_FF = 64
    MAX_LEN = 64
    B, S_SRC, S_TGT = 2, 8, 8

    root = jax.random.PRNGKey(0)
    k_param, k_src, k_tgt = jax.random.split(root, 3)

    params = init_params(k_param, VOCAB, D_MODEL, NHEAD, NUM_LAYERS, DIM_FF, MAX_LEN)

    src = jax.random.randint(k_src, (B, S_SRC), 1, VOCAB, dtype=jnp.int32)
    tgt = jax.random.randint(k_tgt, (B, S_TGT), 1, VOCAB, dtype=jnp.int32)
    # introduce some padding (token id 0), but never a fully-padded sequence
    src = src.at[0, -2:].set(0)
    tgt = tgt.at[1, -1:].set(0)

    fwd = jax.jit(functools.partial(forward, nhead=NHEAD, vocab_size=VOCAB))
    logits = fwd(params, src, tgt)
    jax.block_until_ready(logits)

    assert logits.shape == (B, S_TGT, VOCAB)
    assert bool(jnp.all(jnp.isfinite(logits)))
    print("KERNEL_OK")
</pallas_src>

<mosaic_0001>
module attributes {stable_mosaic.version = 11 : i64} {
  func.func @_ffn_block_kernel(%arg0: i32, %arg1: memref<8x32xbf16, #tpu.memory_space<vmem>>, %arg2: memref<32x64xbf16, #tpu.memory_space<vmem>>, %arg3: memref<1x64xf32, #tpu.memory_space<vmem>>, %arg4: memref<64x32xbf16, #tpu.memory_space<vmem>>, %arg5: memref<1x32xf32, #tpu.memory_space<vmem>>, %arg6: memref<1x32xf32, #tpu.memory_space<vmem>>, %arg7: memref<1x32xf32, #tpu.memory_space<vmem>>, %arg8: memref<8x32xbf16, #tpu.memory_space<vmem>>) attributes {dimension_semantics = [#tpu.dimension_semantics<parallel>], iteration_bounds = array<i64: 2>, scalar_prefetch = 0 : i64, scratch_operands = 0 : i64, tpu.core_type = #tpu.core_type<tc>, window_params = [{transform_indices = @transform_0, window_bounds = array<i64: 8, 32>}, {pipeline_mode = #tpu.pipeline_mode<synchronous>, transform_indices = @transform_1, window_bounds = array<i64: 32, 64>}, {pipeline_mode = #tpu.pipeline_mode<synchronous>, transform_indices = @transform_2, window_bounds = array<i64: 1, 64>}, {pipeline_mode = #tpu.pipeline_mode<synchronous>, transform_indices = @transform_3, window_bounds = array<i64: 64, 32>}, {pipeline_mode = #tpu.pipeline_mode<synchronous>, transform_indices = @transform_4, window_bounds = array<i64: 1, 32>}, {pipeline_mode = #tpu.pipeline_mode<synchronous>, transform_indices = @transform_5, window_bounds = array<i64: 1, 32>}, {pipeline_mode = #tpu.pipeline_mode<synchronous>, transform_indices = @transform_6, window_bounds = array<i64: 1, 32>}, {transform_indices = @transform_7, window_bounds = array<i64: 8, 32>}]} {
    %c0 = arith.constant 0 : index
    %c0_0 = arith.constant 0 : index
    %0 = vector.load %arg1[%c0, %c0_0] : memref<8x32xbf16, #tpu.memory_space<vmem>>, vector<8x32xbf16>
    %c0_1 = arith.constant 0 : index
    %c0_2 = arith.constant 0 : index
    %1 = vector.load %arg2[%c0_1, %c0_2] : memref<32x64xbf16, #tpu.memory_space<vmem>>, vector<32x64xbf16>
    %cst = arith.constant dense<0.000000e+00> : vector<8x64xf32>
    %2 = tpu.matmul %0, %1, %cst {dimension_numbers = #tpu.dot_dimension_numbers<[1], [0], [0], [1], [0, 0, 1, 1], [], []>} : vector<8x32xbf16>, vector<32x64xbf16>, vector<8x64xf32> -> vector<8x64xf32>
    %c0_3 = arith.constant 0 : index
    %c0_4 = arith.constant 0 : index
    %3 = vector.load %arg3[%c0_3, %c0_4] : memref<1x64xf32, #tpu.memory_space<vmem>>, vector<1x64xf32>
    %4 = vector.broadcast %3 : vector<1x64xf32> to vector<8x64xf32>
    %5 = arith.addf %2, %4 : vector<8x64xf32>
    %cst_5 = arith.constant 0.000000e+00 : f32
    %6 = vector.broadcast %cst_5 : f32 to vector<8x64xf32>
    %7 = arith.maximumf %5, %6 : vector<8x64xf32>
    %8 = arith.truncf %7 : vector<8x64xf32> to vector<8x64xbf16>
    %c0_6 = arith.constant 0 : index
    %c0_7 = arith.constant 0 : index
    %9 = vector.load %arg4[%c0_6, %c0_7] : memref<64x32xbf16, #tpu.memory_space<vmem>>, vector<64x32xbf16>
    %cst_8 = arith.constant dense<0.000000e+00> : vector<8x32xf32>
    %10 = tpu.matmul %8, %9, %cst_8 {dimension_numbers = #tpu.dot_dimension_numbers<[1], [0], [0], [1], [0, 0, 1, 1], [], []>} : vector<8x64xbf16>, vector<64x32xbf16>, vector<8x32xf32> -> vector<8x32xf32>
    %c0_9 = arith.constant 0 : index
    %c0_10 = arith.constant 0 : index
    %11 = vector.load %arg5[%c0_9, %c0_10] : memref<1x32xf32, #tpu.memory_space<vmem>>, vector<1x32xf32>
    %12 = vector.broadcast %11 : vector<1x32xf32> to vector<8x32xf32>
    %13 = arith.addf %10, %12 : vector<8x32xf32>
    %14 = arith.extf %0 : vector<8x32xbf16> to vector<8x32xf32>
    %15 = arith.addf %13, %14 : vector<8x32xf32>
    %c0_11 = arith.constant 0 : index
    %c0_12 = arith.constant 0 : index
    %16 = vector.load %arg6[%c0_11, %c0_12] : memref<1x32xf32, #tpu.memory_space<vmem>>, vector<1x32xf32>
    %c0_13 = arith.constant 0 : index
    %c0_14 = arith.constant 0 : index
    %17 = vector.load %arg7[%c0_13, %c0_14] : memref<1x32xf32, #tpu.memory_space<vmem>>, vector<1x32xf32>
    %cst_15 = arith.constant dense<0.000000e+00> : vector<8xf32>
    %18 = vector.multi_reduction <add>, %15, %cst_15 [1] : vector<8x32xf32> to vector<8xf32>
    %19 = vector.shape_cast %18 : vector<8xf32> to vector<8x1xf32>
    %cst_16 = arith.constant 3.200000e+01 : f32
    %20 = vector.broadcast %cst_16 : f32 to vector<8x1xf32>
    %21 = arith.divf %19, %20 : vector<8x1xf32>
    %22 = vector.broadcast %21 : vector<8x1xf32> to vector<8x32xf32>
    %23 = arith.subf %15, %22 : vector<8x32xf32>
    %24 = arith.mulf %23, %23 : vector<8x32xf32>
    %cst_17 = arith.constant dense<0.000000e+00> : vector<8xf32>
    %25 = vector.multi_reduction <add>, %24, %cst_17 [1] : vector<8x32xf32> to vector<8xf32>
    %26 = vector.shape_cast %25 : vector<8xf32> to vector<8x1xf32>
    %cst_18 = arith.constant 3.200000e+01 : f32
    %27 = vector.broadcast %cst_18 : f32 to vector<8x1xf32>
    %28 = arith.divf %26, %27 : vector<8x1xf32>
    %29 = vector.broadcast %21 : vector<8x1xf32> to vector<8x32xf32>
    %30 = arith.subf %15, %29 : vector<8x32xf32>
    %cst_19 = arith.constant 9.99999974E-6 : f32
    %31 = vector.broadcast %cst_19 : f32 to vector<8x1xf32>
    %32 = arith.addf %28, %31 : vector<8x1xf32>
    %33 = math.rsqrt %32 : vector<8x1xf32>
    %34 = vector.broadcast %33 : vector<8x1xf32> to vector<8x32xf32>
    %35 = arith.mulf %30, %34 : vector<8x32xf32>
    %36 = vector.broadcast %16 : vector<1x32xf32> to vector<8x32xf32>
    %37 = arith.mulf %35, %36 : vector<8x32xf32>
    %38 = vector.broadcast %17 : vector<1x32xf32> to vector<8x32xf32>
    %39 = arith.addf %37, %38 : vector<8x32xf32>
    %40 = arith.truncf %39 : vector<8x32xf32> to vector<8x32xbf16>
    %c0_20 = arith.constant 0 : index
    %c0_21 = arith.constant 0 : index
    %41 = vector.load %arg8[%c0_20, %c0_21] : memref<8x32xbf16, #tpu.memory_space<vmem>>, vector<8x32xbf16>
    tpu.vector_store %arg8[%c0_20, %c0_21], %40 {strides = array<i32>} : memref<8x32xbf16, #tpu.memory_space<vmem>>, vector<8x32xbf16>,
    return
  }
  func.func @transform_0(%arg0: i32) -> (i32, i32) {
    %c0_i32 = arith.constant 0 : i32
    %c0_i32_0 = arith.constant 0 : i32
    return %arg0, %c0_i32 : i32, i32
  }
  func.func @transform_1(%arg0: i32) -> (i32, i32) {
    %c0_i32 = arith.constant 0 : i32
    %c0_i32_0 = arith.constant 0 : i32
    %c0_i32_1 = arith.constant 0 : i32
    return %c0_i32, %c0_i32_0 : i32, i32
  }
  func.func @transform_2(%arg0: i32) -> (i32, i32) {
    %c0_i32 = arith.constant 0 : i32
    %c0_i32_0 = arith.constant 0 : i32
    %c0_i32_1 = arith.constant 0 : i32
    return %c0_i32, %c0_i32_0 : i32, i32
  }
  func.func @transform_3(%arg0: i32) -> (i32, i32) {
    %c0_i32 = arith.constant 0 : i32
    %c0_i32_0 = arith.constant 0 : i32
    %c0_i32_1 = arith.constant 0 : i32
    return %c0_i32, %c0_i32_0 : i32, i32
  }
  func.func @transform_4(%arg0: i32) -> (i32, i32) {
    %c0_i32 = arith.constant 0 : i32
    %c0_i32_0 = arith.constant 0 : i32
    %c0_i32_1 = arith.constant 0 : i32
    return %c0_i32, %c0_i32_0 : i32, i32
  }
  func.func @transform_5(%arg0: i32) -> (i32, i32) {
    %c0_i32 = arith.constant 0 : i32
    %c0_i32_0 = arith.constant 0 : i32
    %c0_i32_1 = arith.constant 0 : i32
    return %c0_i32, %c0_i32_0 : i32, i32
  }
  func.func @transform_6(%arg0: i32) -> (i32, i32) {
    %c0_i32 = arith.constant 0 : i32
    %c0_i32_0 = arith.constant 0 : i32
    %c0_i32_1 = arith.constant 0 : i32
    return %c0_i32, %c0_i32_0 : i32, i32
  }
  func.func @transform_7(%arg0: i32) -> (i32, i32) {
    %c0_i32 = arith.constant 0 : i32
    %c0_i32_0 = arith.constant 0 : i32
    return %arg0, %c0_i32 : i32, i32
  }
}

module attributes {stable_mosaic.version = 11 : i64} {
  func.func @_self_attn_block_kernel(%arg0: i32, %arg1: memref<1x8x32xbf16, #tpu.memory_space<vmem>>, %arg2: memref<32x96xbf16, #tpu.memory_space<vmem>>, %arg3: memref<1x96xf32, #tpu.memory_space<vmem>>, %arg4: memref<32x32xbf16, #tpu.memory_space<vmem>>, %arg5: memref<1x32xf32, #tpu.memory_space<vmem>>, %arg6: memref<1x1x8xf32, #tpu.memory_space<vmem>>, %arg7: memref<1x32xf32, #tpu.memory_space<vmem>>, %arg8: memref<1x32xf32, #tpu.memory_space<vmem>>, %arg9: memref<1x8x32xbf16, #tpu.memory_space<vmem>>) attributes {dimension_semantics = [#tpu.dimension_semantics<parallel>], iteration_bounds = array<i64: 2>, scalar_prefetch = 0 : i64, scratch_operands = 0 : i64, tpu.core_type = #tpu.core_type<tc>, window_params = [{transform_indices = @transform_0, window_bounds = array<i64: 1, 8, 32>}, {pipeline_mode = #tpu.pipeline_mode<synchronous>, transform_indices = @transform_1, window_bounds = array<i64: 32, 96>}, {pipeline_mode = #tpu.pipeline_mode<synchronous>, transform_indices = @transform_2, window_bounds = array<i64: 1, 96>}, {pipeline_mode = #tpu.pipeline_mode<synchronous>, transform_indices = @transform_3, window_bounds = array<i64: 32, 32>}, {pipeline_mode = #tpu.pipeline_mode<synchronous>, transform_indices = @transform_4, window_bounds = array<i64: 1, 32>}, {transform_indices = @transform_5, window_bounds = array<i64: 1, 1, 8>}, {pipeline_mode = #tpu.pipeline_mode<synchronous>, transform_indices = @transform_6, window_bounds = array<i64: 1, 32>}, {pipeline_mode = #tpu.pipeline_mode<synchronous>, transform_indices = @transform_7, window_bounds = array<i64: 1, 32>}, {transform_indices = @transform_8, window_bounds = array<i64: 1, 8, 32>}]} {
    %c0 = arith.constant 0 : index
    %c0_0 = arith.constant 0 : index
    %c0_1 = arith.constant 0 : index
    %0 = vector.load %arg1[%c0, %c0_0, %c0_1] : memref<1x8x32xbf16, #tpu.memory_space<vmem>>, vector<1x8x32xbf16>
    %1 = vector.shape_cast %0 : vector<1x8x32xbf16> to vector<8x32xbf16>
    %c0_2 = arith.constant 0 : index
    %c0_3 = arith.constant 0 : index
    %2 = vector.load %arg2[%c0_2, %c0_3] : memref<32x96xbf16, #tpu.memory_space<vmem>>, vector<32x96xbf16>
    %cst = arith.constant dense<0.000000e+00> : vector<8x96xf32>
    %3 = tpu.matmul %1, %2, %cst {dimension_numbers = #tpu.dot_dimension_numbers<[1], [0], [0], [1], [0, 0, 1, 1], [], []>} : vector<8x32xbf16>, vector<32x96xbf16>, vector<8x96xf32> -> vector<8x96xf32>
    %c0_4 = arith.constant 0 : index
    %c0_5 = arith.constant 0 : index
    %4 = vector.load %arg3[%c0_4, %c0_5] : memref<1x96xf32, #tpu.memory_space<vmem>>, vector<1x96xf32>
    %5 = vector.broadcast %4 : vector<1x96xf32> to vector<8x96xf32>
    %6 = arith.addf %3, %5 : vector<8x96xf32>
    %7 = vector.extract_strided_slice %6 {offsets = [0, 0], sizes = [8, 32], strides = [1, 1]} : vector<8x96xf32> to vector<8x32xf32>
    %8 = vector.extract_strided_slice %6 {offsets = [0, 32], sizes = [8, 32], strides = [1, 1]} : vector<8x96xf32> to vector<8x32xf32>
    %9 = vector.extract_strided_slice %6 {offsets = [0, 64], sizes = [8, 32], strides = [1, 1]} : vector<8x96xf32> to vector<8x32xf32>
    %c0_6 = arith.constant 0 : index
    %c0_7 = arith.constant 0 : index
    %c0_8 = arith.constant 0 : index
    %10 = vector.load %arg6[%c0_6, %c0_7, %c0_8] : memref<1x1x8xf32, #tpu.memory_space<vmem>>, vector<1x1x8xf32>
    %11 = vector.shape_cast %10 : vector<1x1x8xf32> to vector<1x8xf32>
    %cst_9 = arith.constant 0.353553385 : f32
    %12 = vector.broadcast %cst_9 : f32 to vector<8x32xf32>
    %13 = arith.mulf %7, %12 : vector<8x32xf32>
    %14 = arith.truncf %13 : vector<8x32xf32> to vector<8x32xbf16>
    %15 = arith.truncf %8 : vector<8x32xf32> to vector<8x32xbf16>
    %16 = arith.truncf %9 : vector<8x32xf32> to vector<8x32xbf16>
    %17 = vector.extract_strided_slice %14 {offsets = [0, 0], sizes = [8, 8], strides = [1, 1]} : vector<8x32xbf16> to vector<8x8xbf16>
    %18 = vector.extract_strided_slice %15 {offsets = [0, 0], sizes = [8, 8], strides = [1, 1]} : vector<8x32xbf16> to vector<8x8xbf16>
    %19 = vector.extract_strided_slice %16 {offsets = [0, 0], sizes = [8, 8], strides = [1, 1]} : vector<8x32xbf16> to vector<8x8xbf16>
    %cst_10 = arith.constant dense<0.000000e+00> : vector<8x8xf32>
    %20 = tpu.matmul %17, %18, %cst_10 {dimension_numbers = #tpu.dot_dimension_numbers<[1], [1], [0], [0], [0, 0, 1, 0], [], []>} : vector<8x8xbf16>, vector<8x8xbf16>, vector<8x8xf32> -> vector<8x8xf32>
    %21 = vector.broadcast %11 : vector<1x8xf32> to vector<8x8xf32>
    %22 = arith.addf %20, %21 : vector<8x8xf32>
    %cst_11 = arith.constant dense<0xFF800000> : vector<8xf32>
    %23 = vector.multi_reduction <maximumf>, %22, %cst_11 [1] : vector<8x8xf32> to vector<8xf32>
    %24 = vector.shape_cast %23 : vector<8xf32> to vector<8x1xf32>
    %25 = vector.broadcast %24 : vector<8x1xf32> to vector<8x8xf32>
    %26 = arith.subf %22, %25 : vector<8x8xf32>
    %27 = math.exp %26 : vector<8x8xf32>
    %cst_12 = arith.constant dense<0.000000e+00> : vector<8xf32>
    %28 = vector.multi_reduction <add>, %27, %cst_12 [1] : vector<8x8xf32> to vector<8xf32>
    %29 = vector.shape_cast %28 : vector<8xf32> to vector<8x1xf32>
    %30 = tpu.reciprocal %29 {approx = true} : vector<8x1xf32> -> vector<8x1xf32>
    %31 = vector.broadcast %30 : vector<8x1xf32> to vector<8x8xf32>
    %32 = arith.mulf %27, %31 : vector<8x8xf32>
    %33 = arith.truncf %32 : vector<8x8xf32> to vector<8x8xbf16>
    %cst_13 = arith.constant dense<0.000000e+00> : vector<8x8xf32>
    %34 = tpu.matmul %33, %19, %cst_13 {dimension_numbers = #tpu.dot_dimension_numbers<[1], [0], [0], [1], [0, 0, 1, 1], [], []>} : vector<8x8xbf16>, vector<8x8xbf16>, vector<8x8xf32> -> vector<8x8xf32>
    %35 = vector.extract_strided_slice %14 {offsets = [0, 8], sizes = [8, 8], strides = [1, 1]} : vector<8x32xbf16> to vector<8x8xbf16>
    %36 = vector.extract_strided_slice %15 {offsets = [0, 8], sizes = [8, 8], strides = [1, 1]} : vector<8x32xbf16> to vector<8x8xbf16>
    %37 = vector.extract_strided_slice %16 {offsets = [0, 8], sizes = [8, 8], strides = [1, 1]} : vector<8x32xbf16> to vector<8x8xbf16>
    %cst_14 = arith.constant dense<0.000000e+00> : vector<8x8xf32>
    %38 = tpu.matmul %35, %36, %cst_14 {dimension_numbers = #tpu.dot_dimension_numbers<[1], [1], [0], [0], [0, 0, 1, 0], [], []>} : vector<8x8xbf16>, vector<8x8xbf16>, vector<8x8xf32> -> vector<8x8xf32>
    %39 = vector.broadcast %11 : vector<1x8xf32> to vector<8x8xf32>
    %40 = arith.addf %38, %39 : vector<8x8xf32>
    %cst_15 = arith.constant dense<0xFF800000> : vector<8xf32>
    %41 = vector.multi_reduction <maximumf>, %40, %cst_15 [1] : vector<8x8xf32> to vector<8xf32>
    %42 = vector.shape_cast %41 : vector<8xf32> to vector<8x1xf32>
    %43 = vector.broadcast %42 : vector<8x1xf32> to vector<8x8xf32>
    %44 = arith.subf %40, %43 : vector<8x8xf32>
    %45 = math.exp %44 : vector<8x8xf32>
    %cst_16 = arith.constant dense<0.000000e+00> : vector<8xf32>
    %46 = vector.multi_reduction <add>, %45, %cst_16 [1] : vector<8x8xf32> to vector<8xf32>
    %47 = vector.shape_cast %46 : vector<8xf32> to vector<8x1xf32>
    %48 = tpu.reciprocal %47 {approx = true} : vector<8x1xf32> -> vector<8x1xf32>
    %49 = vector.broadcast %48 : vector<8x1xf32> to vector<8x8xf32>
    %50 = arith.mulf %45, %49 : vector<8x8xf32>
    %51 = arith.truncf %50 : vector<8x8xf32> to vector<8x8xbf16>
    %cst_17 = arith.constant dense<0.000000e+00> : vector<8x8xf32>
    %52 = tpu.matmul %51, %37, %cst_17 {dimension_numbers = #tpu.dot_dimension_numbers<[1], [0], [0], [1], [0, 0, 1, 1], [], []>} : vector<8x8xbf16>, vector<8x8xbf16>, vector<8x8xf32> -> vector<8x8xf32>
    %53 = vector.extract_strided_slice %14 {offsets = [0, 16], sizes = [8, 8], strides = [1, 1]} : vector<8x32xbf16> to vector<8x8xbf16>
    %54 = vector.extract_strided_slice %15 {offsets = [0, 16], sizes = [8, 8], strides = [1, 1]} : vector<8x32xbf16> to vector<8x8xbf16>
    %55 = vector.extract_strided_slice %16 {offsets = [0, 16], sizes = [8, 8], strides = [1, 1]} : vector<8x32xbf16> to vector<8x8xbf16>
    %cst_18 = arith.constant dense<0.000000e+00> : vector<8x8xf32>
    %56 = tpu.matmul %53, %54, %cst_18 {dimension_numbers = #tpu.dot_dimension_numbers<[1], [1], [0], [0], [0, 0, 1, 0], [], []>} : vector<8x8xbf16>, vector<8x8xbf16>, vector<8x8xf32> -> vector<8x8xf32>
    %57 = vector.broadcast %11 : vector<1x8xf32> to vector<8x8xf32>
    %58 = arith.addf %56, %57 : vector<8x8xf32>
    %cst_19 = arith.constant dense<0xFF800000> : vector<8xf32>
    %59 = vector.multi_reduction <maximumf>, %58, %cst_19 [1] : vector<8x8xf32> to vector<8xf32>
    %60 = vector.shape_cast %59 : vector<8xf32> to vector<8x1xf32>
    %61 = vector.broadcast %60 : vector<8x1xf32> to vector<8x8xf32>
    %62 = arith.subf %58, %61 : vector<8x8xf32>
    %63 = math.exp %62 : vector<8x8xf32>
    %cst_20 = arith.constant dense<0.000000e+00> : vector<8xf32>
    %64 = vector.multi_reduction <add>, %63, %cst_20 [1] : vector<8x8xf32> to vector<8xf32>
    %65 = vector.shape_cast %64 : vector<8xf32> to vector<8x1xf32>
    %66 = tpu.reciprocal %65 {approx = true} : vector<8x1xf32> -> vector<8x1xf32>
    %67 = vector.broadcast %66 : vector<8x1xf32> to vector<8x8xf32>
    %68 = arith.mulf %63, %67 : vector<8x8xf32>
    %69 = arith.truncf %68 : vector<8x8xf32> to vector<8x8xbf16>
    %cst_21 = arith.constant dense<0.000000e+00> : vector<8x8xf32>
    %70 = tpu.matmul %69, %55, %cst_21 {dimension_numbers = #tpu.dot_dimension_numbers<[1], [0], [0], [1], [0, 0, 1, 1], [], []>} : vector<8x8xbf16>, vector<8x8xbf16>, vector<8x8xf32> -> vector<8x8xf32>
    %71 = vector.extract_strided_slice %14 {offsets = [0, 24], sizes = [8, 8], strides = [1, 1]} : vector<8x32xbf16> to vector<8x8xbf16>
    %72 = vector.extract_strided_slice %15 {offsets = [0, 24], sizes = [8, 8], strides = [1, 1]} : vector<8x32xbf16> to vector<8x8xbf16>
    %73 = vector.extract_strided_slice %16 {offsets = [0, 24], sizes = [8, 8], strides = [1, 1]} : vector<8x32xbf16> to vector<8x8xbf16>
    %cst_22 = arith.constant dense<0.000000e+00> : vector<8x8xf32>
    %74 = tpu.matmul %71, %72, %cst_22 {dimension_numbers = #tpu.dot_dimension_numbers<[1], [1], [0], [0], [0, 0, 1, 0], [], []>} : vector<8x8xbf16>, vector<8x8xbf16>, vector<8x8xf32> -> vector<8x8xf32>
    %75 = vector.broadcast %11 : vector<1x8xf32> to vector<8x8xf32>
    %76 = arith.addf %74, %75 : vector<8x8xf32>
    %cst_23 = arith.constant dense<0xFF800000> : vector<8xf32>
    %77 = vector.multi_reduction <maximumf>, %76, %cst_23 [1] : vector<8x8xf32> to vector<8xf32>
    %78 = vector.shape_cast %77 : vector<8xf32> to vector<8x1xf32>
    %79 = vector.broadcast %78 : vector<8x1xf32> to vector<8x8xf32>
    %80 = arith.subf %76, %79 : vector<8x8xf32>
    %81 = math.exp %80 : vector<8x8xf32>
    %cst_24 = arith.constant dense<0.000000e+00> : vector<8xf32>
    %82 = vector.multi_reduction <add>, %81, %cst_24 [1] : vector<8x8xf32> to vector<8xf32>
    %83 = vector.shape_cast %82 : vector<8xf32> to vector<8x1xf32>
    %84 = tpu.reciprocal %83 {approx = true} : vector<8x1xf32> -> vector<8x1xf32>
    %85 = vector.broadcast %84 : vector<8x1xf32> to vector<8x8xf32>
    %86 = arith.mulf %81, %85 : vector<8x8xf32>
    %87 = arith.truncf %86 : vector<8x8xf32> to vector<8x8xbf16>
    %cst_25 = arith.constant dense<0.000000e+00> : vector<8x8xf32>
    %88 = tpu.matmul %87, %73, %cst_25 {dimension_numbers = #tpu.dot_dimension_numbers<[1], [0], [0], [1], [0, 0, 1, 1], [], []>} : vector<8x8xbf16>, vector<8x8xbf16>, vector<8x8xf32> -> vector<8x8xf32>
    %89 = tpu.concatenate %34, %52, %70, %88 in 1 : vector<8x8xf32>, vector<8x8xf32>, vector<8x8xf32>, vector<8x8xf32> -> vector<8x32xf32>
    %90 = arith.truncf %89 : vector<8x32xf32> to vector<8x32xbf16>
    %c0_26 = arith.constant 0 : index
    %c0_27 = arith.constant 0 : index
    %91 = vector.load %arg4[%c0_26, %c0_27] : memref<32x32xbf16, #tpu.memory_space<vmem>>, vector<32x32xbf16>
    %cst_28 = arith.constant dense<0.000000e+00> : vector<8x32xf32>
    %92 = tpu.matmul %90, %91, %cst_28 {dimension_numbers = #tpu.dot_dimension_numbers<[1], [0], [0], [1], [0, 0, 1, 1], [], []>} : vector<8x32xbf16>, vector<32x32xbf16>, vector<8x32xf32> -> vector<8x32xf32>
    %c0_29 = arith.constant 0 : index
    %c0_30 = arith.constant 0 : index
    %93 = vector.load %arg5[%c0_29, %c0_30] : memref<1x32xf32, #tpu.memory_space<vmem>>, vector<1x32xf32>
    %94 = vector.broadcast %93 : vector<1x32xf32> to vector<8x32xf32>
    %95 = arith.addf %92, %94 : vector<8x32xf32>
    %96 = arith.extf %1 : vector<8x32xbf16> to vector<8x32xf32>
    %97 = arith.addf %95, %96 : vector<8x32xf32>
    %c0_31 = arith.constant 0 : index
    %c0_32 = arith.constant 0 : index
    %98 = vector.load %arg7[%c0_31, %c0_32] : memref<1x32xf32, #tpu.memory_space<vmem>>, vector<1x32xf32>
    %c0_33 = arith.constant 0 : index
    %c0_34 = arith.constant 0 : index
    %99 = vector.load %arg8[%c0_33, %c0_34] : memref<1x32xf32, #tpu.memory_space<vmem>>, vector<1x32xf32>
    %cst_35 = arith.constant dense<0.000000e+00> : vector<8xf32>
    %100 = vector.multi_reduction <add>, %97, %cst_35 [1] : vector<8x32xf32> to vector<8xf32>
    %101 = vector.shape_cast %100 : vector<8xf32> to vector<8x1xf32>
    %cst_36 = arith.constant 3.200000e+01 : f32
    %102 = vector.broadcast %cst_36 : f32 to vector<8x1xf32>
    %103 = arith.divf %101, %102 : vector<8x1xf32>
    %104 = vector.broadcast %103 : vector<8x1xf32> to vector<8x32xf32>
    %105 = arith.subf %97, %104 : vector<8x32xf32>
    %106 = arith.mulf %105, %105 : vector<8x32xf32>
    %cst_37 = arith.constant dense<0.000000e+00> : vector<8xf32>
    %107 = vector.multi_reduction <add>, %106, %cst_37 [1] : vector<8x32xf32> to vector<8xf32>
    %108 = vector.shape_cast %107 : vector<8xf32> to vector<8x1xf32>
    %cst_38 = arith.constant 3.200000e+01 : f32
    %109 = vector.broadcast %cst_38 : f32 to vector<8x1xf32>
    %110 = arith.divf %108, %109 : vector<8x1xf32>
    %111 = vector.broadcast %103 : vector<8x1xf32> to vector<8x32xf32>
    %112 = arith.subf %97, %111 : vector<8x32xf32>
    %cst_39 = arith.constant 9.99999974E-6 : f32
    %113 = vector.broadcast %cst_39 : f32 to vector<8x1xf32>
    %114 = arith.addf %110, %113 : vector<8x1xf32>
    %115 = math.rsqrt %114 : vector<8x1xf32>
    %116 = vector.broadcast %115 : vector<8x1xf32> to vector<8x32xf32>
    %117 = arith.mulf %112, %116 : vector<8x32xf32>
    %118 = vector.broadcast %98 : vector<1x32xf32> to vector<8x32xf32>
    %119 = arith.mulf %117, %118 : vector<8x32xf32>
    %120 = vector.broadcast %99 : vector<1x32xf32> to vector<8x32xf32>
    %121 = arith.addf %119, %120 : vector<8x32xf32>
    %122 = arith.truncf %121 : vector<8x32xf32> to vector<8x32xbf16>
    %c0_40 = arith.constant 0 : index
    %c0_41 = arith.constant 0 : index
    %c0_42 = arith.constant 0 : index
    %123 = vector.load %arg9[%c0_40, %c0_41, %c0_42] : memref<1x8x32xbf16, #tpu.memory_space<vmem>>, vector<1x8x32xbf16>
    %124 = vector.shape_cast %123 : vector<1x8x32xbf16> to vector<8x32xbf16>
    %125 = vector.shape_cast %122 : vector<8x32xbf16> to vector<1x8x32xbf16>
    tpu.vector_store %arg9[%c0_40, %c0_41, %c0_42], %125 {strides = array<i32>} : memref<1x8x32xbf16, #tpu.memory_space<vmem>>, vector<1x8x32xbf16>,
    return
  }
  func.func @transform_0(%arg0: i32) -> (i32, i32, i32) {
    %c0_i32 = arith.constant 0 : i32
    %c0_i32_0 = arith.constant 0 : i32
    %c0_i32_1 = arith.constant 0 : i32
    return %arg0, %c0_i32, %c0_i32_0 : i32, i32, i32
  }
  func.func @transform_1(%arg0: i32) -> (i32, i32) {
    %c0_i32 = arith.constant 0 : i32
    %c0_i32_0 = arith.constant 0 : i32
    %c0_i32_1 = arith.constant 0 : i32
    return %c0_i32, %c0_i32_0 : i32, i32
  }
  func.func @transform_2(%arg0: i32) -> (i32, i32) {
    %c0_i32 = arith.constant 0 : i32
    %c0_i32_0 = arith.constant 0 : i32
    %c0_i32_1 = arith.constant 0 : i32
    return %c0_i32, %c0_i32_0 : i32, i32
  }
  func.func @transform_3(%arg0: i32) -> (i32, i32) {
    %c0_i32 = arith.constant 0 : i32
    %c0_i32_0 = arith.constant 0 : i32
    %c0_i32_1 = arith.constant 0 : i32
    return %c0_i32, %c0_i32_0 : i32, i32
  }
  func.func @transform_4(%arg0: i32) -> (i32, i32) {
    %c0_i32 = arith.constant 0 : i32
    %c0_i32_0 = arith.constant 0 : i32
    %c0_i32_1 = arith.constant 0 : i32
    return %c0_i32, %c0_i32_0 : i32, i32
  }
  func.func @transform_5(%arg0: i32) -> (i32, i32, i32) {
    %c0_i32 = arith.constant 0 : i32
    %c0_i32_0 = arith.constant 0 : i32
    %c0_i32_1 = arith.constant 0 : i32
    return %arg0, %c0_i32, %c0_i32_0 : i32, i32, i32
  }
  func.func @transform_6(%arg0: i32) -> (i32, i32) {
    %c0_i32 = arith.constant 0 : i32
    %c0_i32_0 = arith.constant 0 : i32
    %c0_i32_1 = arith.constant 0 : i32
    return %c0_i32, %c0_i32_0 : i32, i32
  }
  func.func @transform_7(%arg0: i32) -> (i32, i32) {
    %c0_i32 = arith.constant 0 : i32
    %c0_i32_0 = arith.constant 0 : i32
    %c0_i32_1 = arith.constant 0 : i32
    return %c0_i32, %c0_i32_0 : i32, i32
  }
  func.func @transform_8(%arg0: i32) -> (i32, i32, i32) {
    %c0_i32 = arith.constant 0 : i32
    %c0_i32_0 = arith.constant 0 : i32
    %c0_i32_1 = arith.constant 0 : i32
    return %arg0, %c0_i32, %c0_i32_0 : i32, i32, i32
  }
}

module attributes {stable_mosaic.version = 11 : i64} {
  func.func @_ln_kernel(%arg0: i32, %arg1: memref<8x32xbf16, #tpu.memory_space<vmem>>, %arg2: memref<1x32xf32, #tpu.memory_space<vmem>>, %arg3: memref<1x32xf32, #tpu.memory_space<vmem>>, %arg4: memref<8x32xbf16, #tpu.memory_space<vmem>>) attributes {dimension_semantics = [#tpu.dimension_semantics<parallel>], iteration_bounds = array<i64: 2>, scalar_prefetch = 0 : i64, scratch_operands = 0 : i64, tpu.core_type = #tpu.core_type<tc>, window_params = [{transform_indices = @transform_0, window_bounds = array<i64: 8, 32>}, {pipeline_mode = #tpu.pipeline_mode<synchronous>, transform_indices = @transform_1, window_bounds = array<i64: 1, 32>}, {pipeline_mode = #tpu.pipeline_mode<synchronous>, transform_indices = @transform_2, window_bounds = array<i64: 1, 32>}, {transform_indices = @transform_3, window_bounds = array<i64: 8, 32>}]} {
    %c0 = arith.constant 0 : index
    %c0_0 = arith.constant 0 : index
    %0 = vector.load %arg1[%c0, %c0_0] : memref<8x32xbf16, #tpu.memory_space<vmem>>, vector<8x32xbf16>
    %1 = arith.extf %0 : vector<8x32xbf16> to vector<8x32xf32>
    %c0_1 = arith.constant 0 : index
    %c0_2 = arith.constant 0 : index
    %2 = vector.load %arg2[%c0_1, %c0_2] : memref<1x32xf32, #tpu.memory_space<vmem>>, vector<1x32xf32>
    %c0_3 = arith.constant 0 : index
    %c0_4 = arith.constant 0 : index
    %3 = vector.load %arg3[%c0_3, %c0_4] : memref<1x32xf32, #tpu.memory_space<vmem>>, vector<1x32xf32>
    %cst = arith.constant dense<0.000000e+00> : vector<8xf32>
    %4 = vector.multi_reduction <add>, %1, %cst [1] : vector<8x32xf32> to vector<8xf32>
    %5 = vector.shape_cast %4 : vector<8xf32> to vector<8x1xf32>
    %cst_5 = arith.constant 3.200000e+01 : f32
    %6 = vector.broadcast %cst_5 : f32 to vector<8x1xf32>
    %7 = arith.divf %5, %6 : vector<8x1xf32>
    %8 = vector.broadcast %7 : vector<8x1xf32> to vector<8x32xf32>
    %9 = arith.subf %1, %8 : vector<8x32xf32>
    %10 = arith.mulf %9, %9 : vector<8x32xf32>
    %cst_6 = arith.constant dense<0.000000e+00> : vector<8xf32>
    %11 = vector.multi_reduction <add>, %10, %cst_6 [1] : vector<8x32xf32> to vector<8xf32>
    %12 = vector.shape_cast %11 : vector<8xf32> to vector<8x1xf32>
    %cst_7 = arith.constant 3.200000e+01 : f32
    %13 = vector.broadcast %cst_7 : f32 to vector<8x1xf32>
    %14 = arith.divf %12, %13 : vector<8x1xf32>
    %15 = vector.broadcast %7 : vector<8x1xf32> to vector<8x32xf32>
    %16 = arith.subf %1, %15 : vector<8x32xf32>
    %cst_8 = arith.constant 9.99999974E-6 : f32
    %17 = vector.broadcast %cst_8 : f32 to vector<8x1xf32>
    %18 = arith.addf %14, %17 : vector<8x1xf32>
    %19 = math.rsqrt %18 : vector<8x1xf32>
    %20 = vector.broadcast %19 : vector<8x1xf32> to vector<8x32xf32>
    %21 = arith.mulf %16, %20 : vector<8x32xf32>
    %22 = vector.broadcast %2 : vector<1x32xf32> to vector<8x32xf32>
    %23 = arith.mulf %21, %22 : vector<8x32xf32>
    %24 = vector.broadcast %3 : vector<1x32xf32> to vector<8x32xf32>
    %25 = arith.addf %23, %24 : vector<8x32xf32>
    %26 = arith.truncf %25 : vector<8x32xf32> to vector<8x32xbf16>
    %c0_9 = arith.constant 0 : index
    %c0_10 = arith.constant 0 : index
    %27 = vector.load %arg4[%c0_9, %c0_10] : memref<8x32xbf16, #tpu.memory_space<vmem>>, vector<8x32xbf16>
    tpu.vector_store %arg4[%c0_9, %c0_10], %26 {strides = array<i32>} : memref<8x32xbf16, #tpu.memory_space<vmem>>, vector<8x32xbf16>,
    return
  }
  func.func @transform_0(%arg0: i32) -> (i32, i32) {
    %c0_i32 = arith.constant 0 : i32
    %c0_i32_0 = arith.constant 0 : i32
    return %arg0, %c0_i32 : i32, i32
  }
  func.func @transform_1(%arg0: i32) -> (i32, i32) {
    %c0_i32 = arith.constant 0 : i32
    %c0_i32_0 = arith.constant 0 : i32
    %c0_i32_1 = arith.constant 0 : i32
    return %c0_i32, %c0_i32_0 : i32, i32
  }
  func.func @transform_2(%arg0: i32) -> (i32, i32) {
    %c0_i32 = arith.constant 0 : i32
    %c0_i32_0 = arith.constant 0 : i32
    %c0_i32_1 = arith.constant 0 : i32
    return %c0_i32, %c0_i32_0 : i32, i32
  }
  func.func @transform_3(%arg0: i32) -> (i32, i32) {
    %c0_i32 = arith.constant 0 : i32
    %c0_i32_0 = arith.constant 0 : i32
    return %arg0, %c0_i32 : i32, i32
  }
}

module attributes {stable_mosaic.version = 11 : i64} {
  func.func @_self_attn_block_kernel(%arg0: i32, %arg1: memref<1x8x32xbf16, #tpu.memory_space<vmem>>, %arg2: memref<32x96xbf16, #tpu.memory_space<vmem>>, %arg3: memref<1x96xf32, #tpu.memory_space<vmem>>, %arg4: memref<32x32xbf16, #tpu.memory_space<vmem>>, %arg5: memref<1x32xf32, #tpu.memory_space<vmem>>, %arg6: memref<1x1x8xf32, #tpu.memory_space<vmem>>, %arg7: memref<1x32xf32, #tpu.memory_space<vmem>>, %arg8: memref<1x32xf32, #tpu.memory_space<vmem>>, %arg9: memref<1x8x32xbf16, #tpu.memory_space<vmem>>) attributes {dimension_semantics = [#tpu.dimension_semantics<parallel>], iteration_bounds = array<i64: 2>, scalar_prefetch = 0 : i64, scratch_operands = 0 : i64, tpu.core_type = #tpu.core_type<tc>, window_params = [{transform_indices = @transform_0, window_bounds = array<i64: 1, 8, 32>}, {pipeline_mode = #tpu.pipeline_mode<synchronous>, transform_indices = @transform_1, window_bounds = array<i64: 32, 96>}, {pipeline_mode = #tpu.pipeline_mode<synchronous>, transform_indices = @transform_2, window_bounds = array<i64: 1, 96>}, {pipeline_mode = #tpu.pipeline_mode<synchronous>, transform_indices = @transform_3, window_bounds = array<i64: 32, 32>}, {pipeline_mode = #tpu.pipeline_mode<synchronous>, transform_indices = @transform_4, window_bounds = array<i64: 1, 32>}, {transform_indices = @transform_5, window_bounds = array<i64: 1, 1, 8>}, {pipeline_mode = #tpu.pipeline_mode<synchronous>, transform_indices = @transform_6, window_bounds = array<i64: 1, 32>}, {pipeline_mode = #tpu.pipeline_mode<synchronous>, transform_indices = @transform_7, window_bounds = array<i64: 1, 32>}, {transform_indices = @transform_8, window_bounds = array<i64: 1, 8, 32>}]} {
    %c0 = arith.constant 0 : index
    %c0_0 = arith.constant 0 : index
    %c0_1 = arith.constant 0 : index
    %0 = vector.load %arg1[%c0, %c0_0, %c0_1] : memref<1x8x32xbf16, #tpu.memory_space<vmem>>, vector<1x8x32xbf16>
    %1 = vector.shape_cast %0 : vector<1x8x32xbf16> to vector<8x32xbf16>
    %c0_2 = arith.constant 0 : index
    %c0_3 = arith.constant 0 : index
    %2 = vector.load %arg2[%c0_2, %c0_3] : memref<32x96xbf16, #tpu.memory_space<vmem>>, vector<32x96xbf16>
    %cst = arith.constant dense<0.000000e+00> : vector<8x96xf32>
    %3 = tpu.matmul %1, %2, %cst {dimension_numbers = #tpu.dot_dimension_numbers<[1], [0], [0], [1], [0, 0, 1, 1], [], []>} : vector<8x32xbf16>, vector<32x96xbf16>, vector<8x96xf32> -> vector<8x96xf32>
    %c0_4 = arith.constant 0 : index
    %c0_5 = arith.constant 0 : index
    %4 = vector.load %arg3[%c0_4, %c0_5] : memref<1x96xf32, #tpu.memory_space<vmem>>, vector<1x96xf32>
    %5 = vector.broadcast %4 : vector<1x96xf32> to vector<8x96xf32>
    %6 = arith.addf %3, %5 : vector<8x96xf32>
    %7 = vector.extract_strided_slice %6 {offsets = [0, 0], sizes = [8, 32], strides = [1, 1]} : vector<8x96xf32> to vector<8x32xf32>
    %8 = vector.extract_strided_slice %6 {offsets = [0, 32], sizes = [8, 32], strides = [1, 1]} : vector<8x96xf32> to vector<8x32xf32>
    %9 = vector.extract_strided_slice %6 {offsets = [0, 64], sizes = [8, 32], strides = [1, 1]} : vector<8x96xf32> to vector<8x32xf32>
    %c0_6 = arith.constant 0 : index
    %c0_7 = arith.constant 0 : index
    %c0_8 = arith.constant 0 : index
    %10 = vector.load %arg6[%c0_6, %c0_7, %c0_8] : memref<1x1x8xf32, #tpu.memory_space<vmem>>, vector<1x1x8xf32>
    %11 = vector.shape_cast %10 : vector<1x1x8xf32> to vector<1x8xf32>
    %12 = tpu.iota {dimensions = array<i32: 0>} : vector<8x8xi32>
    %13 = tpu.iota {dimensions = array<i32: 1>} : vector<8x8xi32>
    %14 = arith.cmpi sgt, %13, %12 : vector<8x8xi32>
    %cst_9 = arith.constant 0.353553385 : f32
    %15 = vector.broadcast %cst_9 : f32 to vector<8x32xf32>
    %16 = arith.mulf %7, %15 : vector<8x32xf32>
    %17 = arith.truncf %16 : vector<8x32xf32> to vector<8x32xbf16>
    %18 = arith.truncf %8 : vector<8x32xf32> to vector<8x32xbf16>
    %19 = arith.truncf %9 : vector<8x32xf32> to vector<8x32xbf16>
    %20 = vector.extract_strided_slice %17 {offsets = [0, 0], sizes = [8, 8], strides = [1, 1]} : vector<8x32xbf16> to vector<8x8xbf16>
    %21 = vector.extract_strided_slice %18 {offsets = [0, 0], sizes = [8, 8], strides = [1, 1]} : vector<8x32xbf16> to vector<8x8xbf16>
    %22 = vector.extract_strided_slice %19 {offsets = [0, 0], sizes = [8, 8], strides = [1, 1]} : vector<8x32xbf16> to vector<8x8xbf16>
    %cst_10 = arith.constant dense<0.000000e+00> : vector<8x8xf32>
    %23 = tpu.matmul %20, %21, %cst_10 {dimension_numbers = #tpu.dot_dimension_numbers<[1], [1], [0], [0], [0, 0, 1, 0], [], []>} : vector<8x8xbf16>, vector<8x8xbf16>, vector<8x8xf32> -> vector<8x8xf32>
    %24 = vector.broadcast %11 : vector<1x8xf32> to vector<8x8xf32>
    %25 = arith.addf %23, %24 : vector<8x8xf32>
    %cst_11 = arith.constant -1.000000e+09 : f32
    %26 = vector.broadcast %cst_11 : f32 to vector<8x8xf32>
    %27 = arith.select %14, %26, %25 : vector<8x8xi1>, vector<8x8xf32>
    %cst_12 = arith.constant dense<0xFF800000> : vector<8xf32>
    %28 = vector.multi_reduction <maximumf>, %27, %cst_12 [1] : vector<8x8xf32> to vector<8xf32>
    %29 = vector.shape_cast %28 : vector<8xf32> to vector<8x1xf32>
    %30 = vector.broadcast %29 : vector<8x1xf32> to vector<8x8xf32>
    %31 = arith.subf %27, %30 : vector<8x8xf32>
    %32 = math.exp %31 : vector<8x8xf32>
    %cst_13 = arith.constant dense<0.000000e+00> : vector<8xf32>
    %33 = vector.multi_reduction <add>, %32, %cst_13 [1] : vector<8x8xf32> to vector<8xf32>
    %34 = vector.shape_cast %33 : vector<8xf32> to vector<8x1xf32>
    %35 = tpu.reciprocal %34 {approx = true} : vector<8x1xf32> -> vector<8x1xf32>
    %36 = vector.broadcast %35 : vector<8x1xf32> to vector<8x8xf32>
    %37 = arith.mulf %32, %36 : vector<8x8xf32>
    %38 = arith.truncf %37 : vector<8x8xf32> to vector<8x8xbf16>
    %cst_14 = arith.constant dense<0.000000e+00> : vector<8x8xf32>
    %39 = tpu.matmul %38, %22, %cst_14 {dimension_numbers = #tpu.dot_dimension_numbers<[1], [0], [0], [1], [0, 0, 1, 1], [], []>} : vector<8x8xbf16>, vector<8x8xbf16>, vector<8x8xf32> -> vector<8x8xf32>
    %40 = vector.extract_strided_slice %17 {offsets = [0, 8], sizes = [8, 8], strides = [1, 1]} : vector<8x32xbf16> to vector<8x8xbf16>
    %41 = vector.extract_strided_slice %18 {offsets = [0, 8], sizes = [8, 8], strides = [1, 1]} : vector<8x32xbf16> to vector<8x8xbf16>
    %42 = vector.extract_strided_slice %19 {offsets = [0, 8], sizes = [8, 8], strides = [1, 1]} : vector<8x32xbf16> to vector<8x8xbf16>
    %cst_15 = arith.constant dense<0.000000e+00> : vector<8x8xf32>
    %43 = tpu.matmul %40, %41, %cst_15 {dimension_numbers = #tpu.dot_dimension_numbers<[1], [1], [0], [0], [0, 0, 1, 0], [], []>} : vector<8x8xbf16>, vector<8x8xbf16>, vector<8x8xf32> -> vector<8x8xf32>
    %44 = vector.broadcast %11 : vector<1x8xf32> to vector<8x8xf32>
    %45 = arith.addf %43, %44 : vector<8x8xf32>
    %cst_16 = arith.constant -1.000000e+09 : f32
    %46 = vector.broadcast %cst_16 : f32 to vector<8x8xf32>
    %47 = arith.select %14, %46, %45 : vector<8x8xi1>, vector<8x8xf32>
    %cst_17 = arith.constant dense<0xFF800000> : vector<8xf32>
    %48 = vector.multi_reduction <maximumf>, %47, %cst_17 [1] : vector<8x8xf32> to vector<8xf32>
    %49 = vector.shape_cast %48 : vector<8xf32> to vector<8x1xf32>
    %50 = vector.broadcast %49 : vector<8x1xf32> to vector<8x8xf32>
    %51 = arith.subf %47, %50 : vector<8x8xf32>
    %52 = math.exp %51 : vector<8x8xf32>
    %cst_18 = arith.constant dense<0.000000e+00> : vector<8xf32>
    %53 = vector.multi_reduction <add>, %52, %cst_18 [1] : vector<8x8xf32> to vector<8xf32>
    %54 = vector.shape_cast %53 : vector<8xf32> to vector<8x1xf32>
    %55 = tpu.reciprocal %54 {approx = true} : vector<8x1xf32> -> vector<8x1xf32>
    %56 = vector.broadcast %55 : vector<8x1xf32> to vector<8x8xf32>
    %57 = arith.mulf %52, %56 : vector<8x8xf32>
    %58 = arith.truncf %57 : vector<8x8xf32> to vector<8x8xbf16>
    %cst_19 = arith.constant dense<0.000000e+00> : vector<8x8xf32>
    %59 = tpu.matmul %58, %42, %cst_19 {dimension_numbers = #tpu.dot_dimension_numbers<[1], [0], [0], [1], [0, 0, 1, 1], [], []>} : vector<8x8xbf16>, vector<8x8xbf16>, vector<8x8xf32> -> vector<8x8xf32>
    %60 = vector.extract_strided_slice %17 {offsets = [0, 16], sizes = [8, 8], strides = [1, 1]} : vector<8x32xbf16> to vector<8x8xbf16>
    %61 = vector.extract_strided_slice %18 {offsets = [0, 16], sizes = [8, 8], strides = [1, 1]} : vector<8x32xbf16> to vector<8x8xbf16>
    %62 = vector.extract_strided_slice %19 {offsets = [0, 16], sizes = [8, 8], strides = [1, 1]} : vector<8x32xbf16> to vector<8x8xbf16>
    %cst_20 = arith.constant dense<0.000000e+00> : vector<8x8xf32>
    %63 = tpu.matmul %60, %61, %cst_20 {dimension_numbers = #tpu.dot_dimension_numbers<[1], [1], [0], [0], [0, 0, 1, 0], [], []>} : vector<8x8xbf16>, vector<8x8xbf16>, vector<8x8xf32> -> vector<8x8xf32>
    %64 = vector.broadcast %11 : vector<1x8xf32> to vector<8x8xf32>
    %65 = arith.addf %63, %64 : vector<8x8xf32>
    %cst_21 = arith.constant -1.000000e+09 : f32
    %66 = vector.broadcast %cst_21 : f32 to vector<8x8xf32>
    %67 = arith.select %14, %66, %65 : vector<8x8xi1>, vector<8x8xf32>
    %cst_22 = arith.constant dense<0xFF800000> : vector<8xf32>
    %68 = vector.multi_reduction <maximumf>, %67, %cst_22 [1] : vector<8x8xf32> to vector<8xf32>
    %69 = vector.shape_cast %68 : vector<8xf32> to vector<8x1xf32>
    %70 = vector.broadcast %69 : vector<8x1xf32> to vector<8x8xf32>
    %71 = arith.subf %67, %70 : vector<8x8xf32>
    %72 = math.exp %71 : vector<8x8xf32>
    %cst_23 = arith.constant dense<0.000000e+00> : vector<8xf32>
    %73 = vector.multi_reduction <add>, %72, %cst_23 [1] : vector<8x8xf32> to vector<8xf32>
    %74 = vector.shape_cast %73 : vector<8xf32> to vector<8x1xf32>
    %75 = tpu.reciprocal %74 {approx = true} : vector<8x1xf32> -> vector<8x1xf32>
    %76 = vector.broadcast %75 : vector<8x1xf32> to vector<8x8xf32>
    %77 = arith.mulf %72, %76 : vector<8x8xf32>
    %78 = arith.truncf %77 : vector<8x8xf32> to vector<8x8xbf16>
    %cst_24 = arith.constant dense<0.000000e+00> : vector<8x8xf32>
    %79 = tpu.matmul %78, %62, %cst_24 {dimension_numbers = #tpu.dot_dimension_numbers<[1], [0], [0], [1], [0, 0, 1, 1], [], []>} : vector<8x8xbf16>, vector<8x8xbf16>, vector<8x8xf32> -> vector<8x8xf32>
    %80 = vector.extract_strided_slice %17 {offsets = [0, 24], sizes = [8, 8], strides = [1, 1]} : vector<8x32xbf16> to vector<8x8xbf16>
    %81 = vector.extract_strided_slice %18 {offsets = [0, 24], sizes = [8, 8], strides = [1, 1]} : vector<8x32xbf16> to vector<8x8xbf16>
    %82 = vector.extract_strided_slice %19 {offsets = [0, 24], sizes = [8, 8], strides = [1, 1]} : vector<8x32xbf16> to vector<8x8xbf16>
    %cst_25 = arith.constant dense<0.000000e+00> : vector<8x8xf32>
    %83 = tpu.matmul %80, %81, %cst_25 {dimension_numbers = #tpu.dot_dimension_numbers<[1], [1], [0], [0], [0, 0, 1, 0], [], []>} : vector<8x8xbf16>, vector<8x8xbf16>, vector<8x8xf32> -> vector<8x8xf32>
    %84 = vector.broadcast %11 : vector<1x8xf32> to vector<8x8xf32>
    %85 = arith.addf %83, %84 : vector<8x8xf32>
    %cst_26 = arith.constant -1.000000e+09 : f32
    %86 = vector.broadcast %cst_26 : f32 to vector<8x8xf32>
    %87 = arith.select %14, %86, %85 : vector<8x8xi1>, vector<8x8xf32>
    %cst_27 = arith.constant dense<0xFF800000> : vector<8xf32>
    %88 = vector.multi_reduction <maximumf>, %87, %cst_27 [1] : vector<8x8xf32> to vector<8xf32>
    %89 = vector.shape_cast %88 : vector<8xf32> to vector<8x1xf32>
    %90 = vector.broadcast %89 : vector<8x1xf32> to vector<8x8xf32>
    %91 = arith.subf %87, %90 : vector<8x8xf32>
    %92 = math.exp %91 : vector<8x8xf32>
    %cst_28 = arith.constant dense<0.000000e+00> : vector<8xf32>
    %93 = vector.multi_reduction <add>, %92, %cst_28 [1] : vector<8x8xf32> to vector<8xf32>
    %94 = vector.shape_cast %93 : vector<8xf32> to vector<8x1xf32>
    %95 = tpu.reciprocal %94 {approx = true} : vector<8x1xf32> -> vector<8x1xf32>
    %96 = vector.broadcast %95 : vector<8x1xf32> to vector<8x8xf32>
    %97 = arith.mulf %92, %96 : vector<8x8xf32>
    %98 = arith.truncf %97 : vector<8x8xf32> to vector<8x8xbf16>
    %cst_29 = arith.constant dense<0.000000e+00> : vector<8x8xf32>
    %99 = tpu.matmul %98, %82, %cst_29 {dimension_numbers = #tpu.dot_dimension_numbers<[1], [0], [0], [1], [0, 0, 1, 1], [], []>} : vector<8x8xbf16>, vector<8x8xbf16>, vector<8x8xf32> -> vector<8x8xf32>
    %100 = tpu.concatenate %39, %59, %79, %99 in 1 : vector<8x8xf32>, vector<8x8xf32>, vector<8x8xf32>, vector<8x8xf32> -> vector<8x32xf32>
    %101 = arith.truncf %100 : vector<8x32xf32> to vector<8x32xbf16>
    %c0_30 = arith.constant 0 : index
    %c0_31 = arith.constant 0 : index
    %102 = vector.load %arg4[%c0_30, %c0_31] : memref<32x32xbf16, #tpu.memory_space<vmem>>, vector<32x32xbf16>
    %cst_32 = arith.constant dense<0.000000e+00> : vector<8x32xf32>
    %103 = tpu.matmul %101, %102, %cst_32 {dimension_numbers = #tpu.dot_dimension_numbers<[1], [0], [0], [1], [0, 0, 1, 1], [], []>} : vector<8x32xbf16>, vector<32x32xbf16>, vector<8x32xf32> -> vector<8x32xf32>
    %c0_33 = arith.constant 0 : index
    %c0_34 = arith.constant 0 : index
    %104 = vector.load %arg5[%c0_33, %c0_34] : memref<1x32xf32, #tpu.memory_space<vmem>>, vector<1x32xf32>
    %105 = vector.broadcast %104 : vector<1x32xf32> to vector<8x32xf32>
    %106 = arith.addf %103, %105 : vector<8x32xf32>
    %107 = arith.extf %1 : vector<8x32xbf16> to vector<8x32xf32>
    %108 = arith.addf %106, %107 : vector<8x32xf32>
    %c0_35 = arith.constant 0 : index
    %c0_36 = arith.constant 0 : index
    %109 = vector.load %arg7[%c0_35, %c0_36] : memref<1x32xf32, #tpu.memory_space<vmem>>, vector<1x32xf32>
    %c0_37 = arith.constant 0 : index
    %c0_38 = arith.constant 0 : index
    %110 = vector.load %arg8[%c0_37, %c0_38] : memref<1x32xf32, #tpu.memory_space<vmem>>, vector<1x32xf32>
    %cst_39 = arith.constant dense<0.000000e+00> : vector<8xf32>
    %111 = vector.multi_reduction <add>, %108, %cst_39 [1] : vector<8x32xf32> to vector<8xf32>
    %112 = vector.shape_cast %111 : vector<8xf32> to vector<8x1xf32>
    %cst_40 = arith.constant 3.200000e+01 : f32
    %113 = vector.broadcast %cst_40 : f32 to vector<8x1xf32>
    %114 = arith.divf %112, %113 : vector<8x1xf32>
    %115 = vector.broadcast %114 : vector<8x1xf32> to vector<8x32xf32>
    %116 = arith.subf %108, %115 : vector<8x32xf32>
    %117 = arith.mulf %116, %116 : vector<8x32xf32>
    %cst_41 = arith.constant dense<0.000000e+00> : vector<8xf32>
    %118 = vector.multi_reduction <add>, %117, %cst_41 [1] : vector<8x32xf32> to vector<8xf32>
    %119 = vector.shape_cast %118 : vector<8xf32> to vector<8x1xf32>
    %cst_42 = arith.constant 3.200000e+01 : f32
    %120 = vector.broadcast %cst_42 : f32 to vector<8x1xf32>
    %121 = arith.divf %119, %120 : vector<8x1xf32>
    %122 = vector.broadcast %114 : vector<8x1xf32> to vector<8x32xf32>
    %123 = arith.subf %108, %122 : vector<8x32xf32>
    %cst_43 = arith.constant 9.99999974E-6 : f32
    %124 = vector.broadcast %cst_43 : f32 to vector<8x1xf32>
    %125 = arith.addf %121, %124 : vector<8x1xf32>
    %126 = math.rsqrt %125 : vector<8x1xf32>
    %127 = vector.broadcast %126 : vector<8x1xf32> to vector<8x32xf32>
    %128 = arith.mulf %123, %127 : vector<8x32xf32>
    %129 = vector.broadcast %109 : vector<1x32xf32> to vector<8x32xf32>
    %130 = arith.mulf %128, %129 : vector<8x32xf32>
    %131 = vector.broadcast %110 : vector<1x32xf32> to vector<8x32xf32>
    %132 = arith.addf %130, %131 : vector<8x32xf32>
    %133 = arith.truncf %132 : vector<8x32xf32> to vector<8x32xbf16>
    %c0_44 = arith.constant 0 : index
    %c0_45 = arith.constant 0 : index
    %c0_46 = arith.constant 0 : index
    %134 = vector.load %arg9[%c0_44, %c0_45, %c0_46] : memref<1x8x32xbf16, #tpu.memory_space<vmem>>, vector<1x8x32xbf16>
    %135 = vector.shape_cast %134 : vector<1x8x32xbf16> to vector<8x32xbf16>
    %136 = vector.shape_cast %133 : vector<8x32xbf16> to vector<1x8x32xbf16>
    tpu.vector_store %arg9[%c0_44, %c0_45, %c0_46], %136 {strides = array<i32>} : memref<1x8x32xbf16, #tpu.memory_space<vmem>>, vector<1x8x32xbf16>,
    return
  }
  func.func @transform_0(%arg0: i32) -> (i32, i32, i32) {
    %c0_i32 = arith.constant 0 : i32
    %c0_i32_0 = arith.constant 0 : i32
    %c0_i32_1 = arith.constant 0 : i32
    return %arg0, %c0_i32, %c0_i32_0 : i32, i32, i32
  }
  func.func @transform_1(%arg0: i32) -> (i32, i32) {
    %c0_i32 = arith.constant 0 : i32
    %c0_i32_0 = arith.constant 0 : i32
    %c0_i32_1 = arith.constant 0 : i32
    return %c0_i32, %c0_i32_0 : i32, i32
  }
  func.func @transform_2(%arg0: i32) -> (i32, i32) {
    %c0_i32 = arith.constant 0 : i32
    %c0_i32_0 = arith.constant 0 : i32
    %c0_i32_1 = arith.constant 0 : i32
    return %c0_i32, %c0_i32_0 : i32, i32
  }
  func.func @transform_3(%arg0: i32) -> (i32, i32) {
    %c0_i32 = arith.constant 0 : i32
    %c0_i32_0 = arith.constant 0 : i32
    %c0_i32_1 = arith.constant 0 : i32
    return %c0_i32, %c0_i32_0 : i32, i32
  }
  func.func @transform_4(%arg0: i32) -> (i32, i32) {
    %c0_i32 = arith.constant 0 : i32
    %c0_i32_0 = arith.constant 0 : i32
    %c0_i32_1 = arith.constant 0 : i32
    return %c0_i32, %c0_i32_0 : i32, i32
  }
  func.func @transform_5(%arg0: i32) -> (i32, i32, i32) {
    %c0_i32 = arith.constant 0 : i32
    %c0_i32_0 = arith.constant 0 : i32
    %c0_i32_1 = arith.constant 0 : i32
    return %arg0, %c0_i32, %c0_i32_0 : i32, i32, i32
  }
  func.func @transform_6(%arg0: i32) -> (i32, i32) {
    %c0_i32 = arith.constant 0 : i32
    %c0_i32_0 = arith.constant 0 : i32
    %c0_i32_1 = arith.constant 0 : i32
    return %c0_i32, %c0_i32_0 : i32, i32
  }
  func.func @transform_7(%arg0: i32) -> (i32, i32) {
    %c0_i32 = arith.constant 0 : i32
    %c0_i32_0 = arith.constant 0 : i32
    %c0_i32_1 = arith.constant 0 : i32
    return %c0_i32, %c0_i32_0 : i32, i32
  }
  func.func @transform_8(%arg0: i32) -> (i32, i32, i32) {
    %c0_i32 = arith.constant 0 : i32
    %c0_i32_0 = arith.constant 0 : i32
    %c0_i32_1 = arith.constant 0 : i32
    return %arg0, %c0_i32, %c0_i32_0 : i32, i32, i32
  }
}

module attributes {stable_mosaic.version = 11 : i64} {
  func.func @_cross_attn_block_kernel(%arg0: i32, %arg1: memref<1x8x32xbf16, #tpu.memory_space<vmem>>, %arg2: memref<1x8x32xbf16, #tpu.memory_space<vmem>>, %arg3: memref<32x32xbf16, #tpu.memory_space<vmem>>, %arg4: memref<1x32xf32, #tpu.memory_space<vmem>>, %arg5: memref<32x64xbf16, #tpu.memory_space<vmem>>, %arg6: memref<1x64xf32, #tpu.memory_space<vmem>>, %arg7: memref<32x32xbf16, #tpu.memory_space<vmem>>, %arg8: memref<1x32xf32, #tpu.memory_space<vmem>>, %arg9: memref<1x1x8xf32, #tpu.memory_space<vmem>>, %arg10: memref<1x32xf32, #tpu.memory_space<vmem>>, %arg11: memref<1x32xf32, #tpu.memory_space<vmem>>, %arg12: memref<1x8x32xbf16, #tpu.memory_space<vmem>>) attributes {dimension_semantics = [#tpu.dimension_semantics<parallel>], iteration_bounds = array<i64: 2>, scalar_prefetch = 0 : i64, scratch_operands = 0 : i64, tpu.core_type = #tpu.core_type<tc>, window_params = [{transform_indices = @transform_0, window_bounds = array<i64: 1, 8, 32>}, {transform_indices = @transform_1, window_bounds = array<i64: 1, 8, 32>}, {pipeline_mode = #tpu.pipeline_mode<synchronous>, transform_indices = @transform_2, window_bounds = array<i64: 32, 32>}, {pipeline_mode = #tpu.pipeline_mode<synchronous>, transform_indices = @transform_3, window_bounds = array<i64: 1, 32>}, {pipeline_mode = #tpu.pipeline_mode<synchronous>, transform_indices = @transform_4, window_bounds = array<i64: 32, 64>}, {pipeline_mode = #tpu.pipeline_mode<synchronous>, transform_indices = @transform_5, window_bounds = array<i64: 1, 64>}, {pipeline_mode = #tpu.pipeline_mode<synchronous>, transform_indices = @transform_6, window_bounds = array<i64: 32, 32>}, {pipeline_mode = #tpu.pipeline_mode<synchronous>, transform_indices = @transform_7, window_bounds = array<i64: 1, 32>}, {transform_indices = @transform_8, window_bounds = array<i64: 1, 1, 8>}, {pipeline_mode = #tpu.pipeline_mode<synchronous>, transform_indices = @transform_9, window_bounds = array<i64: 1, 32>}, {pipeline_mode = #tpu.pipeline_mode<synchronous>, transform_indices = @transform_10, window_bounds = array<i64: 1, 32>}, {transform_indices = @transform_11, window_bounds = array<i64: 1, 8, 32>}]} {
    %c0 = arith.constant 0 : index
    %c0_0 = arith.constant 0 : index
    %c0_1 = arith.constant 0 : index
    %0 = vector.load %arg1[%c0, %c0_0, %c0_1] : memref<1x8x32xbf16, #tpu.memory_space<vmem>>, vector<1x8x32xbf16>
    %1 = vector.shape_cast %0 : vector<1x8x32xbf16> to vector<8x32xbf16>
    %c0_2 = arith.constant 0 : index
    %c0_3 = arith.constant 0 : index
    %c0_4 = arith.constant 0 : index
    %2 = vector.load %arg2[%c0_2, %c0_3, %c0_4] : memref<1x8x32xbf16, #tpu.memory_space<vmem>>, vector<1x8x32xbf16>
    %3 = vector.shape_cast %2 : vector<1x8x32xbf16> to vector<8x32xbf16>
    %c0_5 = arith.constant 0 : index
    %c0_6 = arith.constant 0 : index
    %4 = vector.load %arg3[%c0_5, %c0_6] : memref<32x32xbf16, #tpu.memory_space<vmem>>, vector<32x32xbf16>
    %cst = arith.constant dense<0.000000e+00> : vector<8x32xf32>
    %5 = tpu.matmul %1, %4, %cst {dimension_numbers = #tpu.dot_dimension_numbers<[1], [0], [0], [1], [0, 0, 1, 1], [], []>} : vector<8x32xbf16>, vector<32x32xbf16>, vector<8x32xf32> -> vector<8x32xf32>
    %c0_7 = arith.constant 0 : index
    %c0_8 = arith.constant 0 : index
    %6 = vector.load %arg4[%c0_7, %c0_8] : memref<1x32xf32, #tpu.memory_space<vmem>>, vector<1x32xf32>
    %7 = vector.broadcast %6 : vector<1x32xf32> to vector<8x32xf32>
    %8 = arith.addf %5, %7 : vector<8x32xf32>
    %c0_9 = arith.constant 0 : index
    %c0_10 = arith.constant 0 : index
    %9 = vector.load %arg5[%c0_9, %c0_10] : memref<32x64xbf16, #tpu.memory_space<vmem>>, vector<32x64xbf16>
    %cst_11 = arith.constant dense<0.000000e+00> : vector<8x64xf32>
    %10 = tpu.matmul %3, %9, %cst_11 {dimension_numbers = #tpu.dot_dimension_numbers<[1], [0], [0], [1], [0, 0, 1, 1], [], []>} : vector<8x32xbf16>, vector<32x64xbf16>, vector<8x64xf32> -> vector<8x64xf32>
    %c0_12 = arith.constant 0 : index
    %c0_13 = arith.constant 0 : index
    %11 = vector.load %arg6[%c0_12, %c0_13] : memref<1x64xf32, #tpu.memory_space<vmem>>, vector<1x64xf32>
    %12 = vector.broadcast %11 : vector<1x64xf32> to vector<8x64xf32>
    %13 = arith.addf %10, %12 : vector<8x64xf32>
    %14 = vector.extract_strided_slice %13 {offsets = [0, 0], sizes = [8, 32], strides = [1, 1]} : vector<8x64xf32> to vector<8x32xf32>
    %15 = vector.extract_strided_slice %13 {offsets = [0, 32], sizes = [8, 32], strides = [1, 1]} : vector<8x64xf32> to vector<8x32xf32>
    %c0_14 = arith.constant 0 : index
    %c0_15 = arith.constant 0 : index
    %c0_16 = arith.constant 0 : index
    %16 = vector.load %arg9[%c0_14, %c0_15, %c0_16] : memref<1x1x8xf32, #tpu.memory_space<vmem>>, vector<1x1x8xf32>
    %17 = vector.shape_cast %16 : vector<1x1x8xf32> to vector<1x8xf32>
    %cst_17 = arith.constant 0.353553385 : f32
    %18 = vector.broadcast %cst_17 : f32 to vector<8x32xf32>
    %19 = arith.mulf %8, %18 : vector<8x32xf32>
    %20 = arith.truncf %19 : vector<8x32xf32> to vector<8x32xbf16>
    %21 = arith.truncf %14 : vector<8x32xf32> to vector<8x32xbf16>
    %22 = arith.truncf %15 : vector<8x32xf32> to vector<8x32xbf16>
    %23 = vector.extract_strided_slice %20 {offsets = [0, 0], sizes = [8, 8], strides = [1, 1]} : vector<8x32xbf16> to vector<8x8xbf16>
    %24 = vector.extract_strided_slice %21 {offsets = [0, 0], sizes = [8, 8], strides = [1, 1]} : vector<8x32xbf16> to vector<8x8xbf16>
    %25 = vector.extract_strided_slice %22 {offsets = [0, 0], sizes = [8, 8], strides = [1, 1]} : vector<8x32xbf16> to vector<8x8xbf16>
    %cst_18 = arith.constant dense<0.000000e+00> : vector<8x8xf32>
    %26 = tpu.matmul %23, %24, %cst_18 {dimension_numbers = #tpu.dot_dimension_numbers<[1], [1], [0], [0], [0, 0, 1, 0], [], []>} : vector<8x8xbf16>, vector<8x8xbf16>, vector<8x8xf32> -> vector<8x8xf32>
    %27 = vector.broadcast %17 : vector<1x8xf32> to vector<8x8xf32>
    %28 = arith.addf %26, %27 : vector<8x8xf32>
    %cst_19 = arith.constant dense<0xFF800000> : vector<8xf32>
    %29 = vector.multi_reduction <maximumf>, %28, %cst_19 [1] : vector<8x8xf32> to vector<8xf32>
    %30 = vector.shape_cast %29 : vector<8xf32> to vector<8x1xf32>
    %31 = vector.broadcast %30 : vector<8x1xf32> to vector<8x8xf32>
    %32 = arith.subf %28, %31 : vector<8x8xf32>
    %33 = math.exp %32 : vector<8x8xf32>
    %cst_20 = arith.constant dense<0.000000e+00> : vector<8xf32>
    %34 = vector.multi_reduction <add>, %33, %cst_20 [1] : vector<8x8xf32> to vector<8xf32>
    %35 = vector.shape_cast %34 : vector<8xf32> to vector<8x1xf32>
    %36 = tpu.reciprocal %35 {approx = true} : vector<8x1xf32> -> vector<8x1xf32>
    %37 = vector.broadcast %36 : vector<8x1xf32> to vector<8x8xf32>
    %38 = arith.mulf %33, %37 : vector<8x8xf32>
    %39 = arith.truncf %38 : vector<8x8xf32> to vector<8x8xbf16>
    %cst_21 = arith.constant dense<0.000000e+00> : vector<8x8xf32>
    %40 = tpu.matmul %39, %25, %cst_21 {dimension_numbers = #tpu.dot_dimension_numbers<[1], [0], [0], [1], [0, 0, 1, 1], [], []>} : vector<8x8xbf16>, vector<8x8xbf16>, vector<8x8xf32> -> vector<8x8xf32>
    %41 = vector.extract_strided_slice %20 {offsets = [0, 8], sizes = [8, 8], strides = [1, 1]} : vector<8x32xbf16> to vector<8x8xbf16>
    %42 = vector.extract_strided_slice %21 {offsets = [0, 8], sizes = [8, 8], strides = [1, 1]} : vector<8x32xbf16> to vector<8x8xbf16>
    %43 = vector.extract_strided_slice %22 {offsets = [0, 8], sizes = [8, 8], strides = [1, 1]} : vector<8x32xbf16> to vector<8x8xbf16>
    %cst_22 = arith.constant dense<0.000000e+00> : vector<8x8xf32>
    %44 = tpu.matmul %41, %42, %cst_22 {dimension_numbers = #tpu.dot_dimension_numbers<[1], [1], [0], [0], [0, 0, 1, 0], [], []>} : vector<8x8xbf16>, vector<8x8xbf16>, vector<8x8xf32> -> vector<8x8xf32>
    %45 = vector.broadcast %17 : vector<1x8xf32> to vector<8x8xf32>
    %46 = arith.addf %44, %45 : vector<8x8xf32>
    %cst_23 = arith.constant dense<0xFF800000> : vector<8xf32>
    %47 = vector.multi_reduction <maximumf>, %46, %cst_23 [1] : vector<8x8xf32> to vector<8xf32>
    %48 = vector.shape_cast %47 : vector<8xf32> to vector<8x1xf32>
    %49 = vector.broadcast %48 : vector<8x1xf32> to vector<8x8xf32>
    %50 = arith.subf %46, %49 : vector<8x8xf32>
    %51 = math.exp %50 : vector<8x8xf32>
    %cst_24 = arith.constant dense<0.000000e+00> : vector<8xf32>
    %52 = vector.multi_reduction <add>, %51, %cst_24 [1] : vector<8x8xf32> to vector<8xf32>
    %53 = vector.shape_cast %52 : vector<8xf32> to vector<8x1xf32>
    %54 = tpu.reciprocal %53 {approx = true} : vector<8x1xf32> -> vector<8x1xf32>
    %55 = vector.broadcast %54 : vector<8x1xf32> to vector<8x8xf32>
    %56 = arith.mulf %51, %55 : vector<8x8xf32>
    %57 = arith.truncf %56 : vector<8x8xf32> to vector<8x8xbf16>
    %cst_25 = arith.constant dense<0.000000e+00> : vector<8x8xf32>
    %58 = tpu.matmul %57, %43, %cst_25 {dimension_numbers = #tpu.dot_dimension_numbers<[1], [0], [0], [1], [0, 0, 1, 1], [], []>} : vector<8x8xbf16>, vector<8x8xbf16>, vector<8x8xf32> -> vector<8x8xf32>
    %59 = vector.extract_strided_slice %20 {offsets = [0, 16], sizes = [8, 8], strides = [1, 1]} : vector<8x32xbf16> to vector<8x8xbf16>
    %60 = vector.extract_strided_slice %21 {offsets = [0, 16], sizes = [8, 8], strides = [1, 1]} : vector<8x32xbf16> to vector<8x8xbf16>
    %61 = vector.extract_strided_slice %22 {offsets = [0, 16], sizes = [8, 8], strides = [1, 1]} : vector<8x32xbf16> to vector<8x8xbf16>
    %cst_26 = arith.constant dense<0.000000e+00> : vector<8x8xf32>
    %62 = tpu.matmul %59, %60, %cst_26 {dimension_numbers = #tpu.dot_dimension_numbers<[1], [1], [0], [0], [0, 0, 1, 0], [], []>} : vector<8x8xbf16>, vector<8x8xbf16>, vector<8x8xf32> -> vector<8x8xf32>
    %63 = vector.broadcast %17 : vector<1x8xf32> to vector<8x8xf32>
    %64 = arith.addf %62, %63 : vector<8x8xf32>
    %cst_27 = arith.constant dense<0xFF800000> : vector<8xf32>
    %65 = vector.multi_reduction <maximumf>, %64, %cst_27 [1] : vector<8x8xf32> to vector<8xf32>
    %66 = vector.shape_cast %65 : vector<8xf32> to vector<8x1xf32>
    %67 = vector.broadcast %66 : vector<8x1xf32> to vector<8x8xf32>
    %68 = arith.subf %64, %67 : vector<8x8xf32>
    %69 = math.exp %68 : vector<8x8xf32>
    %cst_28 = arith.constant dense<0.000000e+00> : vector<8xf32>
    %70 = vector.multi_reduction <add>, %69, %cst_28 [1] : vector<8x8xf32> to vector<8xf32>
    %71 = vector.shape_cast %70 : vector<8xf32> to vector<8x1xf32>
    %72 = tpu.reciprocal %71 {approx = true} : vector<8x1xf32> -> vector<8x1xf32>
    %73 = vector.broadcast %72 : vector<8x1xf32> to vector<8x8xf32>
    %74 = arith.mulf %69, %73 : vector<8x8xf32>
    %75 = arith.truncf %74 : vector<8x8xf32> to vector<8x8xbf16>
    %cst_29 = arith.constant dense<0.000000e+00> : vector<8x8xf32>
    %76 = tpu.matmul %75, %61, %cst_29 {dimension_numbers = #tpu.dot_dimension_numbers<[1], [0], [0], [1], [0, 0, 1, 1], [], []>} : vector<8x8xbf16>, vector<8x8xbf16>, vector<8x8xf32> -> vector<8x8xf32>
    %77 = vector.extract_strided_slice %20 {offsets = [0, 24], sizes = [8, 8], strides = [1, 1]} : vector<8x32xbf16> to vector<8x8xbf16>
    %78 = vector.extract_strided_slice %21 {offsets = [0, 24], sizes = [8, 8], strides = [1, 1]} : vector<8x32xbf16> to vector<8x8xbf16>
    %79 = vector.extract_strided_slice %22 {offsets = [0, 24], sizes = [8, 8], strides = [1, 1]} : vector<8x32xbf16> to vector<8x8xbf16>
    %cst_30 = arith.constant dense<0.000000e+00> : vector<8x8xf32>
    %80 = tpu.matmul %77, %78, %cst_30 {dimension_numbers = #tpu.dot_dimension_numbers<[1], [1], [0], [0], [0, 0, 1, 0], [], []>} : vector<8x8xbf16>, vector<8x8xbf16>, vector<8x8xf32> -> vector<8x8xf32>
    %81 = vector.broadcast %17 : vector<1x8xf32> to vector<8x8xf32>
    %82 = arith.addf %80, %81 : vector<8x8xf32>
    %cst_31 = arith.constant dense<0xFF800000> : vector<8xf32>
    %83 = vector.multi_reduction <maximumf>, %82, %cst_31 [1] : vector<8x8xf32> to vector<8xf32>
    %84 = vector.shape_cast %83 : vector<8xf32> to vector<8x1xf32>
    %85 = vector.broadcast %84 : vector<8x1xf32> to vector<8x8xf32>
    %86 = arith.subf %82, %85 : vector<8x8xf32>
    %87 = math.exp %86 : vector<8x8xf32>
    %cst_32 = arith.constant dense<0.000000e+00> : vector<8xf32>
    %88 = vector.multi_reduction <add>, %87, %cst_32 [1] : vector<8x8xf32> to vector<8xf32>
    %89 = vector.shape_cast %88 : vector<8xf32> to vector<8x1xf32>
    %90 = tpu.reciprocal %89 {approx = true} : vector<8x1xf32> -> vector<8x1xf32>
    %91 = vector.broadcast %90 : vector<8x1xf32> to vector<8x8xf32>
    %92 = arith.mulf %87, %91 : vector<8x8xf32>
    %93 = arith.truncf %92 : vector<8x8xf32> to vector<8x8xbf16>
    %cst_33 = arith.constant dense<0.000000e+00> : vector<8x8xf32>
    %94 = tpu.matmul %93, %79, %cst_33 {dimension_numbers = #tpu.dot_dimension_numbers<[1], [0], [0], [1], [0, 0, 1, 1], [], []>} : vector<8x8xbf16>, vector<8x8xbf16>, vector<8x8xf32> -> vector<8x8xf32>
    %95 = tpu.concatenate %40, %58, %76, %94 in 1 : vector<8x8xf32>, vector<8x8xf32>, vector<8x8xf32>, vector<8x8xf32> -> vector<8x32xf32>
    %96 = arith.truncf %95 : vector<8x32xf32> to vector<8x32xbf16>
    %c0_34 = arith.constant 0 : index
    %c0_35 = arith.constant 0 : index
    %97 = vector.load %arg7[%c0_34, %c0_35] : memref<32x32xbf16, #tpu.memory_space<vmem>>, vector<32x32xbf16>
    %cst_36 = arith.constant dense<0.000000e+00> : vector<8x32xf32>
    %98 = tpu.matmul %96, %97, %cst_36 {dimension_numbers = #tpu.dot_dimension_numbers<[1], [0], [0], [1], [0, 0, 1, 1], [], []>} : vector<8x32xbf16>, vector<32x32xbf16>, vector<8x32xf32> -> vector<8x32xf32>
    %c0_37 = arith.constant 0 : index
    %c0_38 = arith.constant 0 : index
    %99 = vector.load %arg8[%c0_37, %c0_38] : memref<1x32xf32, #tpu.memory_space<vmem>>, vector<1x32xf32>
    %100 = vector.broadcast %99 : vector<1x32xf32> to vector<8x32xf32>
    %101 = arith.addf %98, %100 : vector<8x32xf32>
    %102 = arith.extf %1 : vector<8x32xbf16> to vector<8x32xf32>
    %103 = arith.addf %101, %102 : vector<8x32xf32>
    %c0_39 = arith.constant 0 : index
    %c0_40 = arith.constant 0 : index
    %104 = vector.load %arg10[%c0_39, %c0_40] : memref<1x32xf32, #tpu.memory_space<vmem>>, vector<1x32xf32>
    %c0_41 = arith.constant 0 : index
    %c0_42 = arith.constant 0 : index
    %105 = vector.load %arg11[%c0_41, %c0_42] : memref<1x32xf32, #tpu.memory_space<vmem>>, vector<1x32xf32>
    %cst_43 = arith.constant dense<0.000000e+00> : vector<8xf32>
    %106 = vector.multi_reduction <add>, %103, %cst_43 [1] : vector<8x32xf32> to vector<8xf32>
    %107 = vector.shape_cast %106 : vector<8xf32> to vector<8x1xf32>
    %cst_44 = arith.constant 3.200000e+01 : f32
    %108 = vector.broadcast %cst_44 : f32 to vector<8x1xf32>
    %109 = arith.divf %107, %108 : vector<8x1xf32>
    %110 = vector.broadcast %109 : vector<8x1xf32> to vector<8x32xf32>
    %111 = arith.subf %103, %110 : vector<8x32xf32>
    %112 = arith.mulf %111, %111 : vector<8x32xf32>
    %cst_45 = arith.constant dense<0.000000e+00> : vector<8xf32>
    %113 = vector.multi_reduction <add>, %112, %cst_45 [1] : vector<8x32xf32> to vector<8xf32>
    %114 = vector.shape_cast %113 : vector<8xf32> to vector<8x1xf32>
    %cst_46 = arith.constant 3.200000e+01 : f32
    %115 = vector.broadcast %cst_46 : f32 to vector<8x1xf32>
    %116 = arith.divf %114, %115 : vector<8x1xf32>
    %117 = vector.broadcast %109 : vector<8x1xf32> to vector<8x32xf32>
    %118 = arith.subf %103, %117 : vector<8x32xf32>
    %cst_47 = arith.constant 9.99999974E-6 : f32
    %119 = vector.broadcast %cst_47 : f32 to vector<8x1xf32>
    %120 = arith.addf %116, %119 : vector<8x1xf32>
    %121 = math.rsqrt %120 : vector<8x1xf32>
    %122 = vector.broadcast %121 : vector<8x1xf32> to vector<8x32xf32>
    %123 = arith.mulf %118, %122 : vector<8x32xf32>
    %124 = vector.broadcast %104 : vector<1x32xf32> to vector<8x32xf32>
    %125 = arith.mulf %123, %124 : vector<8x32xf32>
    %126 = vector.broadcast %105 : vector<1x32xf32> to vector<8x32xf32>
    %127 = arith.addf %125, %126 : vector<8x32xf32>
    %128 = arith.truncf %127 : vector<8x32xf32> to vector<8x32xbf16>
    %c0_48 = arith.constant 0 : index
    %c0_49 = arith.constant 0 : index
    %c0_50 = arith.constant 0 : index
    %129 = vector.load %arg12[%c0_48, %c0_49, %c0_50] : memref<1x8x32xbf16, #tpu.memory_space<vmem>>, vector<1x8x32xbf16>
    %130 = vector.shape_cast %129 : vector<1x8x32xbf16> to vector<8x32xbf16>
    %131 = vector.shape_cast %128 : vector<8x32xbf16> to vector<1x8x32xbf16>
    tpu.vector_store %arg12[%c0_48, %c0_49, %c0_50], %131 {strides = array<i32>} : memref<1x8x32xbf16, #tpu.memory_space<vmem>>, vector<1x8x32xbf16>,
    return
  }
  func.func @transform_0(%arg0: i32) -> (i32, i32, i32) {
    %c0_i32 = arith.constant 0 : i32
    %c0_i32_0 = arith.constant 0 : i32
    %c0_i32_1 = arith.constant 0 : i32
    return %arg0, %c0_i32, %c0_i32_0 : i32, i32, i32
  }
  func.func @transform_1(%arg0: i32) -> (i32, i32, i32) {
    %c0_i32 = arith.constant 0 : i32
    %c0_i32_0 = arith.constant 0 : i32
    %c0_i32_1 = arith.constant 0 : i32
    return %arg0, %c0_i32, %c0_i32_0 : i32, i32, i32
  }
  func.func @transform_2(%arg0: i32) -> (i32, i32) {
    %c0_i32 = arith.constant 0 : i32
    %c0_i32_0 = arith.constant 0 : i32
    %c0_i32_1 = arith.constant 0 : i32
    return %c0_i32, %c0_i32_0 : i32, i32
  }
  func.func @transform_3(%arg0: i32) -> (i32, i32) {
    %c0_i32 = arith.constant 0 : i32
    %c0_i32_0 = arith.constant 0 : i32
    %c0_i32_1 = arith.constant 0 : i32
    return %c0_i32, %c0_i32_0 : i32, i32
  }
  func.func @transform_4(%arg0: i32) -> (i32, i32) {
    %c0_i32 = arith.constant 0 : i32
    %c0_i32_0 = arith.constant 0 : i32
    %c0_i32_1 = arith.constant 0 : i32
    return %c0_i32, %c0_i32_0 : i32, i32
  }
  func.func @transform_5(%arg0: i32) -> (i32, i32) {
    %c0_i32 = arith.constant 0 : i32
    %c0_i32_0 = arith.constant 0 : i32
    %c0_i32_1 = arith.constant 0 : i32
    return %c0_i32, %c0_i32_0 : i32, i32
  }
  func.func @transform_6(%arg0: i32) -> (i32, i32) {
    %c0_i32 = arith.constant 0 : i32
    %c0_i32_0 = arith.constant 0 : i32
    %c0_i32_1 = arith.constant 0 : i32
    return %c0_i32, %c0_i32_0 : i32, i32
  }
  func.func @transform_7(%arg0: i32) -> (i32, i32) {
    %c0_i32 = arith.constant 0 : i32
    %c0_i32_0 = arith.constant 0 : i32
    %c0_i32_1 = arith.constant 0 : i32
    return %c0_i32, %c0_i32_0 : i32, i32
  }
  func.func @transform_8(%arg0: i32) -> (i32, i32, i32) {
    %c0_i32 = arith.constant 0 : i32
    %c0_i32_0 = arith.constant 0 : i32
    %c0_i32_1 = arith.constant 0 : i32
    return %arg0, %c0_i32, %c0_i32_0 : i32, i32, i32
  }
  func.func @transform_9(%arg0: i32) -> (i32, i32) {
    %c0_i32 = arith.constant 0 : i32
    %c0_i32_0 = arith.constant 0 : i32
    %c0_i32_1 = arith.constant 0 : i32
    return %c0_i32, %c0_i32_0 : i32, i32
  }
  func.func @transform_10(%arg0: i32) -> (i32, i32) {
    %c0_i32 = arith.constant 0 : i32
    %c0_i32_0 = arith.constant 0 : i32
    %c0_i32_1 = arith.constant 0 : i32
    return %c0_i32, %c0_i32_0 : i32, i32
  }
  func.func @transform_11(%arg0: i32) -> (i32, i32, i32) {
    %c0_i32 = arith.constant 0 : i32
    %c0_i32_0 = arith.constant 0 : i32
    %c0_i32_1 = arith.constant 0 : i32
    return %arg0, %c0_i32, %c0_i32_0 : i32, i32, i32
  }
}

module attributes {stable_mosaic.version = 11 : i64} {
  func.func @_ffn_block_kernel(%arg0: i32, %arg1: memref<8x32xbf16, #tpu.memory_space<vmem>>, %arg2: memref<32x64xbf16, #tpu.memory_space<vmem>>, %arg3: memref<1x64xf32, #tpu.memory_space<vmem>>, %arg4: memref<64x32xbf16, #tpu.memory_space<vmem>>, %arg5: memref<1x32xf32, #tpu.memory_space<vmem>>, %arg6: memref<1x32xf32, #tpu.memory_space<vmem>>, %arg7: memref<1x32xf32, #tpu.memory_space<vmem>>, %arg8: memref<8x32xbf16, #tpu.memory_space<vmem>>) attributes {dimension_semantics = [#tpu.dimension_semantics<parallel>], iteration_bounds = array<i64: 2>, scalar_prefetch = 0 : i64, scratch_operands = 0 : i64, tpu.core_type = #tpu.core_type<tc>, window_params = [{transform_indices = @transform_0, window_bounds = array<i64: 8, 32>}, {pipeline_mode = #tpu.pipeline_mode<synchronous>, transform_indices = @transform_1, window_bounds = array<i64: 32, 64>}, {pipeline_mode = #tpu.pipeline_mode<synchronous>, transform_indices = @transform_2, window_bounds = array<i64: 1, 64>}, {pipeline_mode = #tpu.pipeline_mode<synchronous>, transform_indices = @transform_3, window_bounds = array<i64: 64, 32>}, {pipeline_mode = #tpu.pipeline_mode<synchronous>, transform_indices = @transform_4, window_bounds = array<i64: 1, 32>}, {pipeline_mode = #tpu.pipeline_mode<synchronous>, transform_indices = @transform_5, window_bounds = array<i64: 1, 32>}, {pipeline_mode = #tpu.pipeline_mode<synchronous>, transform_indices = @transform_6, window_bounds = array<i64: 1, 32>}, {transform_indices = @transform_7, window_bounds = array<i64: 8, 32>}]} {
    %c0 = arith.constant 0 : index
    %c0_0 = arith.constant 0 : index
    %0 = vector.load %arg1[%c0, %c0_0] : memref<8x32xbf16, #tpu.memory_space<vmem>>, vector<8x32xbf16>
    %c0_1 = arith.constant 0 : index
    %c0_2 = arith.constant 0 : index
    %1 = vector.load %arg2[%c0_1, %c0_2] : memref<32x64xbf16, #tpu.memory_space<vmem>>, vector<32x64xbf16>
    %cst = arith.constant dense<0.000000e+00> : vector<8x64xf32>
    %2 = tpu.matmul %0, %1, %cst {dimension_numbers = #tpu.dot_dimension_numbers<[1], [0], [0], [1], [0, 0, 1, 1], [], []>} : vector<8x32xbf16>, vector<32x64xbf16>, vector<8x64xf32> -> vector<8x64xf32>
    %c0_3 = arith.constant 0 : index
    %c0_4 = arith.constant 0 : index
    %3 = vector.load %arg3[%c0_3, %c0_4] : memref<1x64xf32, #tpu.memory_space<vmem>>, vector<1x64xf32>
    %4 = vector.broadcast %3 : vector<1x64xf32> to vector<8x64xf32>
    %5 = arith.addf %2, %4 : vector<8x64xf32>
    %cst_5 = arith.constant 0.000000e+00 : f32
    %6 = vector.broadcast %cst_5 : f32 to vector<8x64xf32>
    %7 = arith.maximumf %5, %6 : vector<8x64xf32>
    %8 = arith.truncf %7 : vector<8x64xf32> to vector<8x64xbf16>
    %c0_6 = arith.constant 0 : index
    %c0_7 = arith.constant 0 : index
    %9 = vector.load %arg4[%c0_6, %c0_7] : memref<64x32xbf16, #tpu.memory_space<vmem>>, vector<64x32xbf16>
    %cst_8 = arith.constant dense<0.000000e+00> : vector<8x32xf32>
    %10 = tpu.matmul %8, %9, %cst_8 {dimension_numbers = #tpu.dot_dimension_numbers<[1], [0], [0], [1], [0, 0, 1, 1], [], []>} : vector<8x64xbf16>, vector<64x32xbf16>, vector<8x32xf32> -> vector<8x32xf32>
    %c0_9 = arith.constant 0 : index
    %c0_10 = arith.constant 0 : index
    %11 = vector.load %arg5[%c0_9, %c0_10] : memref<1x32xf32, #tpu.memory_space<vmem>>, vector<1x32xf32>
    %12 = vector.broadcast %11 : vector<1x32xf32> to vector<8x32xf32>
    %13 = arith.addf %10, %12 : vector<8x32xf32>
    %14 = arith.extf %0 : vector<8x32xbf16> to vector<8x32xf32>
    %15 = arith.addf %13, %14 : vector<8x32xf32>
    %c0_11 = arith.constant 0 : index
    %c0_12 = arith.constant 0 : index
    %16 = vector.load %arg6[%c0_11, %c0_12] : memref<1x32xf32, #tpu.memory_space<vmem>>, vector<1x32xf32>
    %c0_13 = arith.constant 0 : index
    %c0_14 = arith.constant 0 : index
    %17 = vector.load %arg7[%c0_13, %c0_14] : memref<1x32xf32, #tpu.memory_space<vmem>>, vector<1x32xf32>
    %cst_15 = arith.constant dense<0.000000e+00> : vector<8xf32>
    %18 = vector.multi_reduction <add>, %15, %cst_15 [1] : vector<8x32xf32> to vector<8xf32>
    %19 = vector.shape_cast %18 : vector<8xf32> to vector<8x1xf32>
    %cst_16 = arith.constant 3.200000e+01 : f32
    %20 = vector.broadcast %cst_16 : f32 to vector<8x1xf32>
    %21 = arith.divf %19, %20 : vector<8x1xf32>
    %22 = vector.broadcast %21 : vector<8x1xf32> to vector<8x32xf32>
    %23 = arith.subf %15, %22 : vector<8x32xf32>
    %24 = arith.mulf %23, %23 : vector<8x32xf32>
    %cst_17 = arith.constant dense<0.000000e+00> : vector<8xf32>
    %25 = vector.multi_reduction <add>, %24, %cst_17 [1] : vector<8x32xf32> to vector<8xf32>
    %26 = vector.shape_cast %25 : vector<8xf32> to vector<8x1xf32>
    %cst_18 = arith.constant 3.200000e+01 : f32
    %27 = vector.broadcast %cst_18 : f32 to vector<8x1xf32>
    %28 = arith.divf %26, %27 : vector<8x1xf32>
    %29 = vector.broadcast %21 : vector<8x1xf32> to vector<8x32xf32>
    %30 = arith.subf %15, %29 : vector<8x32xf32>
    %cst_19 = arith.constant 9.99999974E-6 : f32
    %31 = vector.broadcast %cst_19 : f32 to vector<8x1xf32>
    %32 = arith.addf %28, %31 : vector<8x1xf32>
    %33 = math.rsqrt %32 : vector<8x1xf32>
    %34 = vector.broadcast %33 : vector<8x1xf32> to vector<8x32xf32>
    %35 = arith.mulf %30, %34 : vector<8x32xf32>
    %36 = vector.broadcast %16 : vector<1x32xf32> to vector<8x32xf32>
    %37 = arith.mulf %35, %36 : vector<8x32xf32>
    %38 = vector.broadcast %17 : vector<1x32xf32> to vector<8x32xf32>
    %39 = arith.addf %37, %38 : vector<8x32xf32>
    %40 = arith.truncf %39 : vector<8x32xf32> to vector<8x32xbf16>
    %c0_20 = arith.constant 0 : index
    %c0_21 = arith.constant 0 : index
    %41 = vector.load %arg8[%c0_20, %c0_21] : memref<8x32xbf16, #tpu.memory_space<vmem>>, vector<8x32xbf16>
    tpu.vector_store %arg8[%c0_20, %c0_21], %40 {strides = array<i32>} : memref<8x32xbf16, #tpu.memory_space<vmem>>, vector<8x32xbf16>,
    return
  }
  func.func @transform_0(%arg0: i32) -> (i32, i32) {
    %c0_i32 = arith.constant 0 : i32
    %c0_i32_0 = arith.constant 0 : i32
    return %arg0, %c0_i32 : i32, i32
  }
  func.func @transform_1(%arg0: i32) -> (i32, i32) {
    %c0_i32 = arith.constant 0 : i32
    %c0_i32_0 = arith.constant 0 : i32
    %c0_i32_1 = arith.constant 0 : i32
    return %c0_i32, %c0_i32_0 : i32, i32
  }
  func.func @transform_2(%arg0: i32) -> (i32, i32) {
    %c0_i32 = arith.constant 0 : i32
    %c0_i32_0 = arith.constant 0 : i32
    %c0_i32_1 = arith.constant 0 : i32
    return %c0_i32, %c0_i32_0 : i32, i32
  }
  func.func @transform_3(%arg0: i32) -> (i32, i32) {
    %c0_i32 = arith.constant 0 : i32
    %c0_i32_0 = arith.constant 0 : i32
    %c0_i32_1 = arith.constant 0 : i32
    return %c0_i32, %c0_i32_0 : i32, i32
  }
  func.func @transform_4(%arg0: i32) -> (i32, i32) {
    %c0_i32 = arith.constant 0 : i32
    %c0_i32_0 = arith.constant 0 : i32
    %c0_i32_1 = arith.constant 0 : i32
    return %c0_i32, %c0_i32_0 : i32, i32
  }
  func.func @transform_5(%arg0: i32) -> (i32, i32) {
    %c0_i32 = arith.constant 0 : i32
    %c0_i32_0 = arith.constant 0 : i32
    %c0_i32_1 = arith.constant 0 : i32
    return %c0_i32, %c0_i32_0 : i32, i32
  }
  func.func @transform_6(%arg0: i32) -> (i32, i32) {
    %c0_i32 = arith.constant 0 : i32
    %c0_i32_0 = arith.constant 0 : i32
    %c0_i32_1 = arith.constant 0 : i32
    return %c0_i32, %c0_i32_0 : i32, i32
  }
  func.func @transform_7(%arg0: i32) -> (i32, i32) {
    %c0_i32 = arith.constant 0 : i32
    %c0_i32_0 = arith.constant 0 : i32
    return %arg0, %c0_i32 : i32, i32
  }
}

module attributes {stable_mosaic.version = 11 : i64} {
  func.func @_self_attn_block_kernel(%arg0: i32, %arg1: memref<1x8x32xbf16, #tpu.memory_space<vmem>>, %arg2: memref<32x96xbf16, #tpu.memory_space<vmem>>, %arg3: memref<1x96xf32, #tpu.memory_space<vmem>>, %arg4: memref<32x32xbf16, #tpu.memory_space<vmem>>, %arg5: memref<1x32xf32, #tpu.memory_space<vmem>>, %arg6: memref<1x1x8xf32, #tpu.memory_space<vmem>>, %arg7: memref<1x32xf32, #tpu.memory_space<vmem>>, %arg8: memref<1x32xf32, #tpu.memory_space<vmem>>, %arg9: memref<1x8x32xbf16, #tpu.memory_space<vmem>>) attributes {dimension_semantics = [#tpu.dimension_semantics<parallel>], iteration_bounds = array<i64: 2>, scalar_prefetch = 0 : i64, scratch_operands = 0 : i64, tpu.core_type = #tpu.core_type<tc>, window_params = [{transform_indices = @transform_0, window_bounds = array<i64: 1, 8, 32>}, {pipeline_mode = #tpu.pipeline_mode<synchronous>, transform_indices = @transform_1, window_bounds = array<i64: 32, 96>}, {pipeline_mode = #tpu.pipeline_mode<synchronous>, transform_indices = @transform_2, window_bounds = array<i64: 1, 96>}, {pipeline_mode = #tpu.pipeline_mode<synchronous>, transform_indices = @transform_3, window_bounds = array<i64: 32, 32>}, {pipeline_mode = #tpu.pipeline_mode<synchronous>, transform_indices = @transform_4, window_bounds = array<i64: 1, 32>}, {transform_indices = @transform_5, window_bounds = array<i64: 1, 1, 8>}, {pipeline_mode = #tpu.pipeline_mode<synchronous>, transform_indices = @transform_6, window_bounds = array<i64: 1, 32>}, {pipeline_mode = #tpu.pipeline_mode<synchronous>, transform_indices = @transform_7, window_bounds = array<i64: 1, 32>}, {transform_indices = @transform_8, window_bounds = array<i64: 1, 8, 32>}]} {
    %c0 = arith.constant 0 : index
    %c0_0 = arith.constant 0 : index
    %c0_1 = arith.constant 0 : index
    %0 = vector.load %arg1[%c0, %c0_0, %c0_1] : memref<1x8x32xbf16, #tpu.memory_space<vmem>>, vector<1x8x32xbf16>
    %1 = vector.shape_cast %0 : vector<1x8x32xbf16> to vector<8x32xbf16>
    %c0_2 = arith.constant 0 : index
    %c0_3 = arith.constant 0 : index
    %2 = vector.load %arg2[%c0_2, %c0_3] : memref<32x96xbf16, #tpu.memory_space<vmem>>, vector<32x96xbf16>
    %cst = arith.constant dense<0.000000e+00> : vector<8x96xf32>
    %3 = tpu.matmul %1, %2, %cst {dimension_numbers = #tpu.dot_dimension_numbers<[1], [0], [0], [1], [0, 0, 1, 1], [], []>} : vector<8x32xbf16>, vector<32x96xbf16>, vector<8x96xf32> -> vector<8x96xf32>
    %c0_4 = arith.constant 0 : index
    %c0_5 = arith.constant 0 : index
    %4 = vector.load %arg3[%c0_4, %c0_5] : memref<1x96xf32, #tpu.memory_space<vmem>>, vector<1x96xf32>
    %5 = vector.broadcast %4 : vector<1x96xf32> to vector<8x96xf32>
    %6 = arith.addf %3, %5 : vector<8x96xf32>
    %7 = vector.extract_strided_slice %6 {offsets = [0, 0], sizes = [8, 32], strides = [1, 1]} : vector<8x96xf32> to vector<8x32xf32>
    %8 = vector.extract_strided_slice %6 {offsets = [0, 32], sizes = [8, 32], strides = [1, 1]} : vector<8x96xf32> to vector<8x32xf32>
    %9 = vector.extract_strided_slice %6 {offsets = [0, 64], sizes = [8, 32], strides = [1, 1]} : vector<8x96xf32> to vector<8x32xf32>
    %c0_6 = arith.constant 0 : index
    %c0_7 = arith.constant 0 : index
    %c0_8 = arith.constant 0 : index
    %10 = vector.load %arg6[%c0_6, %c0_7, %c0_8] : memref<1x1x8xf32, #tpu.memory_space<vmem>>, vector<1x1x8xf32>
    %11 = vector.shape_cast %10 : vector<1x1x8xf32> to vector<1x8xf32>
    %12 = tpu.iota {dimensions = array<i32: 0>} : vector<8x8xi32>
    %13 = tpu.iota {dimensions = array<i32: 1>} : vector<8x8xi32>
    %14 = arith.cmpi sgt, %13, %12 : vector<8x8xi32>
    %cst_9 = arith.constant 0.353553385 : f32
    %15 = vector.broadcast %cst_9 : f32 to vector<8x32xf32>
    %16 = arith.mulf %7, %15 : vector<8x32xf32>
    %17 = arith.truncf %16 : vector<8x32xf32> to vector<8x32xbf16>
    %18 = arith.truncf %8 : vector<8x32xf32> to vector<8x32xbf16>
    %19 = arith.truncf %9 : vector<8x32xf32> to vector<8x32xbf16>
    %20 = vector.extract_strided_slice %17 {offsets = [0, 0], sizes = [8, 8], strides = [1, 1]} : vector<8x32xbf16> to vector<8x8xbf16>
    %21 = vector.extract_strided_slice %18 {offsets = [0, 0], sizes = [8, 8], strides = [1, 1]} : vector<8x32xbf16> to vector<8x8xbf16>
    %22 = vector.extract_strided_slice %19 {offsets = [0, 0], sizes = [8, 8], strides = [1, 1]} : vector<8x32xbf16> to vector<8x8xbf16>
    %cst_10 = arith.constant dense<0.000000e+00> : vector<8x8xf32>
    %23 = tpu.matmul %20, %21, %cst_10 {dimension_numbers = #tpu.dot_dimension_numbers<[1], [1], [0], [0], [0, 0, 1, 0], [], []>} : vector<8x8xbf16>, vector<8x8xbf16>, vector<8x8xf32> -> vector<8x8xf32>
    %24 = vector.broadcast %11 : vector<1x8xf32> to vector<8x8xf32>
    %25 = arith.addf %23, %24 : vector<8x8xf32>
    %cst_11 = arith.constant -1.000000e+09 : f32
    %26 = vector.broadcast %cst_11 : f32 to vector<8x8xf32>
    %27 = arith.select %14, %26, %25 : vector<8x8xi1>, vector<8x8xf32>
    %cst_12 = arith.constant dense<0xFF800000> : vector<8xf32>
    %28 = vector.multi_reduction <maximumf>, %27, %cst_12 [1] : vector<8x8xf32> to vector<8xf32>
    %29 = vector.shape_cast %28 : vector<8xf32> to vector<8x1xf32>
    %30 = vector.broadcast %29 : vector<8x1xf32> to vector<8x8xf32>
    %31 = arith.subf %27, %30 : vector<8x8xf32>
    %32 = math.exp %31 : vector<8x8xf32>
    %cst_13 = arith.constant dense<0.000000e+00> : vector<8xf32>
    %33 = vector.multi_reduction <add>, %32, %cst_13 [1] : vector<8x8xf32> to vector<8xf32>
    %34 = vector.shape_cast %33 : vector<8xf32> to vector<8x1xf32>
    %35 = tpu.reciprocal %34 {approx = true} : vector<8x1xf32> -> vector<8x1xf32>
    %36 = vector.broadcast %35 : vector<8x1xf32> to vector<8x8xf32>
    %37 = arith.mulf %32, %36 : vector<8x8xf32>
    %38 = arith.truncf %37 : vector<8x8xf32> to vector<8x8xbf16>
    %cst_14 = arith.constant dense<0.000000e+00> : vector<8x8xf32>
    %39 = tpu.matmul %38, %22, %cst_14 {dimension_numbers = #tpu.dot_dimension_numbers<[1], [0], [0], [1], [0, 0, 1, 1], [], []>} : vector<8x8xbf16>, vector<8x8xbf16>, vector<8x8xf32> -> vector<8x8xf32>
    %40 = vector.extract_strided_slice %17 {offsets = [0, 8], sizes = [8, 8], strides = [1, 1]} : vector<8x32xbf16> to vector<8x8xbf16>
    %41 = vector.extract_strided_slice %18 {offsets = [0, 8], sizes = [8, 8], strides = [1, 1]} : vector<8x32xbf16> to vector<8x8xbf16>
    %42 = vector.extract_strided_slice %19 {offsets = [0, 8], sizes = [8, 8], strides = [1, 1]} : vector<8x32xbf16> to vector<8x8xbf16>
    %cst_15 = arith.constant dense<0.000000e+00> : vector<8x8xf32>
    %43 = tpu.matmul %40, %41, %cst_15 {dimension_numbers = #tpu.dot_dimension_numbers<[1], [1], [0], [0], [0, 0, 1, 0], [], []>} : vector<8x8xbf16>, vector<8x8xbf16>, vector<8x8xf32> -> vector<8x8xf32>
    %44 = vector.broadcast %11 : vector<1x8xf32> to vector<8x8xf32>
    %45 = arith.addf %43, %44 : vector<8x8xf32>
    %cst_16 = arith.constant -1.000000e+09 : f32
    %46 = vector.broadcast %cst_16 : f32 to vector<8x8xf32>
    %47 = arith.select %14, %46, %45 : vector<8x8xi1>, vector<8x8xf32>
    %cst_17 = arith.constant dense<0xFF800000> : vector<8xf32>
    %48 = vector.multi_reduction <maximumf>, %47, %cst_17 [1] : vector<8x8xf32> to vector<8xf32>
    %49 = vector.shape_cast %48 : vector<8xf32> to vector<8x1xf32>
    %50 = vector.broadcast %49 : vector<8x1xf32> to vector<8x8xf32>
    %51 = arith.subf %47, %50 : vector<8x8xf32>
    %52 = math.exp %51 : vector<8x8xf32>
    %cst_18 = arith.constant dense<0.000000e+00> : vector<8xf32>
    %53 = vector.multi_reduction <add>, %52, %cst_18 [1] : vector<8x8xf32> to vector<8xf32>
    %54 = vector.shape_cast %53 : vector<8xf32> to vector<8x1xf32>
    %55 = tpu.reciprocal %54 {approx = true} : vector<8x1xf32> -> vector<8x1xf32>
    %56 = vector.broadcast %55 : vector<8x1xf32> to vector<8x8xf32>
    %57 = arith.mulf %52, %56 : vector<8x8xf32>
    %58 = arith.truncf %57 : vector<8x8xf32> to vector<8x8xbf16>
    %cst_19 = arith.constant dense<0.000000e+00> : vector<8x8xf32>
    %59 = tpu.matmul %58, %42, %cst_19 {dimension_numbers = #tpu.dot_dimension_numbers<[1], [0], [0], [1], [0, 0, 1, 1], [], []>} : vector<8x8xbf16>, vector<8x8xbf16>, vector<8x8xf32> -> vector<8x8xf32>
    %60 = vector.extract_strided_slice %17 {offsets = [0, 16], sizes = [8, 8], strides = [1, 1]} : vector<8x32xbf16> to vector<8x8xbf16>
    %61 = vector.extract_strided_slice %18 {offsets = [0, 16], sizes = [8, 8], strides = [1, 1]} : vector<8x32xbf16> to vector<8x8xbf16>
    %62 = vector.extract_strided_slice %19 {offsets = [0, 16], sizes = [8, 8], strides = [1, 1]} : vector<8x32xbf16> to vector<8x8xbf16>
    %cst_20 = arith.constant dense<0.000000e+00> : vector<8x8xf32>
    %63 = tpu.matmul %60, %61, %cst_20 {dimension_numbers = #tpu.dot_dimension_numbers<[1], [1], [0], [0], [0, 0, 1, 0], [], []>} : vector<8x8xbf16>, vector<8x8xbf16>, vector<8x8xf32> -> vector<8x8xf32>
    %64 = vector.broadcast %11 : vector<1x8xf32> to vector<8x8xf32>
    %65 = arith.addf %63, %64 : vector<8x8xf32>
    %cst_21 = arith.constant -1.000000e+09 : f32
    %66 = vector.broadcast %cst_21 : f32 to vector<8x8xf32>
    %67 = arith.select %14, %66, %65 : vector<8x8xi1>, vector<8x8xf32>
    %cst_22 = arith.constant dense<0xFF800000> : vector<8xf32>
    %68 = vector.multi_reduction <maximumf>, %67, %cst_22 [1] : vector<8x8xf32> to vector<8xf32>
    %69 = vector.shape_cast %68 : vector<8xf32> to vector<8x1xf32>
    %70 = vector.broadcast %69 : vector<8x1xf32> to vector<8x8xf32>
    %71 = arith.subf %67, %70 : vector<8x8xf32>
    %72 = math.exp %71 : vector<8x8xf32>
    %cst_23 = arith.constant dense<0.000000e+00> : vector<8xf32>
    %73 = vector.multi_reduction <add>, %72, %cst_23 [1] : vector<8x8xf32> to vector<8xf32>
    %74 = vector.shape_cast %73 : vector<8xf32> to vector<8x1xf32>
    %75 = tpu.reciprocal %74 {approx = true} : vector<8x1xf32> -> vector<8x1xf32>
    %76 = vector.broadcast %75 : vector<8x1xf32> to vector<8x8xf32>
    %77 = arith.mulf %72, %76 : vector<8x8xf32>
    %78 = arith.truncf %77 : vector<8x8xf32> to vector<8x8xbf16>
    %cst_24 = arith.constant dense<0.000000e+00> : vector<8x8xf32>
    %79 = tpu.matmul %78, %62, %cst_24 {dimension_numbers = #tpu.dot_dimension_numbers<[1], [0], [0], [1], [0, 0, 1, 1], [], []>} : vector<8x8xbf16>, vector<8x8xbf16>, vector<8x8xf32> -> vector<8x8xf32>
    %80 = vector.extract_strided_slice %17 {offsets = [0, 24], sizes = [8, 8], strides = [1, 1]} : vector<8x32xbf16> to vector<8x8xbf16>
    %81 = vector.extract_strided_slice %18 {offsets = [0, 24], sizes = [8, 8], strides = [1, 1]} : vector<8x32xbf16> to vector<8x8xbf16>
    %82 = vector.extract_strided_slice %19 {offsets = [0, 24], sizes = [8, 8], strides = [1, 1]} : vector<8x32xbf16> to vector<8x8xbf16>
    %cst_25 = arith.constant dense<0.000000e+00> : vector<8x8xf32>
    %83 = tpu.matmul %80, %81, %cst_25 {dimension_numbers = #tpu.dot_dimension_numbers<[1], [1], [0], [0], [0, 0, 1, 0], [], []>} : vector<8x8xbf16>, vector<8x8xbf16>, vector<8x8xf32> -> vector<8x8xf32>
    %84 = vector.broadcast %11 : vector<1x8xf32> to vector<8x8xf32>
    %85 = arith.addf %83, %84 : vector<8x8xf32>
    %cst_26 = arith.constant -1.000000e+09 : f32
    %86 = vector.broadcast %cst_26 : f32 to vector<8x8xf32>
    %87 = arith.select %14, %86, %85 : vector<8x8xi1>, vector<8x8xf32>
    %cst_27 = arith.constant dense<0xFF800000> : vector<8xf32>
    %88 = vector.multi_reduction <maximumf>, %87, %cst_27 [1] : vector<8x8xf32> to vector<8xf32>
    %89 = vector.shape_cast %88 : vector<8xf32> to vector<8x1xf32>
    %90 = vector.broadcast %89 : vector<8x1xf32> to vector<8x8xf32>
    %91 = arith.subf %87, %90 : vector<8x8xf32>
    %92 = math.exp %91 : vector<8x8xf32>
    %cst_28 = arith.constant dense<0.000000e+00> : vector<8xf32>
    %93 = vector.multi_reduction <add>, %92, %cst_28 [1] : vector<8x8xf32> to vector<8xf32>
    %94 = vector.shape_cast %93 : vector<8xf32> to vector<8x1xf32>
    %95 = tpu.reciprocal %94 {approx = true} : vector<8x1xf32> -> vector<8x1xf32>
    %96 = vector.broadcast %95 : vector<8x1xf32> to vector<8x8xf32>
    %97 = arith.mulf %92, %96 : vector<8x8xf32>
    %98 = arith.truncf %97 : vector<8x8xf32> to vector<8x8xbf16>
    %cst_29 = arith.constant dense<0.000000e+00> : vector<8x8xf32>
    %99 = tpu.matmul %98, %82, %cst_29 {dimension_numbers = #tpu.dot_dimension_numbers<[1], [0], [0], [1], [0, 0, 1, 1], [], []>} : vector<8x8xbf16>, vector<8x8xbf16>, vector<8x8xf32> -> vector<8x8xf32>
    %100 = tpu.concatenate %39, %59, %79, %99 in 1 : vector<8x8xf32>, vector<8x8xf32>, vector<8x8xf32>, vector<8x8xf32> -> vector<8x32xf32>
    %101 = arith.truncf %100 : vector<8x32xf32> to vector<8x32xbf16>
    %c0_30 = arith.constant 0 : index
    %c0_31 = arith.constant 0 : index
    %102 = vector.load %arg4[%c0_30, %c0_31] : memref<32x32xbf16, #tpu.memory_space<vmem>>, vector<32x32xbf16>
    %cst_32 = arith.constant dense<0.000000e+00> : vector<8x32xf32>
    %103 = tpu.matmul %101, %102, %cst_32 {dimension_numbers = #tpu.dot_dimension_numbers<[1], [0], [0], [1], [0, 0, 1, 1], [], []>} : vector<8x32xbf16>, vector<32x32xbf16>, vector<8x32xf32> -> vector<8x32xf32>
    %c0_33 = arith.constant 0 : index
    %c0_34 = arith.constant 0 : index
    %104 = vector.load %arg5[%c0_33, %c0_34] : memref<1x32xf32, #tpu.memory_space<vmem>>, vector<1x32xf32>
    %105 = vector.broadcast %104 : vector<1x32xf32> to vector<8x32xf32>
    %106 = arith.addf %103, %105 : vector<8x32xf32>
    %107 = arith.extf %1 : vector<8x32xbf16> to vector<8x32xf32>
    %108 = arith.addf %106, %107 : vector<8x32xf32>
    %c0_35 = arith.constant 0 : index
    %c0_36 = arith.constant 0 : index
    %109 = vector.load %arg7[%c0_35, %c0_36] : memref<1x32xf32, #tpu.memory_space<vmem>>, vector<1x32xf32>
    %c0_37 = arith.constant 0 : index
    %c0_38 = arith.constant 0 : index
    %110 = vector.load %arg8[%c0_37, %c0_38] : memref<1x32xf32, #tpu.memory_space<vmem>>, vector<1x32xf32>
    %cst_39 = arith.constant dense<0.000000e+00> : vector<8xf32>
    %111 = vector.multi_reduction <add>, %108, %cst_39 [1] : vector<8x32xf32> to vector<8xf32>
    %112 = vector.shape_cast %111 : vector<8xf32> to vector<8x1xf32>
    %cst_40 = arith.constant 3.200000e+01 : f32
    %113 = vector.broadcast %cst_40 : f32 to vector<8x1xf32>
    %114 = arith.divf %112, %113 : vector<8x1xf32>
    %115 = vector.broadcast %114 : vector<8x1xf32> to vector<8x32xf32>
    %116 = arith.subf %108, %115 : vector<8x32xf32>
    %117 = arith.mulf %116, %116 : vector<8x32xf32>
    %cst_41 = arith.constant dense<0.000000e+00> : vector<8xf32>
    %118 = vector.multi_reduction <add>, %117, %cst_41 [1] : vector<8x32xf32> to vector<8xf32>
    %119 = vector.shape_cast %118 : vector<8xf32> to vector<8x1xf32>
    %cst_42 = arith.constant 3.200000e+01 : f32
    %120 = vector.broadcast %cst_42 : f32 to vector<8x1xf32>
    %121 = arith.divf %119, %120 : vector<8x1xf32>
    %122 = vector.broadcast %114 : vector<8x1xf32> to vector<8x32xf32>
    %123 = arith.subf %108, %122 : vector<8x32xf32>
    %cst_43 = arith.constant 9.99999974E-6 : f32
    %124 = vector.broadcast %cst_43 : f32 to vector<8x1xf32>
    %125 = arith.addf %121, %124 : vector<8x1xf32>
    %126 = math.rsqrt %125 : vector<8x1xf32>
    %127 = vector.broadcast %126 : vector<8x1xf32> to vector<8x32xf32>
    %128 = arith.mulf %123, %127 : vector<8x32xf32>
    %129 = vector.broadcast %109 : vector<1x32xf32> to vector<8x32xf32>
    %130 = arith.mulf %128, %129 : vector<8x32xf32>
    %131 = vector.broadcast %110 : vector<1x32xf32> to vector<8x32xf32>
    %132 = arith.addf %130, %131 : vector<8x32xf32>
    %133 = arith.truncf %132 : vector<8x32xf32> to vector<8x32xbf16>
    %c0_44 = arith.constant 0 : index
    %c0_45 = arith.constant 0 : index
    %c0_46 = arith.constant 0 : index
    %134 = vector.load %arg9[%c0_44, %c0_45, %c0_46] : memref<1x8x32xbf16, #tpu.memory_space<vmem>>, vector<1x8x32xbf16>
    %135 = vector.shape_cast %134 : vector<1x8x32xbf16> to vector<8x32xbf16>
    %136 = vector.shape_cast %133 : vector<8x32xbf16> to vector<1x8x32xbf16>
    tpu.vector_store %arg9[%c0_44, %c0_45, %c0_46], %136 {strides = array<i32>} : memref<1x8x32xbf16, #tpu.memory_space<vmem>>, vector<1x8x32xbf16>,
    return
  }
  func.func @transform_0(%arg0: i32) -> (i32, i32, i32) {
    %c0_i32 = arith.constant 0 : i32
    %c0_i32_0 = arith.constant 0 : i32
    %c0_i32_1 = arith.constant 0 : i32
    return %arg0, %c0_i32, %c0_i32_0 : i32, i32, i32
  }
  func.func @transform_1(%arg0: i32) -> (i32, i32) {
    %c0_i32 = arith.constant 0 : i32
    %c0_i32_0 = arith.constant 0 : i32
    %c0_i32_1 = arith.constant 0 : i32
    return %c0_i32, %c0_i32_0 : i32, i32
  }
  func.func @transform_2(%arg0: i32) -> (i32, i32) {
    %c0_i32 = arith.constant 0 : i32
    %c0_i32_0 = arith.constant 0 : i32
    %c0_i32_1 = arith.constant 0 : i32
    return %c0_i32, %c0_i32_0 : i32, i32
  }
  func.func @transform_3(%arg0: i32) -> (i32, i32) {
    %c0_i32 = arith.constant 0 : i32
    %c0_i32_0 = arith.constant 0 : i32
    %c0_i32_1 = arith.constant 0 : i32
    return %c0_i32, %c0_i32_0 : i32, i32
  }
  func.func @transform_4(%arg0: i32) -> (i32, i32) {
    %c0_i32 = arith.constant 0 : i32
    %c0_i32_0 = arith.constant 0 : i32
    %c0_i32_1 = arith.constant 0 : i32
    return %c0_i32, %c0_i32_0 : i32, i32
  }
  func.func @transform_5(%arg0: i32) -> (i32, i32, i32) {
    %c0_i32 = arith.constant 0 : i32
    %c0_i32_0 = arith.constant 0 : i32
    %c0_i32_1 = arith.constant 0 : i32
    return %arg0, %c0_i32, %c0_i32_0 : i32, i32, i32
  }
  func.func @transform_6(%arg0: i32) -> (i32, i32) {
    %c0_i32 = arith.constant 0 : i32
    %c0_i32_0 = arith.constant 0 : i32
    %c0_i32_1 = arith.constant 0 : i32
    return %c0_i32, %c0_i32_0 : i32, i32
  }
  func.func @transform_7(%arg0: i32) -> (i32, i32) {
    %c0_i32 = arith.constant 0 : i32
    %c0_i32_0 = arith.constant 0 : i32
    %c0_i32_1 = arith.constant 0 : i32
    return %c0_i32, %c0_i32_0 : i32, i32
  }
  func.func @transform_8(%arg0: i32) -> (i32, i32, i32) {
    %c0_i32 = arith.constant 0 : i32
    %c0_i32_0 = arith.constant 0 : i32
    %c0_i32_1 = arith.constant 0 : i32
    return %arg0, %c0_i32, %c0_i32_0 : i32, i32, i32
  }
}

module attributes {stable_mosaic.version = 11 : i64} {
  func.func @_cross_attn_block_kernel(%arg0: i32, %arg1: memref<1x8x32xbf16, #tpu.memory_space<vmem>>, %arg2: memref<1x8x32xbf16, #tpu.memory_space<vmem>>, %arg3: memref<32x32xbf16, #tpu.memory_space<vmem>>, %arg4: memref<1x32xf32, #tpu.memory_space<vmem>>, %arg5: memref<32x64xbf16, #tpu.memory_space<vmem>>, %arg6: memref<1x64xf32, #tpu.memory_space<vmem>>, %arg7: memref<32x32xbf16, #tpu.memory_space<vmem>>, %arg8: memref<1x32xf32, #tpu.memory_space<vmem>>, %arg9: memref<1x1x8xf32, #tpu.memory_space<vmem>>, %arg10: memref<1x32xf32, #tpu.memory_space<vmem>>, %arg11: memref<1x32xf32, #tpu.memory_space<vmem>>, %arg12: memref<1x8x32xbf16, #tpu.memory_space<vmem>>) attributes {dimension_semantics = [#tpu.dimension_semantics<parallel>], iteration_bounds = array<i64: 2>, scalar_prefetch = 0 : i64, scratch_operands = 0 : i64, tpu.core_type = #tpu.core_type<tc>, window_params = [{transform_indices = @transform_0, window_bounds = array<i64: 1, 8, 32>}, {transform_indices = @transform_1, window_bounds = array<i64: 1, 8, 32>}, {pipeline_mode = #tpu.pipeline_mode<synchronous>, transform_indices = @transform_2, window_bounds = array<i64: 32, 32>}, {pipeline_mode = #tpu.pipeline_mode<synchronous>, transform_indices = @transform_3, window_bounds = array<i64: 1, 32>}, {pipeline_mode = #tpu.pipeline_mode<synchronous>, transform_indices = @transform_4, window_bounds = array<i64: 32, 64>}, {pipeline_mode = #tpu.pipeline_mode<synchronous>, transform_indices = @transform_5, window_bounds = array<i64: 1, 64>}, {pipeline_mode = #tpu.pipeline_mode<synchronous>, transform_indices = @transform_6, window_bounds = array<i64: 32, 32>}, {pipeline_mode = #tpu.pipeline_mode<synchronous>, transform_indices = @transform_7, window_bounds = array<i64: 1, 32>}, {transform_indices = @transform_8, window_bounds = array<i64: 1, 1, 8>}, {pipeline_mode = #tpu.pipeline_mode<synchronous>, transform_indices = @transform_9, window_bounds = array<i64: 1, 32>}, {pipeline_mode = #tpu.pipeline_mode<synchronous>, transform_indices = @transform_10, window_bounds = array<i64: 1, 32>}, {transform_indices = @transform_11, window_bounds = array<i64: 1, 8, 32>}]} {
    %c0 = arith.constant 0 : index
    %c0_0 = arith.constant 0 : index
    %c0_1 = arith.constant 0 : index
    %0 = vector.load %arg1[%c0, %c0_0, %c0_1] : memref<1x8x32xbf16, #tpu.memory_space<vmem>>, vector<1x8x32xbf16>
    %1 = vector.shape_cast %0 : vector<1x8x32xbf16> to vector<8x32xbf16>
    %c0_2 = arith.constant 0 : index
    %c0_3 = arith.constant 0 : index
    %c0_4 = arith.constant 0 : index
    %2 = vector.load %arg2[%c0_2, %c0_3, %c0_4] : memref<1x8x32xbf16, #tpu.memory_space<vmem>>, vector<1x8x32xbf16>
    %3 = vector.shape_cast %2 : vector<1x8x32xbf16> to vector<8x32xbf16>
    %c0_5 = arith.constant 0 : index
    %c0_6 = arith.constant 0 : index
    %4 = vector.load %arg3[%c0_5, %c0_6] : memref<32x32xbf16, #tpu.memory_space<vmem>>, vector<32x32xbf16>
    %cst = arith.constant dense<0.000000e+00> : vector<8x32xf32>
    %5 = tpu.matmul %1, %4, %cst {dimension_numbers = #tpu.dot_dimension_numbers<[1], [0], [0], [1], [0, 0, 1, 1], [], []>} : vector<8x32xbf16>, vector<32x32xbf16>, vector<8x32xf32> -> vector<8x32xf32>
    %c0_7 = arith.constant 0 : index
    %c0_8 = arith.constant 0 : index
    %6 = vector.load %arg4[%c0_7, %c0_8] : memref<1x32xf32, #tpu.memory_space<vmem>>, vector<1x32xf32>
    %7 = vector.broadcast %6 : vector<1x32xf32> to vector<8x32xf32>
    %8 = arith.addf %5, %7 : vector<8x32xf32>
    %c0_9 = arith.constant 0 : index
    %c0_10 = arith.constant 0 : index
    %9 = vector.load %arg5[%c0_9, %c0_10] : memref<32x64xbf16, #tpu.memory_space<vmem>>, vector<32x64xbf16>
    %cst_11 = arith.constant dense<0.000000e+00> : vector<8x64xf32>
    %10 = tpu.matmul %3, %9, %cst_11 {dimension_numbers = #tpu.dot_dimension_numbers<[1], [0], [0], [1], [0, 0, 1, 1], [], []>} : vector<8x32xbf16>, vector<32x64xbf16>, vector<8x64xf32> -> vector<8x64xf32>
    %c0_12 = arith.constant 0 : index
    %c0_13 = arith.constant 0 : index
    %11 = vector.load %arg6[%c0_12, %c0_13] : memref<1x64xf32, #tpu.memory_space<vmem>>, vector<1x64xf32>
    %12 = vector.broadcast %11 : vector<1x64xf32> to vector<8x64xf32>
    %13 = arith.addf %10, %12 : vector<8x64xf32>
    %14 = vector.extract_strided_slice %13 {offsets = [0, 0], sizes = [8, 32], strides = [1, 1]} : vector<8x64xf32> to vector<8x32xf32>
    %15 = vector.extract_strided_slice %13 {offsets = [0, 32], sizes = [8, 32], strides = [1, 1]} : vector<8x64xf32> to vector<8x32xf32>
    %c0_14 = arith.constant 0 : index
    %c0_15 = arith.constant 0 : index
    %c0_16 = arith.constant 0 : index
    %16 = vector.load %arg9[%c0_14, %c0_15, %c0_16] : memref<1x1x8xf32, #tpu.memory_space<vmem>>, vector<1x1x8xf32>
    %17 = vector.shape_cast %16 : vector<1x1x8xf32> to vector<1x8xf32>
    %cst_17 = arith.constant 0.353553385 : f32
    %18 = vector.broadcast %cst_17 : f32 to vector<8x32xf32>
    %19 = arith.mulf %8, %18 : vector<8x32xf32>
    %20 = arith.truncf %19 : vector<8x32xf32> to vector<8x32xbf16>
    %21 = arith.truncf %14 : vector<8x32xf32> to vector<8x32xbf16>
    %22 = arith.truncf %15 : vector<8x32xf32> to vector<8x32xbf16>
    %23 = vector.extract_strided_slice %20 {offsets = [0, 0], sizes = [8, 8], strides = [1, 1]} : vector<8x32xbf16> to vector<8x8xbf16>
    %24 = vector.extract_strided_slice %21 {offsets = [0, 0], sizes = [8, 8], strides = [1, 1]} : vector<8x32xbf16> to vector<8x8xbf16>
    %25 = vector.extract_strided_slice %22 {offsets = [0, 0], sizes = [8, 8], strides = [1, 1]} : vector<8x32xbf16> to vector<8x8xbf16>
    %cst_18 = arith.constant dense<0.000000e+00> : vector<8x8xf32>
    %26 = tpu.matmul %23, %24, %cst_18 {dimension_numbers = #tpu.dot_dimension_numbers<[1], [1], [0], [0], [0, 0, 1, 0], [], []>} : vector<8x8xbf16>, vector<8x8xbf16>, vector<8x8xf32> -> vector<8x8xf32>
    %27 = vector.broadcast %17 : vector<1x8xf32> to vector<8x8xf32>
    %28 = arith.addf %26, %27 : vector<8x8xf32>
    %cst_19 = arith.constant dense<0xFF800000> : vector<8xf32>
    %29 = vector.multi_reduction <maximumf>, %28, %cst_19 [1] : vector<8x8xf32> to vector<8xf32>
    %30 = vector.shape_cast %29 : vector<8xf32> to vector<8x1xf32>
    %31 = vector.broadcast %30 : vector<8x1xf32> to vector<8x8xf32>
    %32 = arith.subf %28, %31 : vector<8x8xf32>
    %33 = math.exp %32 : vector<8x8xf32>
    %cst_20 = arith.constant dense<0.000000e+00> : vector<8xf32>
    %34 = vector.multi_reduction <add>, %33, %cst_20 [1] : vector<8x8xf32> to vector<8xf32>
    %35 = vector.shape_cast %34 : vector<8xf32> to vector<8x1xf32>
    %36 = tpu.reciprocal %35 {approx = true} : vector<8x1xf32> -> vector<8x1xf32>
    %37 = vector.broadcast %36 : vector<8x1xf32> to vector<8x8xf32>
    %38 = arith.mulf %33, %37 : vector<8x8xf32>
    %39 = arith.truncf %38 : vector<8x8xf32> to vector<8x8xbf16>
    %cst_21 = arith.constant dense<0.000000e+00> : vector<8x8xf32>
    %40 = tpu.matmul %39, %25, %cst_21 {dimension_numbers = #tpu.dot_dimension_numbers<[1], [0], [0], [1], [0, 0, 1, 1], [], []>} : vector<8x8xbf16>, vector<8x8xbf16>, vector<8x8xf32> -> vector<8x8xf32>
    %41 = vector.extract_strided_slice %20 {offsets = [0, 8], sizes = [8, 8], strides = [1, 1]} : vector<8x32xbf16> to vector<8x8xbf16>
    %42 = vector.extract_strided_slice %21 {offsets = [0, 8], sizes = [8, 8], strides = [1, 1]} : vector<8x32xbf16> to vector<8x8xbf16>
    %43 = vector.extract_strided_slice %22 {offsets = [0, 8], sizes = [8, 8], strides = [1, 1]} : vector<8x32xbf16> to vector<8x8xbf16>
    %cst_22 = arith.constant dense<0.000000e+00> : vector<8x8xf32>
    %44 = tpu.matmul %41, %42, %cst_22 {dimension_numbers = #tpu.dot_dimension_numbers<[1], [1], [0], [0], [0, 0, 1, 0], [], []>} : vector<8x8xbf16>, vector<8x8xbf16>, vector<8x8xf32> -> vector<8x8xf32>
    %45 = vector.broadcast %17 : vector<1x8xf32> to vector<8x8xf32>
    %46 = arith.addf %44, %45 : vector<8x8xf32>
    %cst_23 = arith.constant dense<0xFF800000> : vector<8xf32>
    %47 = vector.multi_reduction <maximumf>, %46, %cst_23 [1] : vector<8x8xf32> to vector<8xf32>
    %48 = vector.shape_cast %47 : vector<8xf32> to vector<8x1xf32>
    %49 = vector.broadcast %48 : vector<8x1xf32> to vector<8x8xf32>
    %50 = arith.subf %46, %49 : vector<8x8xf32>
    %51 = math.exp %50 : vector<8x8xf32>
    %cst_24 = arith.constant dense<0.000000e+00> : vector<8xf32>
    %52 = vector.multi_reduction <add>, %51, %cst_24 [1] : vector<8x8xf32> to vector<8xf32>
    %53 = vector.shape_cast %52 : vector<8xf32> to vector<8x1xf32>
    %54 = tpu.reciprocal %53 {approx = true} : vector<8x1xf32> -> vector<8x1xf32>
    %55 = vector.broadcast %54 : vector<8x1xf32> to vector<8x8xf32>
    %56 = arith.mulf %51, %55 : vector<8x8xf32>
    %57 = arith.truncf %56 : vector<8x8xf32> to vector<8x8xbf16>
    %cst_25 = arith.constant dense<0.000000e+00> : vector<8x8xf32>
    %58 = tpu.matmul %57, %43, %cst_25 {dimension_numbers = #tpu.dot_dimension_numbers<[1], [0], [0], [1], [0, 0, 1, 1], [], []>} : vector<8x8xbf16>, vector<8x8xbf16>, vector<8x8xf32> -> vector<8x8xf32>
    %59 = vector.extract_strided_slice %20 {offsets = [0, 16], sizes = [8, 8], strides = [1, 1]} : vector<8x32xbf16> to vector<8x8xbf16>
    %60 = vector.extract_strided_slice %21 {offsets = [0, 16], sizes = [8, 8], strides = [1, 1]} : vector<8x32xbf16> to vector<8x8xbf16>
    %61 = vector.extract_strided_slice %22 {offsets = [0, 16], sizes = [8, 8], strides = [1, 1]} : vector<8x32xbf16> to vector<8x8xbf16>
    %cst_26 = arith.constant dense<0.000000e+00> : vector<8x8xf32>
    %62 = tpu.matmul %59, %60, %cst_26 {dimension_numbers = #tpu.dot_dimension_numbers<[1], [1], [0], [0], [0, 0, 1, 0], [], []>} : vector<8x8xbf16>, vector<8x8xbf16>, vector<8x8xf32> -> vector<8x8xf32>
    %63 = vector.broadcast %17 : vector<1x8xf32> to vector<8x8xf32>
    %64 = arith.addf %62, %63 : vector<8x8xf32>
    %cst_27 = arith.constant dense<0xFF800000> : vector<8xf32>
    %65 = vector.multi_reduction <maximumf>, %64, %cst_27 [1] : vector<8x8xf32> to vector<8xf32>
    %66 = vector.shape_cast %65 : vector<8xf32> to vector<8x1xf32>
    %67 = vector.broadcast %66 : vector<8x1xf32> to vector<8x8xf32>
    %68 = arith.subf %64, %67 : vector<8x8xf32>
    %69 = math.exp %68 : vector<8x8xf32>
    %cst_28 = arith.constant dense<0.000000e+00> : vector<8xf32>
    %70 = vector.multi_reduction <add>, %69, %cst_28 [1] : vector<8x8xf32> to vector<8xf32>
    %71 = vector.shape_cast %70 : vector<8xf32> to vector<8x1xf32>
    %72 = tpu.reciprocal %71 {approx = true} : vector<8x1xf32> -> vector<8x1xf32>
    %73 = vector.broadcast %72 : vector<8x1xf32> to vector<8x8xf32>
    %74 = arith.mulf %69, %73 : vector<8x8xf32>
    %75 = arith.truncf %74 : vector<8x8xf32> to vector<8x8xbf16>
    %cst_29 = arith.constant dense<0.000000e+00> : vector<8x8xf32>
    %76 = tpu.matmul %75, %61, %cst_29 {dimension_numbers = #tpu.dot_dimension_numbers<[1], [0], [0], [1], [0, 0, 1, 1], [], []>} : vector<8x8xbf16>, vector<8x8xbf16>, vector<8x8xf32> -> vector<8x8xf32>
    %77 = vector.extract_strided_slice %20 {offsets = [0, 24], sizes = [8, 8], strides = [1, 1]} : vector<8x32xbf16> to vector<8x8xbf16>
    %78 = vector.extract_strided_slice %21 {offsets = [0, 24], sizes = [8, 8], strides = [1, 1]} : vector<8x32xbf16> to vector<8x8xbf16>
    %79 = vector.extract_strided_slice %22 {offsets = [0, 24], sizes = [8, 8], strides = [1, 1]} : vector<8x32xbf16> to vector<8x8xbf16>
    %cst_30 = arith.constant dense<0.000000e+00> : vector<8x8xf32>
    %80 = tpu.matmul %77, %78, %cst_30 {dimension_numbers = #tpu.dot_dimension_numbers<[1], [1], [0], [0], [0, 0, 1, 0], [], []>} : vector<8x8xbf16>, vector<8x8xbf16>, vector<8x8xf32> -> vector<8x8xf32>
    %81 = vector.broadcast %17 : vector<1x8xf32> to vector<8x8xf32>
    %82 = arith.addf %80, %81 : vector<8x8xf32>
    %cst_31 = arith.constant dense<0xFF800000> : vector<8xf32>
    %83 = vector.multi_reduction <maximumf>, %82, %cst_31 [1] : vector<8x8xf32> to vector<8xf32>
    %84 = vector.shape_cast %83 : vector<8xf32> to vector<8x1xf32>
    %85 = vector.broadcast %84 : vector<8x1xf32> to vector<8x8xf32>
    %86 = arith.subf %82, %85 : vector<8x8xf32>
    %87 = math.exp %86 : vector<8x8xf32>
    %cst_32 = arith.constant dense<0.000000e+00> : vector<8xf32>
    %88 = vector.multi_reduction <add>, %87, %cst_32 [1] : vector<8x8xf32> to vector<8xf32>
    %89 = vector.shape_cast %88 : vector<8xf32> to vector<8x1xf32>
    %90 = tpu.reciprocal %89 {approx = true} : vector<8x1xf32> -> vector<8x1xf32>
    %91 = vector.broadcast %90 : vector<8x1xf32> to vector<8x8xf32>
    %92 = arith.mulf %87, %91 : vector<8x8xf32>
    %93 = arith.truncf %92 : vector<8x8xf32> to vector<8x8xbf16>
    %cst_33 = arith.constant dense<0.000000e+00> : vector<8x8xf32>
    %94 = tpu.matmul %93, %79, %cst_33 {dimension_numbers = #tpu.dot_dimension_numbers<[1], [0], [0], [1], [0, 0, 1, 1], [], []>} : vector<8x8xbf16>, vector<8x8xbf16>, vector<8x8xf32> -> vector<8x8xf32>
    %95 = tpu.concatenate %40, %58, %76, %94 in 1 : vector<8x8xf32>, vector<8x8xf32>, vector<8x8xf32>, vector<8x8xf32> -> vector<8x32xf32>
    %96 = arith.truncf %95 : vector<8x32xf32> to vector<8x32xbf16>
    %c0_34 = arith.constant 0 : index
    %c0_35 = arith.constant 0 : index
    %97 = vector.load %arg7[%c0_34, %c0_35] : memref<32x32xbf16, #tpu.memory_space<vmem>>, vector<32x32xbf16>
    %cst_36 = arith.constant dense<0.000000e+00> : vector<8x32xf32>
    %98 = tpu.matmul %96, %97, %cst_36 {dimension_numbers = #tpu.dot_dimension_numbers<[1], [0], [0], [1], [0, 0, 1, 1], [], []>} : vector<8x32xbf16>, vector<32x32xbf16>, vector<8x32xf32> -> vector<8x32xf32>
    %c0_37 = arith.constant 0 : index
    %c0_38 = arith.constant 0 : index
    %99 = vector.load %arg8[%c0_37, %c0_38] : memref<1x32xf32, #tpu.memory_space<vmem>>, vector<1x32xf32>
    %100 = vector.broadcast %99 : vector<1x32xf32> to vector<8x32xf32>
    %101 = arith.addf %98, %100 : vector<8x32xf32>
    %102 = arith.extf %1 : vector<8x32xbf16> to vector<8x32xf32>
    %103 = arith.addf %101, %102 : vector<8x32xf32>
    %c0_39 = arith.constant 0 : index
    %c0_40 = arith.constant 0 : index
    %104 = vector.load %arg10[%c0_39, %c0_40] : memref<1x32xf32, #tpu.memory_space<vmem>>, vector<1x32xf32>
    %c0_41 = arith.constant 0 : index
    %c0_42 = arith.constant 0 : index
    %105 = vector.load %arg11[%c0_41, %c0_42] : memref<1x32xf32, #tpu.memory_space<vmem>>, vector<1x32xf32>
    %cst_43 = arith.constant dense<0.000000e+00> : vector<8xf32>
    %106 = vector.multi_reduction <add>, %103, %cst_43 [1] : vector<8x32xf32> to vector<8xf32>
    %107 = vector.shape_cast %106 : vector<8xf32> to vector<8x1xf32>
    %cst_44 = arith.constant 3.200000e+01 : f32
    %108 = vector.broadcast %cst_44 : f32 to vector<8x1xf32>
    %109 = arith.divf %107, %108 : vector<8x1xf32>
    %110 = vector.broadcast %109 : vector<8x1xf32> to vector<8x32xf32>
    %111 = arith.subf %103, %110 : vector<8x32xf32>
    %112 = arith.mulf %111, %111 : vector<8x32xf32>
    %cst_45 = arith.constant dense<0.000000e+00> : vector<8xf32>
    %113 = vector.multi_reduction <add>, %112, %cst_45 [1] : vector<8x32xf32> to vector<8xf32>
    %114 = vector.shape_cast %113 : vector<8xf32> to vector<8x1xf32>
    %cst_46 = arith.constant 3.200000e+01 : f32
    %115 = vector.broadcast %cst_46 : f32 to vector<8x1xf32>
    %116 = arith.divf %114, %115 : vector<8x1xf32>
    %117 = vector.broadcast %109 : vector<8x1xf32> to vector<8x32xf32>
    %118 = arith.subf %103, %117 : vector<8x32xf32>
    %cst_47 = arith.constant 9.99999974E-6 : f32
    %119 = vector.broadcast %cst_47 : f32 to vector<8x1xf32>
    %120 = arith.addf %116, %119 : vector<8x1xf32>
    %121 = math.rsqrt %120 : vector<8x1xf32>
    %122 = vector.broadcast %121 : vector<8x1xf32> to vector<8x32xf32>
    %123 = arith.mulf %118, %122 : vector<8x32xf32>
    %124 = vector.broadcast %104 : vector<1x32xf32> to vector<8x32xf32>
    %125 = arith.mulf %123, %124 : vector<8x32xf32>
    %126 = vector.broadcast %105 : vector<1x32xf32> to vector<8x32xf32>
    %127 = arith.addf %125, %126 : vector<8x32xf32>
    %128 = arith.truncf %127 : vector<8x32xf32> to vector<8x32xbf16>
    %c0_48 = arith.constant 0 : index
    %c0_49 = arith.constant 0 : index
    %c0_50 = arith.constant 0 : index
    %129 = vector.load %arg12[%c0_48, %c0_49, %c0_50] : memref<1x8x32xbf16, #tpu.memory_space<vmem>>, vector<1x8x32xbf16>
    %130 = vector.shape_cast %129 : vector<1x8x32xbf16> to vector<8x32xbf16>
    %131 = vector.shape_cast %128 : vector<8x32xbf16> to vector<1x8x32xbf16>
    tpu.vector_store %arg12[%c0_48, %c0_49, %c0_50], %131 {strides = array<i32>} : memref<1x8x32xbf16, #tpu.memory_space<vmem>>, vector<1x8x32xbf16>,
    return
  }
  func.func @transform_0(%arg0: i32) -> (i32, i32, i32) {
    %c0_i32 = arith.constant 0 : i32
    %c0_i32_0 = arith.constant 0 : i32
    %c0_i32_1 = arith.constant 0 : i32
    return %arg0, %c0_i32, %c0_i32_0 : i32, i32, i32
  }
  func.func @transform_1(%arg0: i32) -> (i32, i32, i32) {
    %c0_i32 = arith.constant 0 : i32
    %c0_i32_0 = arith.constant 0 : i32
    %c0_i32_1 = arith.constant 0 : i32
    return %arg0, %c0_i32, %c0_i32_0 : i32, i32, i32
  }
  func.func @transform_2(%arg0: i32) -> (i32, i32) {
    %c0_i32 = arith.constant 0 : i32
    %c0_i32_0 = arith.constant 0 : i32
    %c0_i32_1 = arith.constant 0 : i32
    return %c0_i32, %c0_i32_0 : i32, i32
  }
  func.func @transform_3(%arg0: i32) -> (i32, i32) {
    %c0_i32 = arith.constant 0 : i32
    %c0_i32_0 = arith.constant 0 : i32
    %c0_i32_1 = arith.constant 0 : i32
    return %c0_i32, %c0_i32_0 : i32, i32
  }
  func.func @transform_4(%arg0: i32) -> (i32, i32) {
    %c0_i32 = arith.constant 0 : i32
    %c0_i32_0 = arith.constant 0 : i32
    %c0_i32_1 = arith.constant 0 : i32
    return %c0_i32, %c0_i32_0 : i32, i32
  }
  func.func @transform_5(%arg0: i32) -> (i32, i32) {
    %c0_i32 = arith.constant 0 : i32
    %c0_i32_0 = arith.constant 0 : i32
    %c0_i32_1 = arith.constant 0 : i32
    return %c0_i32, %c0_i32_0 : i32, i32
  }
  func.func @transform_6(%arg0: i32) -> (i32, i32) {
    %c0_i32 = arith.constant 0 : i32
    %c0_i32_0 = arith.constant 0 : i32
    %c0_i32_1 = arith.constant 0 : i32
    return %c0_i32, %c0_i32_0 : i32, i32
  }
  func.func @transform_7(%arg0: i32) -> (i32, i32) {
    %c0_i32 = arith.constant 0 : i32
    %c0_i32_0 = arith.constant 0 : i32
    %c0_i32_1 = arith.constant 0 : i32
    return %c0_i32, %c0_i32_0 : i32, i32
  }
  func.func @transform_8(%arg0: i32) -> (i32, i32, i32) {
    %c0_i32 = arith.constant 0 : i32
    %c0_i32_0 = arith.constant 0 : i32
    %c0_i32_1 = arith.constant 0 : i32
    return %arg0, %c0_i32, %c0_i32_0 : i32, i32, i32
  }
  func.func @transform_9(%arg0: i32) -> (i32, i32) {
    %c0_i32 = arith.constant 0 : i32
    %c0_i32_0 = arith.constant 0 : i32
    %c0_i32_1 = arith.constant 0 : i32
    return %c0_i32, %c0_i32_0 : i32, i32
  }
  func.func @transform_10(%arg0: i32) -> (i32, i32) {
    %c0_i32 = arith.constant 0 : i32
    %c0_i32_0 = arith.constant 0 : i32
    %c0_i32_1 = arith.constant 0 : i32
    return %c0_i32, %c0_i32_0 : i32, i32
  }
  func.func @transform_11(%arg0: i32) -> (i32, i32, i32) {
    %c0_i32 = arith.constant 0 : i32
    %c0_i32_0 = arith.constant 0 : i32
    %c0_i32_1 = arith.constant 0 : i32
    return %arg0, %c0_i32, %c0_i32_0 : i32, i32, i32
  }
}

module attributes {stable_mosaic.version = 11 : i64} {
  func.func @_matmul_noacc_kernel(%arg0: i32, %arg1: i32, %arg2: memref<8x32xbf16, #tpu.memory_space<vmem>>, %arg3: memref<32x128xbf16, #tpu.memory_space<vmem>>, %arg4: memref<1x128xf32, #tpu.memory_space<vmem>>, %arg5: memref<8x128xf32, #tpu.memory_space<vmem>>) attributes {dimension_semantics = [#tpu.dimension_semantics<parallel>, #tpu.dimension_semantics<parallel>], iteration_bounds = array<i64: 2, 1>, scalar_prefetch = 0 : i64, scratch_operands = 0 : i64, tpu.core_type = #tpu.core_type<tc>, window_params = [{transform_indices = @transform_0, window_bounds = array<i64: 8, 32>}, {transform_indices = @transform_1, window_bounds = array<i64: 32, 128>}, {transform_indices = @transform_2, window_bounds = array<i64: 1, 128>}, {transform_indices = @transform_3, window_bounds = array<i64: 8, 128>}]} {
    %c0 = arith.constant 0 : index
    %c0_0 = arith.constant 0 : index
    %0 = vector.load %arg2[%c0, %c0_0] : memref<8x32xbf16, #tpu.memory_space<vmem>>, vector<8x32xbf16>
    %c0_1 = arith.constant 0 : index
    %c0_2 = arith.constant 0 : index
    %1 = vector.load %arg3[%c0_1, %c0_2] : memref<32x128xbf16, #tpu.memory_space<vmem>>, vector<32x128xbf16>
    %cst = arith.constant dense<0.000000e+00> : vector<8x128xf32>
    %2 = tpu.matmul %0, %1, %cst {dimension_numbers = #tpu.dot_dimension_numbers<[1], [0], [0], [1], [0, 0, 1, 1], [], []>} : vector<8x32xbf16>, vector<32x128xbf16>, vector<8x128xf32> -> vector<8x128xf32>
    %c0_3 = arith.constant 0 : index
    %c0_4 = arith.constant 0 : index
    %3 = vector.load %arg4[%c0_3, %c0_4] : memref<1x128xf32, #tpu.memory_space<vmem>>, vector<1x128xf32>
    %4 = vector.broadcast %3 : vector<1x128xf32> to vector<8x128xf32>
    %5 = arith.addf %2, %4 : vector<8x128xf32>
    %c0_5 = arith.constant 0 : index
    %c0_6 = arith.constant 0 : index
    %6 = vector.load %arg5[%c0_5, %c0_6] : memref<8x128xf32, #tpu.memory_space<vmem>>, vector<8x128xf32>
    tpu.vector_store %arg5[%c0_5, %c0_6], %5 {strides = array<i32>} : memref<8x128xf32, #tpu.memory_space<vmem>>, vector<8x128xf32>,
    return
  }
  func.func @transform_0(%arg0: i32, %arg1: i32) -> (i32, i32) {
    %c0_i32 = arith.constant 0 : i32
    %c0_i32_0 = arith.constant 0 : i32
    return %arg0, %c0_i32 : i32, i32
  }
  func.func @transform_1(%arg0: i32, %arg1: i32) -> (i32, i32) {
    %c0_i32 = arith.constant 0 : i32
    %c0_i32_0 = arith.constant 0 : i32
    return %c0_i32, %arg1 : i32, i32
  }
  func.func @transform_2(%arg0: i32, %arg1: i32) -> (i32, i32) {
    %c0_i32 = arith.constant 0 : i32
    %c0_i32_0 = arith.constant 0 : i32
    return %c0_i32, %arg1 : i32, i32
  }
  func.func @transform_3(%arg0: i32, %arg1: i32) -> (i32, i32) {
    %c0_i32 = arith.constant 0 : i32
    return %arg0, %arg1 : i32, i32
  }
}

</mosaic_0001>

<bundles_post_ra>
// kernel: forward.17
= control target key start
LH: loop header
LB: loop body
LE: loop exit
PB: predicated region body
PF: predicated region fallthrough
CT: control target
= control target key end

     0   :  { %s317_s12 = smov 0   ;;  %s349_s0 = inlined_call_operand.vmem [shape: bf16[16,32], index: 0, kind: input, shape index: {}]   ;;  %s350_s1 = inlined_call_operand.vmem [shape: f32[1,32], index: 1, kind: input, shape index: {}]   ;;  %s351_s2 = inlined_call_operand.vmem [shape: f32[1,32], index: 2, kind: input, shape index: {}]   ;;  %s352_s3 = inlined_call_operand.vmem [shape: bf16[16,32], index: 3, kind: output, shape index: {}]  }
   0x1 LB: > { %s264_s13 = sadd.s32 4294967295, %s294_s12   ;;  %p268_p0 = scmp.ge.s32.totalorder %s294_s12, 1  ;;  %s294_s12 = sphi %s317_s12, %s13_s12  }
   0x2   : > { %p136_p1 = scmp.lt.s32.totalorder %s294_s12, 3 }
   0x4   : > { %p137_p2 = pnand %p268_p0, %p136_p1 }
   0x5   : > { %p158_p3 = scmp.lt.s32.totalorder (!%p137_p2), %s264_s13, 1 }
   0x6   : > { %140 = sbr.rel (%p137_p2) target bundleno = 288 (0x120), region = 32 }
   0xb   : > { %s354_s13 = smov (!%p158_p3, %s264_s13), 1  ;;  %vm170_vm0 = vcmask 261120   ;;  %v296_v3 = vmov 32.0   ;;  %v282_v24 = vld [vmem:[%s350_s1] ss:$0 sm:$0xff]  ;;  %vm209_vm5 = vcmask 257024  }
   0xc   : > { %s269_s14 = sshll.u32 %s354_s13, 2  ;;  %284 = vrcp.f32 %v296_v3  ;;  %v283_v26 = vld [vmem:[%s351_s2] ss:$0 sm:$0xff] }
   0xd   : > { %s161_s17 = scalar_lea.vmem %s349_s0, %s269_s14  ;;  %s165_s24 = scalar_lea.vmem %s352_s3, %s269_s14 }
   0xe   : > { %v166_v0 = vld [vmem:[%s161_s17] sm:$0xf] }
   0xf   : > { %v167_v1 = vunpack.c.l.bf16 %v166_v0 }
  0x11   : > { %v171_v2 = vsel %vm170_vm0, %v167_v1, 0.0 }
  0x12   : > { %172 = vadd.xlane.f32.xlu0 %v171_v2  ;;  %v285_v4 = vpop.eup %284 }
  0x13   : > { %v175_v5 = vmul.f32 32.0, %v285_v4  ;;  %vm179_vm1 = vweird.f32 %v285_v4 }
  0x15   : > { %v176_v6 = vsub.f32 1.0, %v175_v5 }
  0x17   : > { %v177_v7 = vmul.f32 %v285_v4, %v176_v6 }
  0x19   : > { %v178_v8 = vadd.f32 %v285_v4, %v177_v7 }
  0x1b   : > { %v180_v9 = vsel %vm179_vm1, %v285_v4, %v178_v8 }
  0x85   : > { %v173_v10 = vpop.xlane.xlu0 %172 }
  0x86   : > { %v181_v11 = vmul.f32 %v180_v9, %v173_v10 }
  0x88   : > { %v182_v12 = vsub.f32 %v167_v1, %v181_v11 }
  0x8a   : > { %v183_v13 = vmul.f32 %v182_v12, %v182_v12 }
  0x8c   : > { %v184_v14 = vsel %vm170_vm0, %v183_v13, 0.0 }
  0x8d   : > { %185 = vadd.xlane.f32.xlu0 %v184_v14 }
 0x100   : > { %v186_v15 = vpop.xlane.xlu0 %185 }
 0x101   : > { %v187_v16 = vmul.f32 %v186_v15, %v180_v9 }
 0x103   : > { %v188_v17 = vadd.f32 1e-05, %v187_v16 }
 0x105   : > { %286 = vrsqrt.f32 %v188_v17  ;;  %vm195_vm3 = vweird.f32 %v188_v17 }
 0x10b   : > { %v287_v18 = vpop.eup %286 }
 0x10c   : > { %v190_v19 = vmul.f32 %v287_v18, %v188_v17  ;;  %vm196_vm2 = vweird.f32 %v287_v18 }
 0x10d   : > { %vm197_vm4 = vmor %vm195_vm3, %vm196_vm2 }
 0x10e   : > { %v191_v20 = vmul.f32 %v287_v18, %v190_v19 }
 0x110   : > { %v192_v21 = vmul.f32 0.5, %v191_v20 }
 0x112   : > { %v193_v22 = vsub.f32 1.5, %v192_v21 }
 0x114   : > { %v194_v23 = vmul.f32 %v287_v18, %v193_v22 }
 0x116   : > { %v198_v25 = vsel %vm197_vm4, %v287_v18, %v194_v23 }
 0x117   : > { %v199_v27 = vmul.f32 %v198_v25, %v182_v12 }
 0x119   : > { %v203_v28 = vmul.f32 %v282_v24, %v199_v27 }
 0x11b   : > { %v207_v29 = vadd.f32 %v283_v26, %v203_v28 }
 0x11d   : > { %v208_v30 = vpack.c.bf16 %v207_v29, %v207_v29 }
 0x11f   : > { %210 = vst.msk [vmem:[%s165_s24] sm:$0xf] %vm209_vm5, %v208_v30 }
 0x120 PF: > { %s13_s12 = sadd.s32 1, %s294_s12  }
 0x121   : > { %p10_p4 = scmp.ge.s32.totalorder %s13_s12, 4  }
 0x123   :  { %12 = sbr.rel (!%p10_p4) target bundleno = 1 (0x1), region = 62 }

// kernel: forward.14
= control target key start
LH: loop header
LB: loop body
LE: loop exit
PB: predicated region body
PF: predicated region fallthrough
CT: control target
= control target key end

     0   :  { %s572_s24 = smov 0   ;;  %s629_s0 = inlined_call_operand.vmem [shape: bf16[16,32], index: 0, kind: input, shape index: {}]   ;;  %s630_s1 = inlined_call_operand.vmem [shape: bf16[32,64], index: 1, kind: input, shape index: {}]   ;;  %s631_s2 = inlined_call_operand.vmem [shape: f32[1,64], index: 2, kind: input, shape index: {}]   ;;  %s632_s3 = inlined_call_operand.vmem [shape: bf16[64,32], index: 3, kind: input, shape index: {}]   ;;  %s633_s4 = inlined_call_operand.vmem [shape: f32[1,32], index: 4, kind: input, shape index: {}]   ;;  %s634_s5 = inlined_call_operand.vmem [shape: f32[1,32], index: 5, kind: input, shape index: {}]   ;;  %s635_s6 = inlined_call_operand.vmem [shape: f32[1,32], index: 6, kind: input, shape index: {}]   ;;  %s636_s7 = inlined_call_operand.vmem [shape: bf16[16,32], index: 7, kind: output, shape index: {}]  }
   0x1 LB: > { %s465_s25 = sadd.s32 4294967295, %s529_s24   ;;  %p469_p0 = scmp.ge.s32.totalorder %s529_s24, 1  ;;  %s529_s24 = sphi %s572_s24, %s17_s24  }
   0x2   : > { %p236_p1 = scmp.lt.s32.totalorder %s529_s24, 3 }
   0x4   : > { %p237_p2 = pnand %p469_p0, %p236_p1 }
   0x5   : > { %p266_p3 = scmp.lt.s32.totalorder (!%p237_p2), %s465_s25, 1 }
   0x6   : > { %240 = sbr.rel (%p237_p2) target bundleno = 552 (0x228), region = 48 }
   0xb   : > { %v501_v0 = vld [vmem:[%s630_s1 + $0x8] sm:$0xff]  ;;  %v505_v1 = vld [vmem:[%s632_s3 + $0x18] sm:$0xff]  ;;  %v500_v2 = vld [vmem:[%s630_s1] sm:$0xff]  ;;  %s638_s25 = smov (!%p266_p3, %s465_s25), 1  ;;  %vm296_vm0 = vcmask 261120   ;;  %vm351_vm1 = vcmask 523264  }
   0xc   : > { %306 = vmatpush.bf16.msra.mxu0 %v501_v0  ;;  %359 = vmatpush.bf16.msra.mxu1 %v505_v1  ;;  %v504_v3 = vld [vmem:[%s632_s3 + $0x10] sm:$0xff]  ;;  %s470_s11 = sshll.u32 %s638_s25, 2  ;;  %v503_v5 = vld [vmem:[%s632_s3 + $0x8] sm:$0xff]  ;;  %v502_v6 = vld [vmem:[%s632_s3] sm:$0xff]  ;;  %v531_v20 = vmov 32.0   ;;  %vm410_vm6 = vcmask 257024  }
   0xd   : > { %s269_s14 = scalar_lea.vmem %s629_s0, %s470_s11  ;;  %v515_v7 = vld [vmem:[%s631_s2] ss:$0 sm:$0xff]  ;;  %519 = vrcp.f32 %v531_v20  ;;  %s273_s8 = scalar_lea.vmem %s636_s7, %s470_s11 }
   0xe   : > { %v275_v4 = vld [vmem:[%s269_s14] sm:$0xf] }
   0xf   : > { %v516_v13 = vld [vmem:[%s633_s4] ss:$0 sm:$0xff]  ;;  %v368_v14 = vunpack.c.l.bf16 %v275_v4 }
  0x10   : > { %307 = vmatpush.bf16.msra.mxu0 %v500_v2  ;;  %360 = vmatpush.bf16.msra.mxu1 %v504_v3  ;;  %v517_v41 = vld [vmem:[%s634_s5] ss:$0 sm:$0xff] }
  0x11   : > { %v518_v43 = vld [vmem:[%s635_s6] ss:$0 sm:$0xff] }
  0x13   : > { %480 = vmatmul.msk.bf16.vlgmr.msra.gmra.mxu0 %vm296_vm0, %v275_v4  ;;  %v520_v21 = vpop.eup %519 }
  0x14   : > { %361 = vmatpush.bf16.msra.mxu1 %v503_v5  ;;  %v376_v22 = vmul.f32 32.0, %v520_v21  ;;  %vm380_vm2 = vweird.f32 %v520_v21 }
  0x16   : > { %v377_v23 = vsub.f32 1.0, %v376_v22 }
  0x18   : > { %362 = vmatpush.bf16.msra.mxu1 %v502_v6  ;;  %v378_v24 = vmul.f32 %v520_v21, %v377_v23 }
  0x1a   : > { %v379_v25 = vadd.f32 %v520_v21, %v378_v24 }
  0x1c   : > { %v381_v26 = vsel %vm380_vm2, %v520_v21, %v379_v25 }
  0x90   : > { %v309_v8 = vpop.f32.mrf.mxu0 }
  0x91   : > { %v310_v9 = vadd.f32 %v515_v7, %v309_v8 }
  0x93   : > { %v313_v10 = vmax.f32 %v310_v9, 0.0 }
  0x95   : > { %v314_v11 = vpack.c.bf16 %v313_v10, %v313_v10 }
  0x97   : > { %497 = vmatmul.msk.bf16.vlgmr.msra.gmra.mxu1 %vm351_vm1, %v314_v11 }
  0x98   : > { %v311_v12 = vpop.f32.mrf.mxu0 }
 0x114   : > { %v364_v15 = vpop.f32.mrf.mxu1 }
 0x115   : > { %v365_v16 = vadd.f32 %v516_v13, %v364_v15 }
 0x117   : > { %v369_v17 = vadd.f32 %v368_v14, %v365_v16 }
 0x119   : > { %v372_v18 = vsel %vm296_vm0, %v369_v17, 0.0 }
 0x11a   : > { %373 = vadd.xlane.f32.xlu0 %v372_v18 }
 0x11c   : > { %v366_v19 = vpop.f32.mrf.mxu1 }
 0x18d   : > { %v374_v27 = vpop.xlane.xlu0 %373 }
 0x18e   : > { %v382_v28 = vmul.f32 %v381_v26, %v374_v27 }
 0x190   : > { %v383_v29 = vsub.f32 %v369_v17, %v382_v28 }
 0x192   : > { %v384_v30 = vmul.f32 %v383_v29, %v383_v29 }
 0x194   : > { %v385_v31 = vsel %vm296_vm0, %v384_v30, 0.0 }
 0x195   : > { %386 = vadd.xlane.f32.xlu0 %v385_v31 }
 0x208   : > { %v387_v32 = vpop.xlane.xlu0 %386 }
 0x209   : > { %v388_v33 = vmul.f32 %v387_v32, %v381_v26 }
 0x20b   : > { %v389_v34 = vadd.f32 1e-05, %v388_v33 }
 0x20d   : > { %521 = vrsqrt.f32 %v389_v34  ;;  %vm396_vm4 = vweird.f32 %v389_v34 }
 0x213   : > { %v522_v35 = vpop.eup %521 }
 0x214   : > { %v391_v36 = vmul.f32 %v522_v35, %v389_v34  ;;  %vm397_vm3 = vweird.f32 %v522_v35 }
 0x215   : > { %vm398_vm5 = vmor %vm396_vm4, %vm397_vm3 }
 0x216   : > { %v392_v37 = vmul.f32 %v522_v35, %v391_v36 }
 0x218   : > { %v393_v38 = vmul.f32 0.5, %v392_v37 }
 0x21a   : > { %v394_v39 = vsub.f32 1.5, %v393_v38 }
 0x21c   : > { %v395_v40 = vmul.f32 %v522_v35, %v394_v39 }
 0x21e   : > { %v399_v42 = vsel %vm398_vm5, %v522_v35, %v395_v40 }
 0x21f   : > { %v400_v44 = vmul.f32 %v399_v42, %v383_v29 }
 0x221   : > { %v404_v45 = vmul.f32 %v517_v41, %v400_v44 }
 0x223   : > { %v408_v46 = vadd.f32 %v518_v43, %v404_v45 }
 0x225   : > { %v409_v47 = vpack.c.bf16 %v408_v46, %v408_v46 }
 0x227   : > { %411 = vst.msk [vmem:[%s273_s8] sm:$0xf] %vm410_vm6, %v409_v47 }
 0x228 PF: > { %s17_s24 = sadd.s32 1, %s529_s24  }
 0x229   : > { %p14_p4 = scmp.ge.s32.totalorder %s17_s24, 4  }
 0x22b   :  { %16 = sbr.rel (!%p14_p4) target bundleno = 1 (0x1), region = 78 }

// kernel: forward.13
= control target key start
LH: loop header
LB: loop body
LE: loop exit
PB: predicated region body
PF: predicated region fallthrough
CT: control target
= control target key end

     0   :  { %s906_s27 = smov 0   ;;  %s1006_s0 = inlined_call_operand.vmem [shape: bf16[2,8,32], index: 0, kind: input, shape index: {}]   ;;  %s1007_s1 = inlined_call_operand.vmem [shape: bf16[32,96], index: 1, kind: input, shape index: {}]   ;;  %s1008_s2 = inlined_call_operand.vmem [shape: f32[1,96], index: 2, kind: input, shape index: {}]   ;;  %s1009_s3 = inlined_call_operand.vmem [shape: bf16[32,32], index: 3, kind: input, shape index: {}]   ;;  %s1010_s4 = inlined_call_operand.vmem [shape: f32[1,32], index: 4, kind: input, shape index: {}]   ;;  %s1011_s5 = inlined_call_operand.vmem [shape: f32[2,1,8], index: 5, kind: input, shape index: {}]   ;;  %s1012_s6 = inlined_call_operand.vmem [shape: f32[1,32], index: 6, kind: input, shape index: {}]   ;;  %s1013_s7 = inlined_call_operand.vmem [shape: f32[1,32], index: 7, kind: input, shape index: {}]   ;;  %s1014_s8 = inlined_call_operand.vmem [shape: bf16[2,8,32], index: 8, kind: output, shape index: {}]  }
   0x1 LB: > { %s751_s28 = sadd.s32 4294967295, %s844_s27   ;;  %p755_p0 = scmp.ge.s32.totalorder %s844_s27, 1  ;;  %s844_s27 = sphi %s906_s27, %s18_s27  }
   0x2   : > { %p269_p1 = scmp.lt.s32.totalorder %s844_s27, 3 }
   0x4   : > { %p270_p2 = pnand %p755_p0, %p269_p1 }
   0x5   : > { %p304_p3 = scmp.lt.s32.totalorder (!%p270_p2), %s751_s28, 1  ;;  %s846_s20 = smov (!%p270_p2), 96  }
   0x6   : > { %273 = sbr.rel (%p270_p2) target bundleno = 1357 (0x54d), region = 52  ;;  %s847_s21 = smov (!%p270_p2), 104  }
   0x7   : > { %s848_s22 = smov (!%p270_p2), 120   ;;  %s849_s23 = smov (!%p270_p2), 88  }
   0x8   : > { %s850_s24 = smov (!%p270_p2), 80   ;;  %s851_s25 = smov (!%p270_p2), 72  }
   0x9   : > { %s852_s26 = smov (!%p270_p2), 112   ;;  %s853_s9 = smov (!%p270_p2), 64  }
   0xa   : > { %s854_s10 = smov (!%p270_p2), 40   ;;  %s855_s12 = smov (!%p270_p2), 56  }
   0xb   : > { %v787_v0 = vld [vmem:[%s1007_s1 + $0x8] sm:$0xff]  ;;  %v786_v1 = vld [vmem:[%s1007_s1] sm:$0xff]  ;;  %s1016_s28 = smov (!%p304_p3, %s751_s28), 1  ;;  %vm337_vm0 = vcmask 261120   ;;  %vm366_vm1 = vcmask 64512   ;;  %vm403_vm2 = vcmask 1043456  }
   0xc   : > { %347 = vmatpush.bf16.msra.mxu0 %v787_v0  ;;  %s756_s11 = sshll.u32 %s1016_s28, 2  ;;  %s310_s14 = scalar_lea.vmem %s1011_s5, %s1016_s28  ;;  %v814_v3 = vld [vmem:[%s1008_s2] ss:$0 sm:$0xff]  ;;  %vm604_vm3 = vcmask 130048   ;;  %vm606_vm4 = vcmask 195584   ;;  %vm687_vm9 = vcmask 257024  }
   0xd   : > { %s307_s17 = scalar_lea.vmem %s1006_s0, %s756_s11  ;;  %v813_v25 = vld [vmem:[%s310_s14] ss:$0 sm:$0xff]  ;;  %s856_s13 = smov 48  }
   0xe   : > { %v932_v2 = vld [vmem:[%s307_s17] sm:$0xf]  ;;  %s857_s14 = smov 8   ;;  %s858_s15 = smov 16  }
   0xf   : > { %s859_s16 = smov 24  }
  0x10   : > { %348 = vmatpush.bf16.msra.mxu0 %v786_v1 }
  0x13   : > { %766 = vmatmul.msk.bf16.vlgmr.msra.gmra.mxu0 %vm337_vm0, %v932_v2 }
  0x90   : > { %v350_v4 = vpop.f32.mrf.mxu0 }
  0x91   : > { %v351_v5 = vadd.f32 %v814_v3, %v350_v4 }
  0x93   : > { %v355_v6 = vmul.f32 0.35355338, %v351_v5  ;;  %v357_v7 = vpack.c.bf16 %v351_v5, %v351_v5 }
  0x95   : > { %v356_v8 = vpack.c.bf16 %v355_v6, %v355_v6  ;;  %v362_v9 = vunpack.c.l.b16 %v357_v7 }
  0x97   : > { %v939_v10 = vpack.c.b16 %v362_v9, %v362_v9  ;;  %v421_v11 = vunpack.c.l.b16 %v356_v8 }
  0x98   : > { %v352_v12 = vpop.f32.mrf.mxu0 }
  0x99   : > { %364 = vrot.lane.b32.xlu0 %v939_v10, %s846_s20  ;;  %v422_v13 = vpack.c.b16 %v421_v11, %v421_v11 }
  0x9b   : > { %535 = vrot.lane.b32.xlu2 %v422_v13, %s847_s21  ;;  %423 = vrot.lane.b32.xlu1 %v422_v13, %s848_s22 }
  0xa1   : > { %425 = vrot.lane.b32.xlu0 %v939_v10, %s849_s23 }
  0xa3   : > { %481 = vrot.lane.b32.xlu2 %v939_v10, %s850_s24  ;;  %537 = vrot.lane.b32.xlu1 %v939_v10, %s851_s25 }
  0xa9   : > { %479 = vrot.lane.b32.xlu0 %v422_v13, %s852_s26 }
  0xf5   : > { %v536_v14 = vpop.permute.xlu2 %535 }
  0xfd   : > { %v482_v15 = vpop.permute.xlu2 %481 }
  0xfe   : > { %v487_v16 = vsel %vm366_vm1, %v482_v15, 0 }
  0xff   : > { %496 = vmatpush.bf16.xpose.msrb.mxu0 %v487_v16 }
 0x10b   : > { %v365_v17 = vpop.permute.xlu0 %364 }
 0x10c   : > { %v371_v18 = vsel %vm366_vm1, %v365_v17, 0 }
 0x10d   : > { %380 = vmatpush.bf16.xpose.msra.mxu1 %v371_v18  ;;  %v424_v19 = vpop.permute.xlu1 %423 }
 0x113   : > { %v426_v20 = vpop.permute.xlu0 %425 }
 0x114   : > { %767 = vmatmul.msk.bf16.vlgmr.msra.gmra.mxu1 %vm366_vm1, %v356_v8  ;;  %v431_v21 = vsel %vm366_vm1, %v426_v20, 0 }
 0x115   : > { %440 = vmatpush.bf16.xpose.msra.mxu3 %v431_v21  ;;  %v538_v22 = vpop.permute.xlu1 %537 }
 0x116   : > { %v543_v23 = vsel %vm366_vm1, %v538_v22, 0 }
 0x11b   : > { %v480_v24 = vpop.permute.xlu0 %479 }
 0x11c   : > { %769 = vmatmul.msk.bf16.vlgmr.msra.gmra.mxu3 %vm366_vm1, %v424_v19  ;;  %771 = vmatmul.msk.bf16.vlgmr.msrb.gmra.mxu0 %vm366_vm1, %v480_v24 }
 0x11d   : > { %552 = vmatpush.bf16.xpose.msrb.mxu3 %v543_v23 }
 0x12c   : > { %773 = vmatmul.msk.bf16.vlgmr.msrb.gmra.mxu3 %vm366_vm1, %v536_v14 }
 0x191   : > { %v382_v26 = vpop.f32.mrf.mxu1 }
 0x192   : > { %v383_v27 = vadd.f32 %v813_v25, %v382_v26 }
 0x194   : > { %v386_v28 = vsel %vm366_vm1, %v383_v27, -inf }
 0x195   : > { %387 = vmax.xlane.f32.xlu1 %v386_v28 }
 0x199   : > { %v384_v29 = vpop.f32.mrf.mxu1  ;;  %v498_v30 = vpop.f32.mrf.mxu0 }
 0x19a   : > { %v499_v35 = vadd.f32 %v813_v25, %v498_v30 }
 0x19c   : > { %v502_v37 = vsel %vm366_vm1, %v499_v35, -inf }
 0x19f   : > { %v442_v31 = vpop.f32.mrf.mxu3 }
 0x1a0   : > { %v443_v32 = vadd.f32 %v813_v25, %v442_v31  ;;  %v789_v31 = vld [vmem:[%s1009_s3 + $0x8] sm:$0xff] }
 0x1a1   : > { %v500_v33 = vpop.f32.mrf.mxu0  ;;  %638 = vmatpush.bf16.msra.mxu0 %v789_v31 }
 0x1a2   : > { %v446_v34 = vsel %vm366_vm1, %v443_v32, -inf }
 0x1a3   : > { %447 = vmax.xlane.f32.xlu2 %v446_v34 }
 0x1a7   : > { %v444_v36 = vpop.f32.mrf.mxu3 }
 0x1ab   : > { %503 = vmax.xlane.f32.xlu2 %v502_v37 }
 0x1af   : > { %v554_v38 = vpop.f32.mrf.mxu3 }
 0x1b0   : > { %v555_v39 = vadd.f32 %v813_v25, %v554_v38 }
 0x1b2   : > { %v558_v40 = vsel %vm366_vm1, %v555_v39, -inf }
 0x1b3   : > { %559 = vmax.xlane.f32.xlu0 %v558_v40  ;;  %v815_v40 = vld [vmem:[%s1010_s4] ss:$0 sm:$0xff] }
 0x1b7   : > { %v556_v41 = vpop.f32.mrf.mxu3 }
 0x1b8   : > { %v645_v41 = vunpack.c.l.bf16 %v932_v2 }
 0x1c3   : > { %398 = vrot.lane.b32.xlu2 %v939_v10, %s853_s9  ;;  %s314_s9 = scalar_lea.vmem %s1014_s8, %s756_s11 }
 0x1cb   : > { %570 = vrot.lane.b32.xlu2 %v939_v10, %s854_s10 }
 0x208   : > { %v388_v42 = vpop.xlane.xlu1 %387 }
 0x209   : > { %v389_v43 = vsub.f32 %v383_v27, %v388_v42 }
 0x20b   : > { %v390_v44 = vmul.f32 1.442695, %v389_v43 }
 0x20d   : > { %818 = vpow2.f32 %v390_v44 }
 0x213   : > { %v819_v45 = vpop.eup %818 }
 0x214   : > { %v392_v46 = vsel %vm366_vm1, %v819_v45, 0.0 }
 0x215   : > { %393 = vadd.xlane.f32.xlu1 %v392_v46 }
 0x216   : > { %v448_v47 = vpop.xlane.xlu2 %447 }
 0x217   : > { %v449_v50 = vsub.f32 %v443_v32, %v448_v47  ;;  %v788_v32 = vld [vmem:[%s1009_s3] sm:$0xff]  ;;  %v860_v47 = vmov 32.0  }
 0x218   : > { %639 = vmatpush.bf16.msra.mxu0 %v788_v32 }
 0x219   : > { %v450_v52 = vmul.f32 1.442695, %v449_v50 }
 0x21e   : > { %v504_v48 = vpop.xlane.xlu2 %503 }
 0x21f   : > { %v505_v49 = vsub.f32 %v499_v35, %v504_v48 }
 0x221   : > { %v506_v51 = vmul.f32 1.442695, %v505_v49 }
 0x223   : > { %820 = vpow2.f32 %v506_v51 }
 0x224   : > { %822 = vpow2.f32 %v450_v52 }
 0x226   : > { %v399_v53 = vpop.permute.xlu2 %398  ;;  %v560_v54 = vpop.xlane.xlu0 %559 }
 0x227   : > { %v405_v55 = vsel %vm403_vm2, %v399_v53, 0  ;;  %v561_v57 = vsub.f32 %v555_v39, %v560_v54 }
 0x228   : > { %414 = vmatpush.bf16.msra.mxu2 %v405_v55 }
 0x229   : > { %v821_v56 = vpop.eup %820  ;;  %v562_v59 = vmul.f32 1.442695, %v561_v57 }
 0x22a   : > { %v508_v58 = vsel %vm366_vm1, %v821_v56, 0.0  ;;  %v823_v60 = vpop.eup %822 }
 0x22b   : > { %509 = vadd.xlane.f32.xlu0 %v508_v58  ;;  %824 = vpow2.f32 %v562_v59  ;;  %v452_v61 = vsel %vm366_vm1, %v823_v60, 0.0 }
 0x22e   : > { %458 = vrot.lane.b32.xlu1 %v939_v10, %s855_s12  ;;  %v571_v6 = vpop.permute.xlu2 %570 }
 0x22f   : > { %v576_v9 = vsel %vm403_vm2, %v571_v6, 0  ;;  %v817_v6 = vld [vmem:[%s1013_s7] ss:$0 sm:$0xff] }
 0x231   : > { %v825_v62 = vpop.eup %824 }
 0x232   : > { %v564_v63 = vsel %vm366_vm1, %v825_v62, 0.0 }
 0x233   : > { %453 = vadd.xlane.f32.xlu0 %v452_v61 }
 0x23b   : > { %565 = vadd.xlane.f32.xlu0 %v564_v63 }
 0x24f   : > { %514 = vrot.lane.b32.xlu0 %v939_v10, %s856_s13 }
 0x288   : > { %v394_v0 = vpop.xlane.xlu1 %393 }
 0x289   : > { %826 = vrcp.f32 %v394_v0 }
 0x28f   : > { %v827_v1 = vpop.eup %826 }
 0x290   : > { %v396_v3 = vmul.f32 %v827_v1, %v819_v45 }
 0x292   : > { %v397_v4 = vpack.c.bf16 %v396_v3, %v396_v3 }
 0x294   : > { %768 = vmatmul.msk.bf16.vlgmr.msra.gmra.mxu2 %vm366_vm1, %v397_v4  ;;  %v816_v4 = vld [vmem:[%s1012_s6] ss:$0 sm:$0xff] }
 0x29e   : > { %v510_v5 = vpop.xlane.xlu0 %509 }
 0x2a0   : > { %v459_v7 = vpop.permute.xlu1 %458 }
 0x2a1   : > { %v464_v8 = vsel %vm403_vm2, %v459_v7, 0 }
 0x2a2   : > { %473 = vmatpush.bf16.msrb.mxu2 %v464_v8 }
 0x2a6   : > { %585 = vmatpush.bf16.msra.mxu2 %v576_v9  ;;  %v454_v11 = vpop.xlane.xlu0 %453 }
 0x2a7   : > { %828 = vrcp.f32 %v454_v11 }
 0x2ad   : > { %v829_v12 = vpop.eup %828 }
 0x2ae   : > { %v456_v10 = vmul.f32 %v829_v12, %v823_v60  ;;  %v566_v13 = vpop.xlane.xlu0 %565 }
 0x2af   : > { %830 = vrcp.f32 %v566_v13 }
 0x2b0   : > { %v457_v14 = vpack.c.bf16 %v456_v10, %v456_v10  ;;  %832 = vrcp.f32 %v510_v5 }
 0x2b1   : > { %834 = vrcp.f32 %v860_v47 }
 0x2b2   : > { %770 = vmatmul.msk.bf16.vlgmr.msrb.gmra.mxu2 %vm366_vm1, %v457_v14 }
 0x2b5   : > { %v831_v15 = vpop.eup %830 }
 0x2b6   : > { %v568_v16 = vmul.f32 %v831_v15, %v825_v62  ;;  %v833_v17 = vpop.eup %832 }
 0x2b7   : > { %v512_v18 = vmul.f32 %v833_v17, %v821_v56  ;;  %v835_v48 = vpop.eup %834 }
 0x2b8   : > { %v569_v19 = vpack.c.bf16 %v568_v16, %v568_v16  ;;  %v653_v49 = vmul.f32 32.0, %v835_v48  ;;  %vm657_vm5 = vweird.f32 %v835_v48 }
 0x2b9   : > { %v513_v22 = vpack.c.bf16 %v512_v18, %v512_v18 }
 0x2ba   : > { %v654_v50 = vsub.f32 1.0, %v653_v49 }
 0x2bc   : > { %v655_v51 = vmul.f32 %v835_v48, %v654_v50 }
 0x2be   : > { %v656_v52 = vadd.f32 %v835_v48, %v655_v51 }
 0x2c0   : > { %v658_v53 = vsel %vm657_vm5, %v835_v48, %v656_v52 }
 0x2c1   : > { %v515_v20 = vpop.permute.xlu0 %514 }
 0x2c2   : > { %774 = vmatmul.msk.bf16.vlgmr.msra.gmra.mxu2 %vm366_vm1, %v569_v19  ;;  %v520_v21 = vsel %vm403_vm2, %v515_v20, 0 }
 0x2c3   : > { %529 = vmatpush.bf16.msrb.mxu1 %v520_v21 }
 0x2c6   : > { %772 = vmatmul.msk.bf16.vlgmr.msrb.gmra.mxu1 %vm366_vm1, %v513_v22 }
 0x317   : > { %v416_v23 = vpop.f32.mrf.mxu2 }
 0x31f   : > { %v418_v24 = vpop.f32.mrf.mxu2 }
 0x335   : > { %v475_v25 = vpop.f32.mrf.mxu2 }
 0x336   : > { %592 = vrot.lane.b32.xlu1 %v475_v25, %s857_s14 }
 0x33d   : > { %v477_v26 = vpop.f32.mrf.mxu2 }
 0x343   : > { %v531_v27 = vpop.f32.mrf.mxu1 }
 0x344   : > { %596 = vrot.lane.b32.xlu2 %v531_v27, %s858_s15 }
 0x345   : > { %v587_v28 = vpop.f32.mrf.mxu2 }
 0x346   : > { %600 = vrot.lane.b32.xlu1 %v587_v28, %s859_s16 }
 0x34b   : > { %v533_v29 = vpop.f32.mrf.mxu1 }
 0x34d   : > { %v589_v30 = vpop.f32.mrf.mxu2 }
 0x39e   : > { %v597_v35 = vpop.permute.xlu2 %596 }
 0x3a8   : > { %v593_v33 = vpop.permute.xlu1 %592 }
 0x3a9   : > { %v603_v34 = vsel %vm366_vm1, %v416_v23, %v593_v33 }
 0x3aa   : > { %v605_v36 = vsel %vm604_vm3, %v603_v34, %v597_v35 }
 0x3b8   : > { %v601_v37 = vpop.permute.xlu1 %600 }
 0x3b9   : > { %v607_v38 = vsel %vm606_vm4, %v605_v36, %v601_v37 }
 0x3ba   : > { %v608_v39 = vpack.c.bf16 %v607_v38, %v607_v38 }
 0x3bc   : > { %783 = vmatmul.msk.bf16.vlgmr.msra.gmra.mxu0 %vm337_vm0, %v608_v39 }
 0x439   : > { %v641_v42 = vpop.f32.mrf.mxu0 }
 0x43a   : > { %v642_v43 = vadd.f32 %v815_v40, %v641_v42 }
 0x43c   : > { %v646_v44 = vadd.f32 %v645_v41, %v642_v43 }
 0x43e   : > { %v649_v45 = vsel %vm337_vm0, %v646_v44, 0.0 }
 0x43f   : > { %650 = vadd.xlane.f32.xlu2 %v649_v45 }
 0x441   : > { %v643_v46 = vpop.f32.mrf.mxu0 }
 0x4b2   : > { %v651_v54 = vpop.xlane.xlu2 %650 }
 0x4b3   : > { %v659_v55 = vmul.f32 %v658_v53, %v651_v54 }
 0x4b5   : > { %v660_v56 = vsub.f32 %v646_v44, %v659_v55 }
 0x4b7   : > { %v661_v2 = vmul.f32 %v660_v56, %v660_v56 }
 0x4b9   : > { %v662_v57 = vsel %vm337_vm0, %v661_v2, 0.0 }
 0x4ba   : > { %663 = vadd.xlane.f32.xlu1 %v662_v57 }
 0x52d   : > { %v664_v58 = vpop.xlane.xlu1 %663 }
 0x52e   : > { %v665_v59 = vmul.f32 %v664_v58, %v658_v53 }
 0x530   : > { %v666_v60 = vadd.f32 1e-05, %v665_v59 }
 0x532   : > { %836 = vrsqrt.f32 %v666_v60  ;;  %vm673_vm7 = vweird.f32 %v666_v60 }
 0x538   : > { %v837_v61 = vpop.eup %836 }
 0x539   : > { %v668_v62 = vmul.f32 %v837_v61, %v666_v60  ;;  %vm674_vm6 = vweird.f32 %v837_v61 }
 0x53a   : > { %vm675_vm8 = vmor %vm673_vm7, %vm674_vm6 }
 0x53b   : > { %v669_v63 = vmul.f32 %v837_v61, %v668_v62 }
 0x53d   : > { %v670_v0 = vmul.f32 0.5, %v669_v63 }
 0x53f   : > { %v671_v1 = vsub.f32 1.5, %v670_v0 }
 0x541   : > { %v672_v3 = vmul.f32 %v837_v61, %v671_v1 }
 0x543   : > { %v676_v5 = vsel %vm675_vm8, %v837_v61, %v672_v3 }
 0x544   : > { %v677_v7 = vmul.f32 %v676_v5, %v660_v56 }
 0x546   : > { %v681_v8 = vmul.f32 %v816_v4, %v677_v7 }
 0x548   : > { %v685_v9 = vadd.f32 %v817_v6, %v681_v8 }
 0x54a   : > { %v686_v11 = vpack.c.bf16 %v685_v9, %v685_v9 }
 0x54c   : > { %688 = vst.msk [vmem:[%s314_s9] sm:$0xf] %vm687_vm9, %v686_v11 }
 0x54d PF: > { %s18_s27 = sadd.s32 1, %s844_s27  }
 0x54e   : > { %p15_p4 = scmp.ge.s32.totalorder %s18_s27, 4  }
 0x550   :  { %17 = sbr.rel (!%p15_p4) target bundleno = 1 (0x1), region = 85 }

// kernel: forward.18
= control target key start
LH: loop header
LB: loop body
LE: loop exit
PB: predicated region body
PF: predicated region fallthrough
CT: control target
= control target key end

     0   :  { %s915_s27 = smov 0   ;;  %s1019_s0 = inlined_call_operand.vmem [shape: bf16[2,8,32], index: 0, kind: input, shape index: {}]   ;;  %s1020_s1 = inlined_call_operand.vmem [shape: bf16[32,96], index: 1, kind: input, shape index: {}]   ;;  %s1021_s2 = inlined_call_operand.vmem [shape: f32[1,96], index: 2, kind: input, shape index: {}]   ;;  %s1022_s3 = inlined_call_operand.vmem [shape: bf16[32,32], index: 3, kind: input, shape index: {}]   ;;  %s1023_s4 = inlined_call_operand.vmem [shape: f32[1,32], index: 4, kind: input, shape index: {}]   ;;  %s1024_s5 = inlined_call_operand.vmem [shape: f32[2,1,8], index: 5, kind: input, shape index: {}]   ;;  %s1025_s6 = inlined_call_operand.vmem [shape: f32[1,32], index: 6, kind: input, shape index: {}]   ;;  %s1026_s7 = inlined_call_operand.vmem [shape: f32[1,32], index: 7, kind: input, shape index: {}]   ;;  %s1027_s8 = inlined_call_operand.vmem [shape: bf16[2,8,32], index: 8, kind: output, shape index: {}]  }
   0x1 LB: > { %s760_s28 = sadd.s32 4294967295, %s853_s27   ;;  %p764_p0 = scmp.ge.s32.totalorder %s853_s27, 1  ;;  %s853_s27 = sphi %s915_s27, %s18_s27  }
   0x2   : > { %p269_p1 = scmp.lt.s32.totalorder %s853_s27, 3 }
   0x4   : > { %p270_p2 = pnand %p764_p0, %p269_p1 }
   0x5   : > { %p304_p3 = scmp.lt.s32.totalorder (!%p270_p2), %s760_s28, 1  ;;  %s855_s20 = smov (!%p270_p2), 96  }
   0x6   : > { %273 = sbr.rel (%p270_p2) target bundleno = 1358 (0x54e), region = 52  ;;  %s856_s21 = smov (!%p270_p2), 104  }
   0x7   : > { %s857_s22 = smov (!%p270_p2), 120   ;;  %s858_s23 = smov (!%p270_p2), 88  }
   0x8   : > { %s859_s24 = smov (!%p270_p2), 80   ;;  %s860_s25 = smov (!%p270_p2), 72  }
   0x9   : > { %s861_s26 = smov (!%p270_p2), 112   ;;  %s862_s9 = smov (!%p270_p2), 64  }
   0xa   : > { %s863_s10 = smov (!%p270_p2), 40   ;;  %s864_s12 = smov (!%p270_p2), 56  }
   0xb   : > { %v796_v0 = vld [vmem:[%s1020_s1 + $0x8] sm:$0xff]  ;;  %v795_v1 = vld [vmem:[%s1020_s1] sm:$0xff]  ;;  %s1029_s28 = smov (!%p304_p3, %s760_s28), 1  ;;  %vm337_vm0 = vcmask 261120   ;;  %vm371_vm1 = vcmask 64512   ;;  %v355_v25 = vlaneseq  ;;  %vm409_vm3 = vcmask 1043456  }
   0xc   : > { %347 = vmatpush.bf16.msra.mxu0 %v796_v0  ;;  %s765_s11 = sshll.u32 %s1029_s28, 2  ;;  %s310_s14 = scalar_lea.vmem %s1024_s5, %s1029_s28  ;;  %v823_v3 = vld [vmem:[%s1021_s2] ss:$0 sm:$0xff]  ;;  %vm613_vm4 = vcmask 130048   ;;  %vm615_vm5 = vcmask 195584   ;;  %vm696_vm10 = vcmask 257024  }
   0xd   : > { %s307_s17 = scalar_lea.vmem %s1019_s0, %s765_s11  ;;  %v356_v26 = vshrl.u32 %v355_v25, 7  ;;  %v358_v27 = vand.u32 127, %v355_v25  ;;  %v822_v28 = vld [vmem:[%s310_s14] ss:$0 sm:$0xff]  ;;  %s865_s13 = smov 48  }
   0xe   : > { %v941_v2 = vld [vmem:[%s307_s17] sm:$0xf]  ;;  %s866_s14 = smov 8   ;;  %s867_s15 = smov 16  }
   0xf   : > { %vm359_vm2 = vcmp.gt.s32.totalorder %v358_v27, %v356_v26  ;;  %s868_s16 = smov 24  }
  0x10   : > { %348 = vmatpush.bf16.msra.mxu0 %v795_v1 }
  0x13   : > { %775 = vmatmul.msk.bf16.vlgmr.msra.gmra.mxu0 %vm337_vm0, %v941_v2 }
  0x90   : > { %v350_v4 = vpop.f32.mrf.mxu0 }
  0x91   : > { %v351_v5 = vadd.f32 %v823_v3, %v350_v4 }
  0x93   : > { %v360_v6 = vmul.f32 0.35355338, %v351_v5  ;;  %v362_v7 = vpack.c.bf16 %v351_v5, %v351_v5 }
  0x95   : > { %v361_v8 = vpack.c.bf16 %v360_v6, %v360_v6  ;;  %v367_v9 = vunpack.c.l.b16 %v362_v7 }
  0x97   : > { %v948_v10 = vpack.c.b16 %v367_v9, %v367_v9  ;;  %v427_v11 = vunpack.c.l.b16 %v361_v8 }
  0x98   : > { %v352_v12 = vpop.f32.mrf.mxu0 }
  0x99   : > { %369 = vrot.lane.b32.xlu0 %v948_v10, %s855_s20  ;;  %v428_v13 = vpack.c.b16 %v427_v11, %v427_v11 }
  0x9b   : > { %543 = vrot.lane.b32.xlu2 %v428_v13, %s856_s21  ;;  %429 = vrot.lane.b32.xlu1 %v428_v13, %s857_s22 }
  0xa1   : > { %431 = vrot.lane.b32.xlu0 %v948_v10, %s858_s23 }
  0xa3   : > { %488 = vrot.lane.b32.xlu2 %v948_v10, %s859_s24  ;;  %545 = vrot.lane.b32.xlu1 %v948_v10, %s860_s25 }
  0xa9   : > { %486 = vrot.lane.b32.xlu0 %v428_v13, %s861_s26 }
  0xf5   : > { %v544_v14 = vpop.permute.xlu2 %543 }
  0xfd   : > { %v489_v15 = vpop.permute.xlu2 %488 }
  0xfe   : > { %v494_v16 = vsel %vm371_vm1, %v489_v15, 0 }
  0xff   : > { %503 = vmatpush.bf16.xpose.msrb.mxu0 %v494_v16 }
 0x10b   : > { %v370_v17 = vpop.permute.xlu0 %369 }
 0x10c   : > { %v376_v18 = vsel %vm371_vm1, %v370_v17, 0 }
 0x10d   : > { %385 = vmatpush.bf16.xpose.msra.mxu1 %v376_v18  ;;  %v430_v19 = vpop.permute.xlu1 %429 }
 0x113   : > { %v432_v20 = vpop.permute.xlu0 %431 }
 0x114   : > { %776 = vmatmul.msk.bf16.vlgmr.msra.gmra.mxu1 %vm371_vm1, %v361_v8  ;;  %v437_v21 = vsel %vm371_vm1, %v432_v20, 0 }
 0x115   : > { %446 = vmatpush.bf16.xpose.msra.mxu3 %v437_v21  ;;  %v546_v22 = vpop.permute.xlu1 %545 }
 0x116   : > { %v551_v23 = vsel %vm371_vm1, %v546_v22, 0 }
 0x11b   : > { %v487_v24 = vpop.permute.xlu0 %486 }
 0x11c   : > { %778 = vmatmul.msk.bf16.vlgmr.msra.gmra.mxu3 %vm371_vm1, %v430_v19  ;;  %780 = vmatmul.msk.bf16.vlgmr.msrb.gmra.mxu0 %vm371_vm1, %v487_v24 }
 0x11d   : > { %560 = vmatpush.bf16.xpose.msrb.mxu3 %v551_v23 }
 0x12c   : > { %782 = vmatmul.msk.bf16.vlgmr.msrb.gmra.mxu3 %vm371_vm1, %v544_v14 }
 0x191   : > { %v387_v29 = vpop.f32.mrf.mxu1 }
 0x192   : > { %v388_v30 = vadd.f32 %v822_v28, %v387_v29 }
 0x194   : > { %v391_v31 = vsel %vm359_vm2, -1e+09, %v388_v30 }
 0x195   : > { %v392_v32 = vsel %vm371_vm1, %v391_v31, -inf }
 0x196   : > { %393 = vmax.xlane.f32.xlu1 %v392_v32 }
 0x199   : > { %v389_v33 = vpop.f32.mrf.mxu1  ;;  %v505_v34 = vpop.f32.mrf.mxu0 }
 0x19a   : > { %v506_v40 = vadd.f32 %v822_v28, %v505_v34 }
 0x19c   : > { %v509_v42 = vsel %vm359_vm2, -1e+09, %v506_v40 }
 0x19d   : > { %v510_v43 = vsel %vm371_vm1, %v509_v42, -inf }
 0x19f   : > { %v448_v35 = vpop.f32.mrf.mxu3 }
 0x1a0   : > { %v449_v36 = vadd.f32 %v822_v28, %v448_v35 }
 0x1a1   : > { %v507_v37 = vpop.f32.mrf.mxu0 }
 0x1a2   : > { %v452_v38 = vsel %vm359_vm2, -1e+09, %v449_v36 }
 0x1a3   : > { %v453_v39 = vsel %vm371_vm1, %v452_v38, -inf }
 0x1a4   : > { %454 = vmax.xlane.f32.xlu2 %v453_v39  ;;  %v797_v39 = vld [vmem:[%s1022_s3] sm:$0xff] }
 0x1a7   : > { %v450_v41 = vpop.f32.mrf.mxu3 }
 0x1ac   : > { %511 = vmax.xlane.f32.xlu2 %v510_v43 }
 0x1af   : > { %v562_v44 = vpop.f32.mrf.mxu3 }
 0x1b0   : > { %v563_v45 = vadd.f32 %v822_v28, %v562_v44 }
 0x1b2   : > { %v566_v46 = vsel %vm359_vm2, -1e+09, %v563_v45 }
 0x1b3   : > { %v567_v47 = vsel %vm371_vm1, %v566_v46, -inf }
 0x1b4   : > { %568 = vmax.xlane.f32.xlu0 %v567_v47  ;;  %v824_v47 = vld [vmem:[%s1023_s4] ss:$0 sm:$0xff] }
 0x1b7   : > { %v564_v48 = vpop.f32.mrf.mxu3 }
 0x1b8   : > { %v654_v48 = vunpack.c.l.bf16 %v941_v2 }
 0x1c4   : > { %404 = vrot.lane.b32.xlu2 %v948_v10, %s862_s9  ;;  %s314_s9 = scalar_lea.vmem %s1027_s8, %s765_s11 }
 0x1cc   : > { %579 = vrot.lane.b32.xlu2 %v948_v10, %s863_s10 }
 0x209   : > { %v394_v49 = vpop.xlane.xlu1 %393 }
 0x20a   : > { %v395_v50 = vsub.f32 %v391_v31, %v394_v49 }
 0x20c   : > { %v396_v51 = vmul.f32 1.442695, %v395_v50 }
 0x20e   : > { %827 = vpow2.f32 %v396_v51 }
 0x214   : > { %v828_v52 = vpop.eup %827 }
 0x215   : > { %v398_v53 = vsel %vm371_vm1, %v828_v52, 0.0 }
 0x216   : > { %399 = vadd.xlane.f32.xlu1 %v398_v53 }
 0x217   : > { %v455_v54 = vpop.xlane.xlu2 %454 }
 0x218   : > { %v456_v57 = vsub.f32 %v452_v38, %v455_v54  ;;  %v798_v38 = vld [vmem:[%s1022_s3 + $0x8] sm:$0xff]  ;;  %v869_v54 = vmov 32.0  }
 0x219   : > { %647 = vmatpush.bf16.msra.mxu0 %v798_v38 }
 0x21a   : > { %v457_v59 = vmul.f32 1.442695, %v456_v57 }
 0x21d   : > { %648 = vmatpush.bf16.msra.mxu0 %v797_v39 }
 0x21f   : > { %v512_v55 = vpop.xlane.xlu2 %511 }
 0x220   : > { %v513_v56 = vsub.f32 %v509_v42, %v512_v55 }
 0x222   : > { %v514_v58 = vmul.f32 1.442695, %v513_v56 }
 0x224   : > { %829 = vpow2.f32 %v514_v58 }
 0x225   : > { %831 = vpow2.f32 %v457_v59 }
 0x227   : > { %v405_v60 = vpop.permute.xlu2 %404  ;;  %v569_v61 = vpop.xlane.xlu0 %568 }
 0x228   : > { %v411_v62 = vsel %vm409_vm3, %v405_v60, 0  ;;  %v570_v0 = vsub.f32 %v566_v46, %v569_v61 }
 0x229   : > { %420 = vmatpush.bf16.msra.mxu2 %v411_v62 }
 0x22a   : > { %v830_v63 = vpop.eup %829  ;;  %v571_v3 = vmul.f32 1.442695, %v570_v0 }
 0x22b   : > { %v516_v1 = vsel %vm371_vm1, %v830_v63, 0.0  ;;  %v832_v4 = vpop.eup %831 }
 0x22c   : > { %517 = vadd.xlane.f32.xlu0 %v516_v1  ;;  %833 = vpow2.f32 %v571_v3  ;;  %v459_v5 = vsel %vm371_vm1, %v832_v4, 0.0 }
 0x22f   : > { %465 = vrot.lane.b32.xlu1 %v948_v10, %s864_s12  ;;  %v580_v14 = vpop.permute.xlu2 %579 }
 0x230   : > { %v585_v17 = vsel %vm409_vm3, %v580_v14, 0  ;;  %v826_v14 = vld [vmem:[%s1026_s7] ss:$0 sm:$0xff] }
 0x232   : > { %v834_v6 = vpop.eup %833 }
 0x233   : > { %v573_v7 = vsel %vm371_vm1, %v834_v6, 0.0 }
 0x234   : > { %460 = vadd.xlane.f32.xlu0 %v459_v5 }
 0x23c   : > { %574 = vadd.xlane.f32.xlu0 %v573_v7 }
 0x250   : > { %522 = vrot.lane.b32.xlu0 %v948_v10, %s865_s13 }
 0x289   : > { %v400_v8 = vpop.xlane.xlu1 %399 }
 0x28a   : > { %835 = vrcp.f32 %v400_v8 }
 0x290   : > { %v836_v9 = vpop.eup %835 }
 0x291   : > { %v402_v11 = vmul.f32 %v836_v9, %v828_v52 }
 0x293   : > { %v403_v12 = vpack.c.bf16 %v402_v11, %v402_v11 }
 0x295   : > { %777 = vmatmul.msk.bf16.vlgmr.msra.gmra.mxu2 %vm371_vm1, %v403_v12  ;;  %v825_v12 = vld [vmem:[%s1025_s6] ss:$0 sm:$0xff] }
 0x29f   : > { %v518_v13 = vpop.xlane.xlu0 %517 }
 0x2a1   : > { %v466_v15 = vpop.permute.xlu1 %465 }
 0x2a2   : > { %v471_v16 = vsel %vm409_vm3, %v466_v15, 0 }
 0x2a3   : > { %480 = vmatpush.bf16.msrb.mxu2 %v471_v16 }
 0x2a7   : > { %594 = vmatpush.bf16.msra.mxu2 %v585_v17  ;;  %v461_v18 = vpop.xlane.xlu0 %460 }
 0x2a8   : > { %837 = vrcp.f32 %v461_v18 }
 0x2ae   : > { %v838_v19 = vpop.eup %837 }
 0x2af   : > { %v463_v10 = vmul.f32 %v838_v19, %v832_v4  ;;  %v575_v20 = vpop.xlane.xlu0 %574 }
 0x2b0   : > { %839 = vrcp.f32 %v575_v20 }
 0x2b1   : > { %v464_v21 = vpack.c.bf16 %v463_v10, %v463_v10  ;;  %841 = vrcp.f32 %v518_v13 }
 0x2b2   : > { %843 = vrcp.f32 %v869_v54 }
 0x2b3   : > { %779 = vmatmul.msk.bf16.vlgmr.msrb.gmra.mxu2 %vm371_vm1, %v464_v21 }
 0x2b6   : > { %v840_v22 = vpop.eup %839 }
 0x2b7   : > { %v577_v23 = vmul.f32 %v840_v22, %v834_v6  ;;  %v842_v24 = vpop.eup %841 }
 0x2b8   : > { %v520_v25 = vmul.f32 %v842_v24, %v830_v63  ;;  %v844_v55 = vpop.eup %843 }
 0x2b9   : > { %v578_v26 = vpack.c.bf16 %v577_v23, %v577_v23  ;;  %v662_v56 = vmul.f32 32.0, %v844_v55  ;;  %vm666_vm6 = vweird.f32 %v844_v55 }
 0x2ba   : > { %v521_v29 = vpack.c.bf16 %v520_v25, %v520_v25 }
 0x2bb   : > { %v663_v57 = vsub.f32 1.0, %v662_v56 }
 0x2bd   : > { %v664_v58 = vmul.f32 %v844_v55, %v663_v57 }
 0x2bf   : > { %v665_v59 = vadd.f32 %v844_v55, %v664_v58 }
 0x2c1   : > { %v667_v60 = vsel %vm666_vm6, %v844_v55, %v665_v59 }
 0x2c2   : > { %v523_v27 = vpop.permute.xlu0 %522 }
 0x2c3   : > { %783 = vmatmul.msk.bf16.vlgmr.msra.gmra.mxu2 %vm371_vm1, %v578_v26  ;;  %v528_v28 = vsel %vm409_vm3, %v523_v27, 0 }
 0x2c4   : > { %537 = vmatpush.bf16.msrb.mxu1 %v528_v28 }
 0x2c7   : > { %781 = vmatmul.msk.bf16.vlgmr.msrb.gmra.mxu1 %vm371_vm1, %v521_v29 }
 0x318   : > { %v422_v30 = vpop.f32.mrf.mxu2 }
 0x320   : > { %v424_v31 = vpop.f32.mrf.mxu2 }
 0x336   : > { %v482_v32 = vpop.f32.mrf.mxu2 }
 0x337   : > { %601 = vrot.lane.b32.xlu1 %v482_v32, %s866_s14 }
 0x33e   : > { %v484_v33 = vpop.f32.mrf.mxu2 }
 0x344   : > { %v539_v34 = vpop.f32.mrf.mxu1 }
 0x345   : > { %605 = vrot.lane.b32.xlu2 %v539_v34, %s867_s15 }
 0x346   : > { %v596_v35 = vpop.f32.mrf.mxu2 }
 0x347   : > { %609 = vrot.lane.b32.xlu1 %v596_v35, %s868_s16 }
 0x34c   : > { %v541_v36 = vpop.f32.mrf.mxu1 }
 0x34e   : > { %v598_v37 = vpop.f32.mrf.mxu2 }
 0x39f   : > { %v606_v42 = vpop.permute.xlu2 %605 }
 0x3a9   : > { %v602_v40 = vpop.permute.xlu1 %601 }
 0x3aa   : > { %v612_v41 = vsel %vm371_vm1, %v422_v30, %v602_v40 }
 0x3ab   : > { %v614_v43 = vsel %vm613_vm4, %v612_v41, %v606_v42 }
 0x3b9   : > { %v610_v44 = vpop.permute.xlu1 %609 }
 0x3ba   : > { %v616_v45 = vsel %vm615_vm5, %v614_v43, %v610_v44 }
 0x3bb   : > { %v617_v46 = vpack.c.bf16 %v616_v45, %v616_v45 }
 0x3bd   : > { %792 = vmatmul.msk.bf16.vlgmr.msra.gmra.mxu0 %vm337_vm0, %v617_v46 }
 0x43a   : > { %v650_v49 = vpop.f32.mrf.mxu0 }
 0x43b   : > { %v651_v50 = vadd.f32 %v824_v47, %v650_v49 }
 0x43d   : > { %v655_v51 = vadd.f32 %v654_v48, %v651_v50 }
 0x43f   : > { %v658_v52 = vsel %vm337_vm0, %v655_v51, 0.0 }
 0x440   : > { %659 = vadd.xlane.f32.xlu2 %v658_v52 }
 0x442   : > { %v652_v53 = vpop.f32.mrf.mxu0 }
 0x4b3   : > { %v660_v61 = vpop.xlane.xlu2 %659 }
 0x4b4   : > { %v668_v62 = vmul.f32 %v667_v60, %v660_v61 }
 0x4b6   : > { %v669_v63 = vsub.f32 %v655_v51, %v668_v62 }
 0x4b8   : > { %v670_v2 = vmul.f32 %v669_v63, %v669_v63 }
 0x4ba   : > { %v671_v0 = vsel %vm337_vm0, %v670_v2, 0.0 }
 0x4bb   : > { %672 = vadd.xlane.f32.xlu1 %v671_v0 }
 0x52e   : > { %v673_v1 = vpop.xlane.xlu1 %672 }
 0x52f   : > { %v674_v3 = vmul.f32 %v673_v1, %v667_v60 }
 0x531   : > { %v675_v4 = vadd.f32 1e-05, %v674_v3 }
 0x533   : > { %845 = vrsqrt.f32 %v675_v4  ;;  %vm682_vm8 = vweird.f32 %v675_v4 }
 0x539   : > { %v846_v5 = vpop.eup %845 }
 0x53a   : > { %v677_v6 = vmul.f32 %v846_v5, %v675_v4  ;;  %vm683_vm7 = vweird.f32 %v846_v5 }
 0x53b   : > { %vm684_vm9 = vmor %vm682_vm8, %vm683_vm7 }
 0x53c   : > { %v678_v7 = vmul.f32 %v846_v5, %v677_v6 }
 0x53e   : > { %v679_v8 = vmul.f32 0.5, %v678_v7 }
 0x540   : > { %v680_v9 = vsub.f32 1.5, %v679_v8 }
 0x542   : > { %v681_v11 = vmul.f32 %v846_v5, %v680_v9 }
 0x544   : > { %v685_v13 = vsel %vm684_vm9, %v846_v5, %v681_v11 }
 0x545   : > { %v686_v15 = vmul.f32 %v685_v13, %v669_v63 }
 0x547   : > { %v690_v16 = vmul.f32 %v825_v12, %v686_v15 }
 0x549   : > { %v694_v17 = vadd.f32 %v826_v14, %v690_v16 }
 0x54b   : > { %v695_v18 = vpack.c.bf16 %v694_v17, %v694_v17 }
 0x54d   : > { %697 = vst.msk [vmem:[%s314_s9] sm:$0xf] %vm696_vm10, %v695_v18 }
 0x54e PF: > { %s18_s27 = sadd.s32 1, %s853_s27  }
 0x54f   : > { %p15_p4 = scmp.ge.s32.totalorder %s18_s27, 4  }
 0x551   :  { %17 = sbr.rel (!%p15_p4) target bundleno = 1 (0x1), region = 85 }

// kernel: forward.20
= control target key start
LH: loop header
LB: loop body
LE: loop exit
PB: predicated region body
PF: predicated region fallthrough
CT: control target
= control target key end

     0   :  { %12 = vsyncpa [#allocation3], 0  ;;  %s953_s0 = inlined_call_operand.vmem [shape: bf16[16,32], index: 0, kind: input, shape index: {}]   ;;  %s954_s1 = inlined_call_operand.vmem [shape: bf16[32,64], index: 1, kind: input, shape index: {}]   ;;  %s955_s2 = inlined_call_operand.hbm [shape: f32[1,64], index: 2, kind: input, shape index: {}]   ;;  %s956_s3 = inlined_call_operand.vmem [shape: bf16[64,32], index: 3, kind: input, shape index: {}]   ;;  %s957_s4 = inlined_call_operand.hbm [shape: f32[1,32], index: 4, kind: input, shape index: {}]   ;;  %s958_s5 = inlined_call_operand.hbm [shape: f32[1,32], index: 5, kind: input, shape index: {}]   ;;  %s959_s6 = inlined_call_operand.hbm [shape: f32[1,32], index: 6, kind: input, shape index: {}]   ;;  %s960_s7 = inlined_call_operand.vmem [shape: bf16[16,32], index: 7, kind: output, shape index: {}]  }
   0x1   :  { %13 = vsyncpa [#allocation5], 0 }
   0x2   :  { %14 = vsyncpa [#allocation8], 0  ;;  %s857_s24 = smov 0  }
   0x3 LB: > { %s233_s27 = sshll.u32 %s957_s4, 4  ;;  %s866_s28 = sadd.s32 4294967295, %s810_s24   ;;  %s810_s24 = sphi %s857_s24, %s20_s24   ;;  %s234_s27 = int_to_ptr.hbm [resolvable:$true] %s233_s27 }
   0x4   : > { %p567_p0 = scmp.ge.s32.totalorder %s810_s24, 1  ;;  %p203_p1 = scmp.lt.s32.totalorder %s810_s24, 3 }
   0x5   : > { %p643_p2 = scmp.eq.s32.totalorder %s866_s28, 0  ;;  %s812_s30 = smov [#allocation4]  }
   0x6   : > { %p871_p3 = pnand %p567_p0, %p203_p1  ;;  %s235_s8 = sshll.u32 %s812_s30, 4  ;;  %s236_s8 = int_to_ptr.vmem [resolvable:$true] %s235_s8 }
   0x7   : > { %s218_s11 = sshll.u32 %s955_s2, 4  ;;  %s245_s14 = sshll.u32 %s958_s5, 4  ;;  %s219_s11 = int_to_ptr.hbm [resolvable:$true] %s218_s11  ;;  %s246_s14 = int_to_ptr.hbm [resolvable:$true] %s245_s14 }
   0x8   : > { %p630_p4 = pneg %p871_p3  ;;  %s813_s16 = smov [#allocation2]  }
   0x9   : > { %s220_s17 = sshll.u32 %s813_s16, 4  ;;  %s814_s18 = smov [#allocation6]   ;;  %s221_s17 = int_to_ptr.vmem [resolvable:$true] %s220_s17 }
   0xa   : > { %p885_p5 = pnand %p643_p2, %p630_p4  ;;  %s247_s19 = sshll.u32 %s814_s18, 4  ;;  %s248_s19 = int_to_ptr.vmem [resolvable:$true] %s247_s19 }
   0xb   : > { %s257_s22 = sshll.u32 %s959_s6, 4  ;;  %s815_s23 = smov [#allocation7]   ;;  %s258_s22 = int_to_ptr.hbm [resolvable:$true] %s257_s22 }
   0xc   : > { %636 = dma.hbm_to_vmem [thread:$0]  (!%p885_p5), %s234_s27, 16, %s236_s8, [#allocation5]  }
   0xd   : > { %633 = dma.hbm_to_vmem [thread:$0]  (!%p885_p5), %s219_s11, 16, %s221_s17, [#allocation3]  }
   0xe   : > { %639 = dma.hbm_to_vmem [thread:$0]  (!%p885_p5), %s246_s14, 16, %s248_s19, [#allocation5]  }
   0xf   : > { %s259_s25 = sshll.u32 %s815_s23, 4  ;;  %279 = sbr.rel (%p871_p3) target bundleno = 566 (0x236), region = 48  ;;  %s260_s25 = int_to_ptr.vmem [resolvable:$true] %s259_s25 }
  0x10   : > { %642 = dma.hbm_to_vmem [thread:$0]  (!%p885_p5), %s258_s22, 16, %s260_s25, [#allocation8]  }
  0x14   : > { %797 = dma.done.wait (%p643_p2), [#allocation3], 16  }
  0x15   : > { %799 = vsyncadd (%p643_p2), [#allocation3], 4294967280 }
  0x16   : > { %801 = dma.done.wait (%p643_p2), [#allocation5], 32  }
  0x17   : > { %803 = vsyncadd (%p643_p2), [#allocation5], 4294967264 }
  0x18   : > { %805 = dma.done.wait (%p643_p2), [#allocation8], 16  }
  0x19   : > { %807 = vsyncadd (%p643_p2), [#allocation8], 4294967280  ;;  %p325_p6 = scmp.lt.s32.totalorder %s866_s28, 1  ;;  %v609_v0 = vld [vmem:[%s954_s1 + $0x8] sm:$0xff]  ;;  %v613_v1 = vld [vmem:[%s956_s3 + $0x18] sm:$0xff]  ;;  %vm355_vm0 = vcmask 261120  }
  0x1a   : > { %365 = vmatpush.bf16.msra.mxu0 %v609_v0  ;;  %v608_v2 = vld [vmem:[%s954_s1] sm:$0xff]  ;;  %418 = vmatpush.bf16.msra.mxu1 %v613_v1  ;;  %v612_v3 = vld [vmem:[%s956_s3 + $0x10] sm:$0xff]  ;;  %v611_v5 = vld [vmem:[%s956_s3 + $0x8] sm:$0xff]  ;;  %vm410_vm1 = vcmask 523264   ;;  %v816_v20 = vmov 32.0   ;;  %vm469_vm6 = vcmask 257024  }
  0x1b   : > { %s964_s28 = smov (!%p325_p6, %s866_s28), 1  ;;  %v610_v6 = vld [vmem:[%s956_s3] sm:$0xff]  ;;  %668 = vrcp.f32 %v816_v20 }
  0x1c   : > { %s578_s29 = sshll.u32 %s964_s28, 2  ;;  %v664_v7 = vld [vmem:[#allocation2] ss:$0 sm:$0xff]  ;;  %v665_v13 = vld [vmem:[#allocation4] ss:$0 sm:$0xff] }
  0x1d   : > { %s328_s13 = scalar_lea.vmem %s953_s0, %s578_s29  ;;  %v666_v41 = vld [vmem:[#allocation6] ss:$0 sm:$0xff]  ;;  %v667_v43 = vld [vmem:[#allocation7] ss:$0 sm:$0xff]  ;;  %s332_s22 = scalar_lea.vmem %s960_s7, %s578_s29 }
  0x1e   : > { %366 = vmatpush.bf16.msra.mxu0 %v608_v2  ;;  %v334_v4 = vld [vmem:[%s328_s13] sm:$0xf]  ;;  %419 = vmatpush.bf16.msra.mxu1 %v612_v3 }
  0x1f   : > { %v427_v14 = vunpack.c.l.bf16 %v334_v4 }
  0x21   : > { %588 = vmatmul.msk.bf16.vlgmr.msra.gmra.mxu0 %vm355_vm0, %v334_v4  ;;  %v669_v21 = vpop.eup %668 }
  0x22   : > { %420 = vmatpush.bf16.msra.mxu1 %v611_v5  ;;  %v435_v22 = vmul.f32 32.0, %v669_v21  ;;  %vm439_vm2 = vweird.f32 %v669_v21 }
  0x24   : > { %v436_v23 = vsub.f32 1.0, %v435_v22 }
  0x26   : > { %421 = vmatpush.bf16.msra.mxu1 %v610_v6  ;;  %v437_v24 = vmul.f32 %v669_v21, %v436_v23 }
  0x28   : > { %v438_v25 = vadd.f32 %v669_v21, %v437_v24 }
  0x2a   : > { %v440_v26 = vsel %vm439_vm2, %v669_v21, %v438_v25 }
  0x9e   : > { %v368_v8 = vpop.f32.mrf.mxu0 }
  0x9f   : > { %v369_v9 = vadd.f32 %v664_v7, %v368_v8 }
  0xa1   : > { %v372_v10 = vmax.f32 %v369_v9, 0.0 }
  0xa3   : > { %v373_v11 = vpack.c.bf16 %v372_v10, %v372_v10 }
  0xa5   : > { %605 = vmatmul.msk.bf16.vlgmr.msra.gmra.mxu1 %vm410_vm1, %v373_v11 }
  0xa6   : > { %v370_v12 = vpop.f32.mrf.mxu0 }
 0x122   : > { %v423_v15 = vpop.f32.mrf.mxu1 }
 0x123   : > { %v424_v16 = vadd.f32 %v665_v13, %v423_v15 }
 0x125   : > { %v428_v17 = vadd.f32 %v427_v14, %v424_v16 }
 0x127   : > { %v431_v18 = vsel %vm355_vm0, %v428_v17, 0.0 }
 0x128   : > { %432 = vadd.xlane.f32.xlu0 %v431_v18 }
 0x12a   : > { %v425_v19 = vpop.f32.mrf.mxu1 }
 0x19b   : > { %v433_v27 = vpop.xlane.xlu0 %432 }
 0x19c   : > { %v441_v28 = vmul.f32 %v440_v26, %v433_v27 }
 0x19e   : > { %v442_v29 = vsub.f32 %v428_v17, %v441_v28 }
 0x1a0   : > { %v443_v30 = vmul.f32 %v442_v29, %v442_v29 }
 0x1a2   : > { %v444_v31 = vsel %vm355_vm0, %v443_v30, 0.0 }
 0x1a3   : > { %445 = vadd.xlane.f32.xlu0 %v444_v31 }
 0x216   : > { %v446_v32 = vpop.xlane.xlu0 %445 }
 0x217   : > { %v447_v33 = vmul.f32 %v446_v32, %v440_v26 }
 0x219   : > { %v448_v34 = vadd.f32 1e-05, %v447_v33 }
 0x21b   : > { %670 = vrsqrt.f32 %v448_v34  ;;  %vm455_vm4 = vweird.f32 %v448_v34 }
 0x221   : > { %v671_v35 = vpop.eup %670 }
 0x222   : > { %v450_v36 = vmul.f32 %v671_v35, %v448_v34  ;;  %vm456_vm3 = vweird.f32 %v671_v35 }
 0x223   : > { %vm457_vm5 = vmor %vm455_vm4, %vm456_vm3 }
 0x224   : > { %v451_v37 = vmul.f32 %v671_v35, %v450_v36 }
 0x226   : > { %v452_v38 = vmul.f32 0.5, %v451_v37 }
 0x228   : > { %v453_v39 = vsub.f32 1.5, %v452_v38 }
 0x22a   : > { %v454_v40 = vmul.f32 %v671_v35, %v453_v39 }
 0x22c   : > { %v458_v42 = vsel %vm457_vm5, %v671_v35, %v454_v40 }
 0x22d   : > { %v459_v44 = vmul.f32 %v458_v42, %v442_v29 }
 0x22f   : > { %v463_v45 = vmul.f32 %v666_v41, %v459_v44 }
 0x231   : > { %v467_v46 = vadd.f32 %v667_v43, %v463_v45 }
 0x233   : > { %v468_v47 = vpack.c.bf16 %v467_v46, %v467_v46 }
 0x235   : > { %470 = vst.msk [vmem:[%s332_s22] sm:$0xf] %vm469_vm6, %v468_v47 }
 0x236 PF: > { %s20_s24 = sadd.s32 1, %s810_s24  }
 0x237   : > { %p17_p7 = scmp.ge.s32.totalorder %s20_s24, 4  }
 0x239   :  { %19 = sbr.rel (!%p17_p7) target bundleno = 3 (0x3), region = 95 }
 0x23e   :  { %490 = vsyncpa [#allocation3], 1 }
 0x23f   :  { %492 = vsyncpa [#allocation3 + $0x1], 1 }
 0x240   :  { %493 = vsyncpa [#allocation5], 1 }
 0x241   :  { %494 = vsyncpa [#allocation8], 1 }

// kernel: forward.19
= control target key start
LH: loop header
LB: loop body
LE: loop exit
PB: predicated region body
PF: predicated region fallthrough
CT: control target
= control target key end

     0   :  { %16 = vsyncpa [#allocation3], 0  ;;  %s1415_s0 = inlined_call_operand.vmem [shape: bf16[2,8,32], index: 0, kind: input, shape index: {}]   ;;  %s1416_s1 = inlined_call_operand.vmem [shape: bf16[2,8,32], index: 1, kind: input, shape index: {}]   ;;  %s1417_s2 = inlined_call_operand.vmem [shape: bf16[32,32], index: 2, kind: input, shape index: {}]   ;;  %s1418_s3 = inlined_call_operand.vmem [shape: f32[1,32], index: 3, kind: input, shape index: {}]   ;;  %s1419_s4 = inlined_call_operand.vmem [shape: bf16[32,64], index: 4, kind: input, shape index: {}]   ;;  %s1420_s5 = inlined_call_operand.vmem [shape: f32[1,64], index: 5, kind: input, shape index: {}]   ;;  %s1421_s6 = inlined_call_operand.vmem [shape: bf16[32,32], index: 6, kind: input, shape index: {}]   ;;  %s1422_s7 = inlined_call_operand.hbm [shape: f32[1,32], index: 7, kind: input, shape index: {}]   ;;  %s1423_s8 = inlined_call_operand.vmem [shape: f32[2,1,8], index: 8, kind: input, shape index: {}]   ;;  %s1424_s9 = inlined_call_operand.hbm [shape: f32[1,32], index: 9, kind: input, shape index: {}]   ;;  %s1425_s10 = inlined_call_operand.hbm [shape: f32[1,32], index: 10, kind: input, shape index: {}]   ;;  %s1426_s11 = inlined_call_operand.vmem [shape: bf16[2,8,32], index: 11, kind: output, shape index: {}]  }
   0x1   :  { %17 = vsyncpa [#allocation5], 0  ;;  %s1284_s17 = smov 0  }
   0x2 LB: > { %s339_s20 = sshll.u32 %s1424_s9, 4  ;;  %s971_s21 = sadd.s32 4294967295, %s1208_s17   ;;  %s1208_s17 = sphi %s1284_s17, %s23_s17   ;;  %s340_s20 = int_to_ptr.hbm [resolvable:$true] %s339_s20 }
   0x3   : > { %p973_p0 = scmp.ge.s32.totalorder %s1208_s17, 1  ;;  %p300_p1 = scmp.lt.s32.totalorder %s1208_s17, 3 }
   0x4   : > { %p1050_p2 = scmp.eq.s32.totalorder %s971_s21, 0  ;;  %s1210_s23 = smov [#allocation4]  }
   0x5   : > { %p1295_p3 = pnand %p973_p0, %p300_p1  ;;  %s341_s24 = sshll.u32 %s1210_s23, 4  ;;  %s342_s24 = int_to_ptr.vmem [resolvable:$true] %s341_s24 }
   0x6   : > { %s327_s27 = sshll.u32 %s1422_s7, 4  ;;  %s351_s30 = sshll.u32 %s1425_s10, 4  ;;  %s328_s27 = int_to_ptr.hbm [resolvable:$true] %s327_s27  ;;  %s352_s30 = int_to_ptr.hbm [resolvable:$true] %s351_s30 }
   0x7   : > { %p1040_p4 = pneg %p1295_p3  ;;  %s1211_s12 = smov [#allocation2]  }
   0x8   : > { %s329_s13 = sshll.u32 %s1211_s12, 4  ;;  %s1212_s14 = smov [#allocation6]   ;;  %s330_s13 = int_to_ptr.vmem [resolvable:$true] %s329_s13 }
   0x9   : > { %p1041_p5 = pnand %p1050_p2, %p1040_p4  ;;  %s353_s15 = sshll.u32 %s1212_s14, 4  ;;  %s354_s15 = int_to_ptr.vmem [resolvable:$true] %s353_s15 }
   0xa   : > { %386 = sbr.rel (%p1295_p3) target bundleno = 1615 (0x64f), region = 64 }
   0xb   : > { %1046 = dma.hbm_to_vmem [thread:$0]  (!%p1041_p5), %s340_s20, 16, %s342_s24, [#allocation5]  }
   0xc   : > { %1043 = dma.hbm_to_vmem [thread:$0]  (!%p1041_p5), %s328_s27, 16, %s330_s13, [#allocation3]  }
   0xd   : > { %1049 = dma.hbm_to_vmem [thread:$0]  (!%p1041_p5), %s352_s30, 16, %s354_s15, [#allocation5]  }
   0xf   : > { %1199 = dma.done.wait (%p1050_p2), [#allocation3], 16  }
  0x10   : > { %1201 = vsyncadd (%p1050_p2), [#allocation3], 4294967280 }
  0x11   : > { %1203 = dma.done.wait (%p1050_p2), [#allocation5], 32  }
  0x12   : > { %1205 = vsyncadd (%p1050_p2), [#allocation5], 4294967264  ;;  %p442_p6 = scmp.lt.s32.totalorder %s971_s21, 1  ;;  %v1023_v0 = vld [vmem:[%s1417_s2 + $0x8] sm:$0xff]  ;;  %v1022_v2 = vld [vmem:[%s1417_s2] sm:$0xff]  ;;  %vm480_vm0 = vcmask 261120  }
  0x13   : > { %v1025_v1 = vld [vmem:[%s1419_s4 + $0x8] sm:$0xff]  ;;  %490 = vmatpush.bf16.msra.mxu0 %v1023_v0  ;;  %v1024_v3 = vld [vmem:[%s1419_s4] sm:$0xff]  ;;  %vm540_vm1 = vcmask 64512   ;;  %s1213_s24 = smov 96   ;;  %s1214_s25 = smov 120   ;;  %vm580_vm2 = vcmask 1043456  }
  0x14   : > { %s1429_s21 = smov (!%p442_p6, %s971_s21), 1  ;;  %526 = vmatpush.bf16.msra.mxu1 %v1025_v1  ;;  %v1078_v6 = vld [vmem:[%s1418_s3] ss:$0 sm:$0xff]  ;;  %s1215_s26 = smov 112   ;;  %vm781_vm3 = vcmask 130048   ;;  %vm783_vm4 = vcmask 195584  }
  0x15   : > { %s1323_s22 = sshll.u32 %s1429_s21, 2  ;;  %s452_s29 = scalar_lea.vmem %s1423_s8, %s1429_s21  ;;  %v1079_v7 = vld [vmem:[%s1420_s5] ss:$0 sm:$0xff]  ;;  %vm864_vm9 = vcmask 257024  }
  0x16   : > { %s445_s13 = scalar_lea.vmem %s1415_s0, %s1323_s22  ;;  %s449_s16 = scalar_lea.vmem %s1416_s1, %s1323_s22  ;;  %v1080_v30 = vld [vmem:[%s452_s29] ss:$0 sm:$0xff] }
  0x17   : > { %491 = vmatpush.bf16.msra.mxu0 %v1022_v2  ;;  %v1343_v4 = vld [vmem:[%s445_s13] sm:$0xf]  ;;  %s1216_s27 = smov 104   ;;  %s1217_s21 = smov 88  }
  0x18   : > { %527 = vmatpush.bf16.msra.mxu1 %v1024_v3  ;;  %v459_v5 = vld [vmem:[%s449_s16] sm:$0xf]  ;;  %s1218_s29 = smov 80   ;;  %s1219_s12 = smov 72  }
  0x19   : > { %s1220_s13 = smov 8   ;;  %s1221_s14 = smov 16  }
  0x1a   : > { %993 = vmatmul.msk.bf16.vlgmr.msra.gmra.mxu0 %vm480_vm0, %v1343_v4  ;;  %s1222_s15 = smov 24  }
  0x1b   : > { %1002 = vmatmul.msk.bf16.vlgmr.msra.gmra.mxu1 %vm480_vm0, %v459_v5 }
  0x97   : > { %v493_v8 = vpop.f32.mrf.mxu0 }
  0x98   : > { %v529_v9 = vpop.f32.mrf.mxu1  ;;  %v494_v10 = vadd.f32 %v1078_v6, %v493_v8 }
  0x99   : > { %v530_v11 = vadd.f32 %v1079_v7, %v529_v9 }
  0x9a   : > { %v534_v12 = vmul.f32 0.35355338, %v494_v10 }
  0x9b   : > { %v536_v13 = vpack.c.bf16 %v530_v11, %v530_v11 }
  0x9c   : > { %v535_v14 = vpack.c.bf16 %v534_v12, %v534_v12 }
  0x9d   : > { %v573_v15 = vunpack.c.l.b16 %v536_v13  ;;  %v545_v16 = vsel %vm540_vm1, %v536_v13, 0 }
  0x9e   : > { %554 = vmatpush.bf16.xpose.msra.mxu2 %v545_v16  ;;  %v598_v17 = vunpack.c.l.b16 %v535_v14 }
  0x9f   : > { %v1355_v18 = vpack.c.b16 %v573_v15, %v573_v15  ;;  %v495_v19 = vpop.f32.mrf.mxu0 }
  0xa0   : > { %v531_v20 = vpop.f32.mrf.mxu1  ;;  %v599_v21 = vpack.c.b16 %v598_v17, %v598_v17 }
  0xa1   : > { %575 = vrot.lane.b32.xlu1 %v1355_v18, %s1213_s24 }
  0xa2   : > { %600 = vrot.lane.b32.xlu2 %v599_v21, %s1214_s25 }
  0xa5   : > { %1003 = vmatmul.msk.bf16.vlgmr.msra.gmra.mxu2 %vm540_vm1, %v535_v14 }
  0xa9   : > { %602 = vrot.lane.b32.xlu1 %v1355_v18, %s1214_s25  ;;  %s456_s25 = scalar_lea.vmem %s1426_s11, %s1323_s22 }
  0xaa   : > { %658 = vrot.lane.b32.xlu2 %v1355_v18, %s1215_s26 }
  0xb1   : > { %656 = vrot.lane.b32.xlu1 %v599_v21, %s1215_s26 }
  0xb2   : > { %712 = vrot.lane.b32.xlu2 %v599_v21, %s1216_s27 }
  0xfc   : > { %v601_v22 = vpop.permute.xlu2 %600 }
 0x104   : > { %v659_v23 = vpop.permute.xlu2 %658 }
 0x105   : > { %v664_v24 = vsel %vm540_vm1, %v659_v23, 0 }
 0x106   : > { %673 = vmatpush.bf16.xpose.msrb.mxu1 %v664_v24 }
 0x10c   : > { %v713_v44 = vpop.permute.xlu2 %712 }
 0x113   : > { %v576_v25 = vpop.permute.xlu1 %575 }
 0x114   : > { %v582_v26 = vsel %vm580_vm2, %v576_v25, 0 }
 0x115   : > { %591 = vmatpush.bf16.msra.mxu3 %v582_v26 }
 0x11b   : > { %v603_v27 = vpop.permute.xlu1 %602 }
 0x11c   : > { %v608_v28 = vsel %vm540_vm1, %v603_v27, 0 }
 0x11d   : > { %617 = vmatpush.bf16.xpose.msrb.mxu3 %v608_v28 }
 0x123   : > { %v657_v29 = vpop.permute.xlu1 %656 }
 0x124   : > { %1007 = vmatmul.msk.bf16.vlgmr.msrb.gmra.mxu1 %vm540_vm1, %v657_v29 }
 0x128   : > { %v556_v31 = vpop.f32.mrf.mxu2 }
 0x129   : > { %v557_v32 = vadd.f32 %v1080_v30, %v556_v31 }
 0x12b   : > { %v560_v33 = vsel %vm540_vm1, %v557_v32, -inf }
 0x12c   : > { %561 = vmax.xlane.f32.xlu0 %v560_v33 }
 0x130   : > { %v558_v34 = vpop.f32.mrf.mxu2 }
 0x19f   : > { %v562_v35 = vpop.xlane.xlu0 %561 }
 0x1a0   : > { %v563_v36 = vsub.f32 %v557_v32, %v562_v35 }
 0x1a1   : > { %v675_v37 = vpop.f32.mrf.mxu1 }
 0x1a2   : > { %v564_v38 = vmul.f32 1.442695, %v563_v36  ;;  %v676_v39 = vadd.f32 %v1080_v30, %v675_v37  ;;  %v1027_v37 = vld [vmem:[%s1421_s6 + $0x8] sm:$0xff] }
 0x1a3   : > { %815 = vmatpush.bf16.msra.mxu1 %v1027_v37 }
 0x1a4   : > { %1084 = vpow2.f32 %v564_v38  ;;  %v679_v40 = vsel %vm540_vm1, %v676_v39, -inf  ;;  %v1026_v38 = vld [vmem:[%s1421_s6] sm:$0xff] }
 0x1a5   : > { %680 = vmax.xlane.f32.xlu2 %v679_v40 }
 0x1a7   : > { %816 = vmatpush.bf16.msra.mxu1 %v1026_v38 }
 0x1a9   : > { %v677_v41 = vpop.f32.mrf.mxu1 }
 0x1aa   : > { %v1085_v42 = vpop.eup %1084 }
 0x1ab   : > { %v566_v43 = vsel %vm540_vm1, %v1085_v42, 0.0 }
 0x1ac   : > { %567 = vadd.xlane.f32.xlu0 %v566_v43 }
 0x1c0   : > { %714 = vrot.lane.b32.xlu0 %v1355_v18, %s1216_s27 }
 0x218   : > { %v681_v45 = vpop.xlane.xlu2 %680 }
 0x219   : > { %v682_v46 = vsub.f32 %v676_v39, %v681_v45 }
 0x21b   : > { %v683_v47 = vmul.f32 1.442695, %v682_v46  ;;  %v1081_v46 = vld [vmem:[#allocation2] ss:$0 sm:$0xff] }
 0x21d   : > { %1086 = vpow2.f32 %v683_v47  ;;  %v822_v47 = vunpack.c.l.bf16 %v1343_v4 }
 0x21f   : > { %v568_v48 = vpop.xlane.xlu0 %567 }
 0x220   : > { %1088 = vrcp.f32 %v568_v48 }
 0x223   : > { %v1087_v49 = vpop.eup %1086 }
 0x224   : > { %v685_v50 = vsel %vm540_vm1, %v1087_v49, 0.0 }
 0x225   : > { %686 = vadd.xlane.f32.xlu2 %v685_v50 }
 0x226   : > { %v1089_v51 = vpop.eup %1088 }
 0x227   : > { %v570_v52 = vmul.f32 %v1089_v51, %v1085_v42 }
 0x229   : > { %v571_v53 = vpack.c.bf16 %v570_v52, %v570_v52 }
 0x22b   : > { %1004 = vmatmul.msk.bf16.vlgmr.msra.gmra.mxu3 %vm540_vm1, %v571_v53  ;;  %v1223_v53 = vmov 32.0  }
 0x232   : > { %v715_v54 = vpop.permute.xlu0 %714 }
 0x233   : > { %v720_v55 = vsel %vm540_vm1, %v715_v54, 0 }
 0x234   : > { %729 = vmatpush.bf16.xpose.msra.mxu3 %v720_v55 }
 0x23b   : > { %1005 = vmatmul.msk.bf16.vlgmr.msrb.gmra.mxu3 %vm540_vm1, %v601_v22 }
 0x24b   : > { %1009 = vmatmul.msk.bf16.vlgmr.msra.gmra.mxu3 %vm540_vm1, %v713_v44 }
 0x298   : > { %v687_v15 = vpop.xlane.xlu2 %686 }
 0x2ae   : > { %v1381_v56 = vpop.f32.mrf.mxu3 }
 0x2b6   : > { %v595_v57 = vpop.f32.mrf.mxu3 }
 0x2be   : > { %v619_v58 = vpop.f32.mrf.mxu3 }
 0x2bf   : > { %v620_v59 = vadd.f32 %v1080_v30, %v619_v58 }
 0x2c1   : > { %v623_v60 = vsel %vm540_vm1, %v620_v59, -inf }
 0x2c2   : > { %624 = vmax.xlane.f32.xlu1 %v623_v60 }
 0x2c6   : > { %v621_v61 = vpop.f32.mrf.mxu3 }
 0x2ce   : > { %v731_v62 = vpop.f32.mrf.mxu3 }
 0x2cf   : > { %v732_v63 = vadd.f32 %v1080_v30, %v731_v62 }
 0x2d1   : > { %v735_v0 = vsel %vm540_vm1, %v732_v63, -inf }
 0x2d2   : > { %736 = vmax.xlane.f32.xlu0 %v735_v0 }
 0x2d6   : > { %v733_v1 = vpop.f32.mrf.mxu3 }
 0x2db   : > { %635 = vrot.lane.b32.xlu1 %v1355_v18, %s1217_s21 }
 0x335   : > { %v625_v2 = vpop.xlane.xlu1 %624 }
 0x336   : > { %v626_v3 = vsub.f32 %v620_v59, %v625_v2 }
 0x338   : > { %v627_v5 = vmul.f32 1.442695, %v626_v3 }
 0x33a   : > { %1090 = vpow2.f32 %v627_v5 }
 0x340   : > { %v1091_v6 = vpop.eup %1090 }
 0x341   : > { %v629_v7 = vsel %vm540_vm1, %v1091_v6, 0.0 }
 0x342   : > { %630 = vadd.xlane.f32.xlu2 %v629_v7 }
 0x345   : > { %v737_v8 = vpop.xlane.xlu0 %736 }
 0x346   : > { %v738_v9 = vsub.f32 %v732_v63, %v737_v8 }
 0x348   : > { %v739_v10 = vmul.f32 1.442695, %v738_v9 }
 0x34a   : > { %1092 = vpow2.f32 %v739_v10  ;;  %v1082_v10 = vld [vmem:[#allocation4] ss:$0 sm:$0xff] }
 0x34b   : > { %1094 = vrcp.f32 %v687_v15 }
 0x34d   : > { %v636_v11 = vpop.permute.xlu1 %635 }
 0x34e   : > { %v641_v12 = vsel %vm580_vm2, %v636_v11, 0 }
 0x34f   : > { %650 = vmatpush.bf16.msrb.mxu0 %v641_v12  ;;  %v1083_v12 = vld [vmem:[#allocation6] ss:$0 sm:$0xff] }
 0x350   : > { %v1093_v13 = vpop.eup %1092 }
 0x351   : > { %v741_v14 = vsel %vm540_vm1, %v1093_v13, 0.0  ;;  %v1095_v17 = vpop.eup %1094 }
 0x352   : > { %742 = vadd.xlane.f32.xlu0 %v741_v14  ;;  %v689_v20 = vmul.f32 %v1095_v17, %v1087_v49 }
 0x354   : > { %v690_v25 = vpack.c.bf16 %v689_v20, %v689_v20 }
 0x35a   : > { %691 = vrot.lane.b32.xlu2 %v1355_v18, %s1218_s29 }
 0x366   : > { %747 = vrot.lane.b32.xlu0 %v1355_v18, %s1219_s12 }
 0x3b5   : > { %v631_v16 = vpop.xlane.xlu2 %630 }
 0x3b6   : > { %1096 = vrcp.f32 %v631_v16 }
 0x3bc   : > { %v1097_v19 = vpop.eup %1096 }
 0x3bd   : > { %v633_v21 = vmul.f32 %v1097_v19, %v1091_v6  ;;  %v692_v22 = vpop.permute.xlu2 %691 }
 0x3be   : > { %v697_v23 = vsel %vm580_vm2, %v692_v22, 0 }
 0x3bf   : > { %706 = vmatpush.bf16.msrb.mxu2 %v697_v23  ;;  %v634_v24 = vpack.c.bf16 %v633_v21, %v633_v21 }
 0x3c1   : > { %1006 = vmatmul.msk.bf16.vlgmr.msrb.gmra.mxu0 %vm540_vm1, %v634_v24 }
 0x3c2   : > { %1008 = vmatmul.msk.bf16.vlgmr.msrb.gmra.mxu2 %vm540_vm1, %v690_v25 }
 0x3c5   : > { %v743_v26 = vpop.xlane.xlu0 %742 }
 0x3c6   : > { %1098 = vrcp.f32 %v743_v26 }
 0x3c7   : > { %1100 = vrcp.f32 %v1223_v53 }
 0x3cc   : > { %v1099_v18 = vpop.eup %1098 }
 0x3cd   : > { %v745_v27 = vmul.f32 %v1099_v18, %v1093_v13  ;;  %v1101_v54 = vpop.eup %1100 }
 0x3ce   : > { %v830_v55 = vmul.f32 32.0, %v1101_v54  ;;  %vm834_vm5 = vweird.f32 %v1101_v54 }
 0x3cf   : > { %v746_v30 = vpack.c.bf16 %v745_v27, %v745_v27 }
 0x3d8   : > { %v748_v28 = vpop.permute.xlu0 %747 }
 0x3d9   : > { %v753_v29 = vsel %vm580_vm2, %v748_v28, 0 }
 0x3da   : > { %762 = vmatpush.bf16.msra.mxu0 %v753_v29 }
 0x3dd   : > { %1010 = vmatmul.msk.bf16.vlgmr.msra.gmra.mxu0 %vm540_vm1, %v746_v30 }
 0x43e   : > { %v652_v31 = vpop.f32.mrf.mxu0 }
 0x43f   : > { %769 = vrot.lane.b32.xlu1 %v652_v31, %s1220_s13 }
 0x445   : > { %v708_v32 = vpop.f32.mrf.mxu2 }
 0x446   : > { %v654_v33 = vpop.f32.mrf.mxu0 }
 0x447   : > { %773 = vrot.lane.b32.xlu1 %v708_v32, %s1221_s14 }
 0x44d   : > { %v710_v34 = vpop.f32.mrf.mxu2 }
 0x45a   : > { %v764_v35 = vpop.f32.mrf.mxu0 }
 0x45b   : > { %777 = vrot.lane.b32.xlu2 %v764_v35, %s1222_s15 }
 0x462   : > { %v766_v36 = vpop.f32.mrf.mxu0 }
 0x4b1   : > { %v770_v39 = vpop.permute.xlu1 %769 }
 0x4b2   : > { %v780_v40 = vsel %vm540_vm1, %v1381_v56, %v770_v39  ;;  %v831_v56 = vsub.f32 1.0, %v830_v55 }
 0x4b4   : > { %v832_v57 = vmul.f32 %v1101_v54, %v831_v56 }
 0x4b5   : > { %v778_v42 = vpop.permute.xlu2 %777 }
 0x4b6   : > { %v833_v58 = vadd.f32 %v1101_v54, %v832_v57 }
 0x4b8   : > { %v835_v59 = vsel %vm834_vm5, %v1101_v54, %v833_v58 }
 0x4b9   : > { %v774_v41 = vpop.permute.xlu1 %773 }
 0x4ba   : > { %v782_v43 = vsel %vm781_vm3, %v780_v40, %v774_v41 }
 0x4bb   : > { %v784_v44 = vsel %vm783_vm4, %v782_v43, %v778_v42 }
 0x4bc   : > { %v785_v45 = vpack.c.bf16 %v784_v44, %v784_v44 }
 0x4be   : > { %1019 = vmatmul.msk.bf16.vlgmr.msra.gmra.mxu1 %vm480_vm0, %v785_v45 }
 0x53b   : > { %v818_v48 = vpop.f32.mrf.mxu1 }
 0x53c   : > { %v819_v49 = vadd.f32 %v1081_v46, %v818_v48 }
 0x53e   : > { %v823_v50 = vadd.f32 %v822_v47, %v819_v49 }
 0x540   : > { %v826_v51 = vsel %vm480_vm0, %v823_v50, 0.0 }
 0x541   : > { %827 = vadd.xlane.f32.xlu0 %v826_v51 }
 0x543   : > { %v820_v52 = vpop.f32.mrf.mxu1 }
 0x5b4   : > { %v828_v60 = vpop.xlane.xlu0 %827 }
 0x5b5   : > { %v836_v61 = vmul.f32 %v835_v59, %v828_v60 }
 0x5b7   : > { %v837_v62 = vsub.f32 %v823_v50, %v836_v61 }
 0x5b9   : > { %v838_v4 = vmul.f32 %v837_v62, %v837_v62 }
 0x5bb   : > { %v839_v63 = vsel %vm480_vm0, %v838_v4, 0.0 }
 0x5bc   : > { %840 = vadd.xlane.f32.xlu1 %v839_v63 }
 0x62f   : > { %v841_v0 = vpop.xlane.xlu1 %840 }
 0x630   : > { %v842_v1 = vmul.f32 %v841_v0, %v835_v59 }
 0x632   : > { %v843_v2 = vadd.f32 1e-05, %v842_v1 }
 0x634   : > { %1102 = vrsqrt.f32 %v843_v2  ;;  %vm850_vm7 = vweird.f32 %v843_v2 }
 0x63a   : > { %v1103_v3 = vpop.eup %1102 }
 0x63b   : > { %v845_v5 = vmul.f32 %v1103_v3, %v843_v2  ;;  %vm851_vm6 = vweird.f32 %v1103_v3 }
 0x63c   : > { %vm852_vm8 = vmor %vm850_vm7, %vm851_vm6 }
 0x63d   : > { %v846_v6 = vmul.f32 %v1103_v3, %v845_v5 }
 0x63f   : > { %v847_v7 = vmul.f32 0.5, %v846_v6 }
 0x641   : > { %v848_v8 = vsub.f32 1.5, %v847_v7 }
 0x643   : > { %v849_v9 = vmul.f32 %v1103_v3, %v848_v8 }
 0x645   : > { %v853_v11 = vsel %vm852_vm8, %v1103_v3, %v849_v9 }
 0x646   : > { %v854_v13 = vmul.f32 %v853_v11, %v837_v62 }
 0x648   : > { %v858_v14 = vmul.f32 %v1082_v10, %v854_v13 }
 0x64a   : > { %v862_v15 = vadd.f32 %v1083_v12, %v858_v14 }
 0x64c   : > { %v863_v16 = vpack.c.bf16 %v862_v15, %v862_v15 }
 0x64e   : > { %865 = vst.msk [vmem:[%s456_s25] sm:$0xf] %vm864_vm9, %v863_v16 }
 0x64f PF: > { %s23_s17 = sadd.s32 1, %s1208_s17  }
 0x650   : > { %p20_p7 = scmp.ge.s32.totalorder %s23_s17, 4  }
 0x652   :  { %22 = sbr.rel (!%p20_p7) target bundleno = 2 (0x2), region = 113 }
 0x657   :  { %885 = vsyncpa [#allocation3], 1 }
 0x658   :  { %887 = vsyncpa [#allocation3 + $0x1], 1 }
 0x659   :  { %888 = vsyncpa [#allocation5], 1 }

// kernel: forward.21
= control target key start
LH: loop header
LB: loop body
LE: loop exit
PB: predicated region body
PF: predicated region fallthrough
CT: control target
= control target key end

     0   :  { %13 = vsyncpa [#allocation3], 0  ;;  %s1245_s0 = inlined_call_operand.vmem [shape: bf16[2,8,32], index: 0, kind: input, shape index: {}]   ;;  %s1246_s1 = inlined_call_operand.vmem [shape: bf16[32,96], index: 1, kind: input, shape index: {}]   ;;  %s1247_s2 = inlined_call_operand.vmem [shape: f32[1,96], index: 2, kind: input, shape index: {}]   ;;  %s1248_s3 = inlined_call_operand.vmem [shape: bf16[32,32], index: 3, kind: input, shape index: {}]   ;;  %s1249_s4 = inlined_call_operand.hbm [shape: f32[1,32], index: 4, kind: input, shape index: {}]   ;;  %s1250_s5 = inlined_call_operand.vmem [shape: f32[2,1,8], index: 5, kind: input, shape index: {}]   ;;  %s1251_s6 = inlined_call_operand.hbm [shape: f32[1,32], index: 6, kind: input, shape index: {}]   ;;  %s1252_s7 = inlined_call_operand.hbm [shape: f32[1,32], index: 7, kind: input, shape index: {}]   ;;  %s1253_s8 = inlined_call_operand.vmem [shape: bf16[2,8,32], index: 8, kind: output, shape index: {}]  }
   0x1   :  { %14 = vsyncpa [#allocation5], 0  ;;  %s1128_s27 = smov 0  }
   0x2 LB: > { %s262_s30 = sshll.u32 %s1251_s6, 4  ;;  %s835_s9 = sadd.s32 4294967295, %s1063_s27   ;;  %s1063_s27 = sphi %s1128_s27, %s20_s27   ;;  %s263_s30 = int_to_ptr.hbm [resolvable:$true] %s262_s30 }
   0x3   : > { %p837_p0 = scmp.ge.s32.totalorder %s1063_s27, 1  ;;  %p229_p1 = scmp.lt.s32.totalorder %s1063_s27, 3 }
   0x4   : > { %p902_p2 = scmp.eq.s32.totalorder %s835_s9, 0  ;;  %s1065_s11 = smov [#allocation4]  }
   0x5   : > { %p1139_p3 = pnand %p837_p0, %p229_p1  ;;  %s264_s12 = sshll.u32 %s1065_s11, 4  ;;  %s265_s12 = int_to_ptr.vmem [resolvable:$true] %s264_s12 }
   0x6   : > { %s250_s15 = sshll.u32 %s1249_s4, 4  ;;  %s274_s18 = sshll.u32 %s1252_s7, 4  ;;  %s251_s15 = int_to_ptr.hbm [resolvable:$true] %s250_s15  ;;  %s275_s18 = int_to_ptr.hbm [resolvable:$true] %s274_s18 }
   0x7   : > { %p892_p4 = pneg %p1139_p3  ;;  %s1066_s19 = smov [#allocation2]  }
   0x8   : > { %s252_s20 = sshll.u32 %s1066_s19, 4  ;;  %s1067_s21 = smov [#allocation6]   ;;  %s253_s20 = int_to_ptr.vmem [resolvable:$true] %s252_s20 }
   0x9   : > { %p893_p5 = pnand %p902_p2, %p892_p4  ;;  %s276_s22 = sshll.u32 %s1067_s21, 4  ;;  %s277_s22 = int_to_ptr.vmem [resolvable:$true] %s276_s22 }
   0xa   : > { %302 = sbr.rel (%p1139_p3) target bundleno = 1365 (0x555), region = 52 }
   0xb   : > { %898 = dma.hbm_to_vmem [thread:$0]  (!%p893_p5), %s263_s30, 16, %s265_s12, [#allocation5]  }
   0xc   : > { %895 = dma.hbm_to_vmem [thread:$0]  (!%p893_p5), %s251_s15, 16, %s253_s20, [#allocation3]  }
   0xd   : > { %901 = dma.hbm_to_vmem [thread:$0]  (!%p893_p5), %s275_s18, 16, %s277_s22, [#allocation5]  }
   0xf   : > { %1054 = dma.done.wait (%p902_p2), [#allocation3], 16  }
  0x10   : > { %1056 = vsyncadd (%p902_p2), [#allocation3], 4294967280 }
  0x11   : > { %1058 = dma.done.wait (%p902_p2), [#allocation5], 32  }
  0x12   : > { %1060 = vsyncadd (%p902_p2), [#allocation5], 4294967264  ;;  %p348_p6 = scmp.lt.s32.totalorder %s835_s9, 1  ;;  %v877_v0 = vld [vmem:[%s1246_s1 + $0x8] sm:$0xff]  ;;  %v876_v1 = vld [vmem:[%s1246_s1] sm:$0xff]  ;;  %vm381_vm0 = vcmask 261120   ;;  %v399_v25 = vlaneseq }
  0x13   : > { %391 = vmatpush.bf16.msra.mxu0 %v877_v0  ;;  %v934_v3 = vld [vmem:[%s1247_s2] ss:$0 sm:$0xff]  ;;  %s1068_s16 = smov 96   ;;  %s1069_s17 = smov 104   ;;  %vm415_vm1 = vcmask 64512   ;;  %vm453_vm3 = vcmask 1043456  }
  0x14   : > { %s1256_s9 = smov (!%p348_p6, %s835_s9), 1  ;;  %s1070_s18 = smov 120   ;;  %v400_v26 = vshrl.u32 %v399_v25, 7  ;;  %v402_v27 = vand.u32 127, %v399_v25  ;;  %vm657_vm4 = vcmask 130048   ;;  %vm659_vm5 = vcmask 195584  }
  0x15   : > { %s846_s25 = sshll.u32 %s1256_s9, 2  ;;  %s354_s29 = scalar_lea.vmem %s1250_s5, %s1256_s9  ;;  %vm740_vm10 = vcmask 257024  }
  0x16   : > { %s351_s13 = scalar_lea.vmem %s1245_s0, %s846_s25  ;;  %s1071_s19 = smov 88   ;;  %v935_v28 = vld [vmem:[%s354_s29] ss:$0 sm:$0xff]  ;;  %vm403_vm2 = vcmp.gt.s32.totalorder %v402_v27, %v400_v26 }
  0x17   : > { %392 = vmatpush.bf16.msra.mxu0 %v876_v1  ;;  %v1176_v2 = vld [vmem:[%s351_s13] sm:$0xf]  ;;  %s1072_s20 = smov 80   ;;  %s1073_s21 = smov 72  }
  0x18   : > { %s1074_s22 = smov 112   ;;  %s1075_s26 = smov 64  }
  0x19   : > { %s1076_s28 = smov 40   ;;  %s1077_s29 = smov 56  }
  0x1a   : > { %856 = vmatmul.msk.bf16.vlgmr.msra.gmra.mxu0 %vm381_vm0, %v1176_v2  ;;  %s1078_s30 = smov 48   ;;  %s1079_s10 = smov 8  }
  0x1b   : > { %s1080_s11 = smov 16   ;;  %s1081_s12 = smov 24  }
  0x97   : > { %v394_v4 = vpop.f32.mrf.mxu0 }
  0x98   : > { %v395_v5 = vadd.f32 %v934_v3, %v394_v4 }
  0x9a   : > { %v404_v6 = vmul.f32 0.35355338, %v395_v5  ;;  %v406_v7 = vpack.c.bf16 %v395_v5, %v395_v5 }
  0x9c   : > { %v405_v8 = vpack.c.bf16 %v404_v6, %v404_v6  ;;  %v411_v9 = vunpack.c.l.b16 %v406_v7 }
  0x9e   : > { %v1183_v10 = vpack.c.b16 %v411_v9, %v411_v9  ;;  %v471_v11 = vunpack.c.l.b16 %v405_v8 }
  0x9f   : > { %v396_v12 = vpop.f32.mrf.mxu0 }
  0xa0   : > { %413 = vrot.lane.b32.xlu0 %v1183_v10, %s1068_s16  ;;  %v472_v13 = vpack.c.b16 %v471_v11, %v471_v11 }
  0xa2   : > { %587 = vrot.lane.b32.xlu2 %v472_v13, %s1069_s17  ;;  %473 = vrot.lane.b32.xlu1 %v472_v13, %s1070_s18 }
  0xa8   : > { %475 = vrot.lane.b32.xlu0 %v1183_v10, %s1071_s19  ;;  %s358_s19 = scalar_lea.vmem %s1253_s8, %s846_s25 }
  0xaa   : > { %532 = vrot.lane.b32.xlu2 %v1183_v10, %s1072_s20  ;;  %589 = vrot.lane.b32.xlu1 %v1183_v10, %s1073_s21 }
  0xb0   : > { %530 = vrot.lane.b32.xlu0 %v472_v13, %s1074_s22 }
  0xfc   : > { %v588_v14 = vpop.permute.xlu2 %587 }
 0x104   : > { %v533_v15 = vpop.permute.xlu2 %532 }
 0x105   : > { %v538_v16 = vsel %vm415_vm1, %v533_v15, 0 }
 0x106   : > { %547 = vmatpush.bf16.xpose.msrb.mxu0 %v538_v16 }
 0x112   : > { %v414_v17 = vpop.permute.xlu0 %413 }
 0x113   : > { %v420_v18 = vsel %vm415_vm1, %v414_v17, 0 }
 0x114   : > { %429 = vmatpush.bf16.xpose.msra.mxu1 %v420_v18  ;;  %v474_v19 = vpop.permute.xlu1 %473 }
 0x11a   : > { %v476_v20 = vpop.permute.xlu0 %475 }
 0x11b   : > { %857 = vmatmul.msk.bf16.vlgmr.msra.gmra.mxu1 %vm415_vm1, %v405_v8  ;;  %v481_v21 = vsel %vm415_vm1, %v476_v20, 0 }
 0x11c   : > { %490 = vmatpush.bf16.xpose.msra.mxu3 %v481_v21  ;;  %v590_v22 = vpop.permute.xlu1 %589 }
 0x11d   : > { %v595_v23 = vsel %vm415_vm1, %v590_v22, 0 }
 0x122   : > { %v531_v24 = vpop.permute.xlu0 %530 }
 0x123   : > { %859 = vmatmul.msk.bf16.vlgmr.msra.gmra.mxu3 %vm415_vm1, %v474_v19  ;;  %861 = vmatmul.msk.bf16.vlgmr.msrb.gmra.mxu0 %vm415_vm1, %v531_v24 }
 0x124   : > { %604 = vmatpush.bf16.xpose.msrb.mxu3 %v595_v23 }
 0x133   : > { %863 = vmatmul.msk.bf16.vlgmr.msrb.gmra.mxu3 %vm415_vm1, %v588_v14 }
 0x198   : > { %v431_v29 = vpop.f32.mrf.mxu1 }
 0x199   : > { %v432_v30 = vadd.f32 %v935_v28, %v431_v29 }
 0x19b   : > { %v435_v31 = vsel %vm403_vm2, -1e+09, %v432_v30 }
 0x19c   : > { %v436_v32 = vsel %vm415_vm1, %v435_v31, -inf }
 0x19d   : > { %437 = vmax.xlane.f32.xlu1 %v436_v32 }
 0x1a0   : > { %v433_v33 = vpop.f32.mrf.mxu1  ;;  %v549_v34 = vpop.f32.mrf.mxu0 }
 0x1a1   : > { %v550_v40 = vadd.f32 %v935_v28, %v549_v34 }
 0x1a3   : > { %v553_v42 = vsel %vm403_vm2, -1e+09, %v550_v40 }
 0x1a4   : > { %v554_v43 = vsel %vm415_vm1, %v553_v42, -inf }
 0x1a6   : > { %v492_v35 = vpop.f32.mrf.mxu3 }
 0x1a7   : > { %v493_v36 = vadd.f32 %v935_v28, %v492_v35 }
 0x1a8   : > { %v551_v37 = vpop.f32.mrf.mxu0 }
 0x1a9   : > { %v496_v38 = vsel %vm403_vm2, -1e+09, %v493_v36 }
 0x1aa   : > { %v497_v39 = vsel %vm415_vm1, %v496_v38, -inf }
 0x1ab   : > { %498 = vmax.xlane.f32.xlu2 %v497_v39  ;;  %v878_v39 = vld [vmem:[%s1248_s3] sm:$0xff] }
 0x1ae   : > { %v494_v41 = vpop.f32.mrf.mxu3 }
 0x1b3   : > { %555 = vmax.xlane.f32.xlu2 %v554_v43 }
 0x1b6   : > { %v606_v44 = vpop.f32.mrf.mxu3 }
 0x1b7   : > { %v607_v45 = vadd.f32 %v935_v28, %v606_v44 }
 0x1b9   : > { %v610_v46 = vsel %vm403_vm2, -1e+09, %v607_v45 }
 0x1ba   : > { %v611_v47 = vsel %vm415_vm1, %v610_v46, -inf }
 0x1bb   : > { %612 = vmax.xlane.f32.xlu0 %v611_v47  ;;  %v936_v47 = vld [vmem:[#allocation2] ss:$0 sm:$0xff] }
 0x1be   : > { %v608_v48 = vpop.f32.mrf.mxu3 }
 0x1bf   : > { %v698_v48 = vunpack.c.l.bf16 %v1176_v2 }
 0x1cb   : > { %448 = vrot.lane.b32.xlu2 %v1183_v10, %s1075_s26 }
 0x1d3   : > { %623 = vrot.lane.b32.xlu2 %v1183_v10, %s1076_s28 }
 0x210   : > { %v438_v49 = vpop.xlane.xlu1 %437 }
 0x211   : > { %v439_v50 = vsub.f32 %v435_v31, %v438_v49 }
 0x213   : > { %v440_v51 = vmul.f32 1.442695, %v439_v50 }
 0x215   : > { %939 = vpow2.f32 %v440_v51 }
 0x21b   : > { %v940_v52 = vpop.eup %939 }
 0x21c   : > { %v442_v53 = vsel %vm415_vm1, %v940_v52, 0.0 }
 0x21d   : > { %443 = vadd.xlane.f32.xlu1 %v442_v53 }
 0x21e   : > { %v499_v54 = vpop.xlane.xlu2 %498 }
 0x21f   : > { %v500_v57 = vsub.f32 %v496_v38, %v499_v54  ;;  %v879_v38 = vld [vmem:[%s1248_s3 + $0x8] sm:$0xff]  ;;  %v1082_v54 = vmov 32.0  }
 0x220   : > { %691 = vmatpush.bf16.msra.mxu0 %v879_v38 }
 0x221   : > { %v501_v59 = vmul.f32 1.442695, %v500_v57 }
 0x224   : > { %692 = vmatpush.bf16.msra.mxu0 %v878_v39 }
 0x226   : > { %v556_v55 = vpop.xlane.xlu2 %555 }
 0x227   : > { %v557_v56 = vsub.f32 %v553_v42, %v556_v55 }
 0x229   : > { %v558_v58 = vmul.f32 1.442695, %v557_v56 }
 0x22b   : > { %941 = vpow2.f32 %v558_v58 }
 0x22c   : > { %943 = vpow2.f32 %v501_v59 }
 0x22e   : > { %v449_v60 = vpop.permute.xlu2 %448  ;;  %v613_v61 = vpop.xlane.xlu0 %612 }
 0x22f   : > { %v455_v62 = vsel %vm453_vm3, %v449_v60, 0  ;;  %v614_v0 = vsub.f32 %v610_v46, %v613_v61 }
 0x230   : > { %464 = vmatpush.bf16.msra.mxu2 %v455_v62 }
 0x231   : > { %v942_v63 = vpop.eup %941  ;;  %v615_v3 = vmul.f32 1.442695, %v614_v0 }
 0x232   : > { %v560_v1 = vsel %vm415_vm1, %v942_v63, 0.0  ;;  %v944_v4 = vpop.eup %943 }
 0x233   : > { %561 = vadd.xlane.f32.xlu0 %v560_v1  ;;  %945 = vpow2.f32 %v615_v3  ;;  %v503_v5 = vsel %vm415_vm1, %v944_v4, 0.0 }
 0x236   : > { %509 = vrot.lane.b32.xlu1 %v1183_v10, %s1077_s29  ;;  %v624_v14 = vpop.permute.xlu2 %623 }
 0x237   : > { %v629_v17 = vsel %vm453_vm3, %v624_v14, 0  ;;  %v938_v14 = vld [vmem:[#allocation6] ss:$0 sm:$0xff] }
 0x239   : > { %v946_v6 = vpop.eup %945 }
 0x23a   : > { %v617_v7 = vsel %vm415_vm1, %v946_v6, 0.0 }
 0x23b   : > { %504 = vadd.xlane.f32.xlu0 %v503_v5 }
 0x243   : > { %618 = vadd.xlane.f32.xlu0 %v617_v7 }
 0x257   : > { %566 = vrot.lane.b32.xlu0 %v1183_v10, %s1078_s30 }
 0x290   : > { %v444_v8 = vpop.xlane.xlu1 %443 }
 0x291   : > { %947 = vrcp.f32 %v444_v8 }
 0x297   : > { %v948_v9 = vpop.eup %947 }
 0x298   : > { %v446_v11 = vmul.f32 %v948_v9, %v940_v52 }
 0x29a   : > { %v447_v12 = vpack.c.bf16 %v446_v11, %v446_v11 }
 0x29c   : > { %858 = vmatmul.msk.bf16.vlgmr.msra.gmra.mxu2 %vm415_vm1, %v447_v12  ;;  %v937_v12 = vld [vmem:[#allocation4] ss:$0 sm:$0xff] }
 0x2a6   : > { %v562_v13 = vpop.xlane.xlu0 %561 }
 0x2a8   : > { %v510_v15 = vpop.permute.xlu1 %509 }
 0x2a9   : > { %v515_v16 = vsel %vm453_vm3, %v510_v15, 0 }
 0x2aa   : > { %524 = vmatpush.bf16.msrb.mxu2 %v515_v16 }
 0x2ae   : > { %638 = vmatpush.bf16.msra.mxu2 %v629_v17  ;;  %v505_v18 = vpop.xlane.xlu0 %504 }
 0x2af   : > { %949 = vrcp.f32 %v505_v18 }
 0x2b5   : > { %v950_v19 = vpop.eup %949 }
 0x2b6   : > { %v507_v10 = vmul.f32 %v950_v19, %v944_v4  ;;  %v619_v20 = vpop.xlane.xlu0 %618 }
 0x2b7   : > { %951 = vrcp.f32 %v619_v20 }
 0x2b8   : > { %v508_v21 = vpack.c.bf16 %v507_v10, %v507_v10  ;;  %953 = vrcp.f32 %v562_v13 }
 0x2b9   : > { %955 = vrcp.f32 %v1082_v54 }
 0x2ba   : > { %860 = vmatmul.msk.bf16.vlgmr.msrb.gmra.mxu2 %vm415_vm1, %v508_v21 }
 0x2bd   : > { %v952_v22 = vpop.eup %951 }
 0x2be   : > { %v621_v23 = vmul.f32 %v952_v22, %v946_v6  ;;  %v954_v24 = vpop.eup %953 }
 0x2bf   : > { %v564_v25 = vmul.f32 %v954_v24, %v942_v63  ;;  %v956_v55 = vpop.eup %955 }
 0x2c0   : > { %v622_v26 = vpack.c.bf16 %v621_v23, %v621_v23  ;;  %v706_v56 = vmul.f32 32.0, %v956_v55  ;;  %vm710_vm6 = vweird.f32 %v956_v55 }
 0x2c1   : > { %v565_v29 = vpack.c.bf16 %v564_v25, %v564_v25 }
 0x2c2   : > { %v707_v57 = vsub.f32 1.0, %v706_v56 }
 0x2c4   : > { %v708_v58 = vmul.f32 %v956_v55, %v707_v57 }
 0x2c6   : > { %v709_v59 = vadd.f32 %v956_v55, %v708_v58 }
 0x2c8   : > { %v711_v60 = vsel %vm710_vm6, %v956_v55, %v709_v59 }
 0x2c9   : > { %v567_v27 = vpop.permute.xlu0 %566 }
 0x2ca   : > { %864 = vmatmul.msk.bf16.vlgmr.msra.gmra.mxu2 %vm415_vm1, %v622_v26  ;;  %v572_v28 = vsel %vm453_vm3, %v567_v27, 0 }
 0x2cb   : > { %581 = vmatpush.bf16.msrb.mxu1 %v572_v28 }
 0x2ce   : > { %862 = vmatmul.msk.bf16.vlgmr.msrb.gmra.mxu1 %vm415_vm1, %v565_v29 }
 0x31f   : > { %v466_v30 = vpop.f32.mrf.mxu2 }
 0x327   : > { %v468_v31 = vpop.f32.mrf.mxu2 }
 0x33d   : > { %v526_v32 = vpop.f32.mrf.mxu2 }
 0x33e   : > { %645 = vrot.lane.b32.xlu1 %v526_v32, %s1079_s10 }
 0x345   : > { %v528_v33 = vpop.f32.mrf.mxu2 }
 0x34b   : > { %v583_v34 = vpop.f32.mrf.mxu1 }
 0x34c   : > { %649 = vrot.lane.b32.xlu2 %v583_v34, %s1080_s11 }
 0x34d   : > { %v640_v35 = vpop.f32.mrf.mxu2 }
 0x34e   : > { %653 = vrot.lane.b32.xlu1 %v640_v35, %s1081_s12 }
 0x353   : > { %v585_v36 = vpop.f32.mrf.mxu1 }
 0x355   : > { %v642_v37 = vpop.f32.mrf.mxu2 }
 0x3a6   : > { %v650_v42 = vpop.permute.xlu2 %649 }
 0x3b0   : > { %v646_v40 = vpop.permute.xlu1 %645 }
 0x3b1   : > { %v656_v41 = vsel %vm415_vm1, %v466_v30, %v646_v40 }
 0x3b2   : > { %v658_v43 = vsel %vm657_vm4, %v656_v41, %v650_v42 }
 0x3c0   : > { %v654_v44 = vpop.permute.xlu1 %653 }
 0x3c1   : > { %v660_v45 = vsel %vm659_vm5, %v658_v43, %v654_v44 }
 0x3c2   : > { %v661_v46 = vpack.c.bf16 %v660_v45, %v660_v45 }
 0x3c4   : > { %873 = vmatmul.msk.bf16.vlgmr.msra.gmra.mxu0 %vm381_vm0, %v661_v46 }
 0x441   : > { %v694_v49 = vpop.f32.mrf.mxu0 }
 0x442   : > { %v695_v50 = vadd.f32 %v936_v47, %v694_v49 }
 0x444   : > { %v699_v51 = vadd.f32 %v698_v48, %v695_v50 }
 0x446   : > { %v702_v52 = vsel %vm381_vm0, %v699_v51, 0.0 }
 0x447   : > { %703 = vadd.xlane.f32.xlu2 %v702_v52 }
 0x449   : > { %v696_v53 = vpop.f32.mrf.mxu0 }
 0x4ba   : > { %v704_v61 = vpop.xlane.xlu2 %703 }
 0x4bb   : > { %v712_v62 = vmul.f32 %v711_v60, %v704_v61 }
 0x4bd   : > { %v713_v63 = vsub.f32 %v699_v51, %v712_v62 }
 0x4bf   : > { %v714_v2 = vmul.f32 %v713_v63, %v713_v63 }
 0x4c1   : > { %v715_v0 = vsel %vm381_vm0, %v714_v2, 0.0 }
 0x4c2   : > { %716 = vadd.xlane.f32.xlu1 %v715_v0 }
 0x535   : > { %v717_v1 = vpop.xlane.xlu1 %716 }
 0x536   : > { %v718_v3 = vmul.f32 %v717_v1, %v711_v60 }
 0x538   : > { %v719_v4 = vadd.f32 1e-05, %v718_v3 }
 0x53a   : > { %957 = vrsqrt.f32 %v719_v4  ;;  %vm726_vm8 = vweird.f32 %v719_v4 }
 0x540   : > { %v958_v5 = vpop.eup %957 }
 0x541   : > { %v721_v6 = vmul.f32 %v958_v5, %v719_v4  ;;  %vm727_vm7 = vweird.f32 %v958_v5 }
 0x542   : > { %vm728_vm9 = vmor %vm726_vm8, %vm727_vm7 }
 0x543   : > { %v722_v7 = vmul.f32 %v958_v5, %v721_v6 }
 0x545   : > { %v723_v8 = vmul.f32 0.5, %v722_v7 }
 0x547   : > { %v724_v9 = vsub.f32 1.5, %v723_v8 }
 0x549   : > { %v725_v11 = vmul.f32 %v958_v5, %v724_v9 }
 0x54b   : > { %v729_v13 = vsel %vm728_vm9, %v958_v5, %v725_v11 }
 0x54c   : > { %v730_v15 = vmul.f32 %v729_v13, %v713_v63 }
 0x54e   : > { %v734_v16 = vmul.f32 %v937_v12, %v730_v15 }
 0x550   : > { %v738_v17 = vadd.f32 %v938_v14, %v734_v16 }
 0x552   : > { %v739_v18 = vpack.c.bf16 %v738_v17, %v738_v17 }
 0x554   : > { %741 = vst.msk [vmem:[%s358_s19] sm:$0xf] %vm740_vm10, %v739_v18 }
 0x555 PF: > { %s20_s27 = sadd.s32 1, %s1063_s27  }
 0x556   : > { %p17_p7 = scmp.ge.s32.totalorder %s20_s27, 4  }
 0x558   :  { %19 = sbr.rel (!%p17_p7) target bundleno = 2 (0x2), region = 98 }
 0x55d   :  { %761 = vsyncpa [#allocation3], 1 }
 0x55e   :  { %763 = vsyncpa [#allocation3 + $0x1], 1 }
 0x55f   :  { %764 = vsyncpa [#allocation5], 1 }

// kernel: forward.22
= control target key start
LH: loop header
LB: loop body
LE: loop exit
PB: predicated region body
PF: predicated region fallthrough
CT: control target
= control target key end

     0   :  { %16 = vsyncpa [#allocation3], 0  ;;  %s1513_s0 = inlined_call_operand.vmem [shape: bf16[2,8,32], index: 0, kind: input, shape index: {}]   ;;  %s1514_s1 = inlined_call_operand.vmem [shape: bf16[2,8,32], index: 1, kind: input, shape index: {}]   ;;  %s1515_s2 = inlined_call_operand.vmem [shape: bf16[32,32], index: 2, kind: input, shape index: {}]   ;;  %s1516_s3 = inlined_call_operand.vmem [shape: f32[1,32], index: 3, kind: input, shape index: {}]   ;;  %s1517_s4 = inlined_call_operand.vmem [shape: bf16[32,64], index: 4, kind: input, shape index: {}]   ;;  %s1518_s5 = inlined_call_operand.hbm [shape: f32[1,64], index: 5, kind: input, shape index: {}]   ;;  %s1519_s6 = inlined_call_operand.vmem [shape: bf16[32,32], index: 6, kind: input, shape index: {}]   ;;  %s1520_s7 = inlined_call_operand.hbm [shape: f32[1,32], index: 7, kind: input, shape index: {}]   ;;  %s1521_s8 = inlined_call_operand.vmem [shape: f32[2,1,8], index: 8, kind: input, shape index: {}]   ;;  %s1522_s9 = inlined_call_operand.hbm [shape: f32[1,32], index: 9, kind: input, shape index: {}]   ;;  %s1523_s10 = inlined_call_operand.hbm [shape: f32[1,32], index: 10, kind: input, shape index: {}]   ;;  %s1524_s11 = inlined_call_operand.vmem [shape: bf16[2,8,32], index: 11, kind: output, shape index: {}]  }
   0x1   :  { %17 = vsyncpa [#allocation5], 0 }
   0x2   :  { %18 = vsyncpa [#allocation8], 0  ;;  %s1356_s17 = smov 0  }
   0x3 LB: > { %s337_s20 = sshll.u32 %s1520_s7, 4  ;;  %s1365_s21 = sadd.s32 4294967295, %s1279_s17   ;;  %s1279_s17 = sphi %s1356_s17, %s24_s17   ;;  %s338_s20 = int_to_ptr.hbm [resolvable:$true] %s337_s20 }
   0x4   : > { %p998_p0 = scmp.ge.s32.totalorder %s1279_s17, 1  ;;  %p301_p1 = scmp.lt.s32.totalorder %s1279_s17, 3 }
   0x5   : > { %p1084_p2 = scmp.eq.s32.totalorder %s1365_s21, 0  ;;  %s1281_s23 = smov [#allocation4]  }
   0x6   : > { %p1370_p3 = pnand %p998_p0, %p301_p1  ;;  %s339_s24 = sshll.u32 %s1281_s23, 4  ;;  %s340_s24 = int_to_ptr.vmem [resolvable:$true] %s339_s24 }
   0x7   : > { %s322_s27 = sshll.u32 %s1518_s5, 4  ;;  %s349_s30 = sshll.u32 %s1522_s9, 4  ;;  %s323_s27 = int_to_ptr.hbm [resolvable:$true] %s322_s27  ;;  %s350_s30 = int_to_ptr.hbm [resolvable:$true] %s349_s30 }
   0x8   : > { %p1071_p4 = pneg %p1370_p3  ;;  %s1282_s13 = smov [#allocation2]  }
   0x9   : > { %s324_s14 = sshll.u32 %s1282_s13, 4  ;;  %s1283_s15 = smov [#allocation6]   ;;  %s325_s14 = int_to_ptr.vmem [resolvable:$true] %s324_s14 }
   0xa   : > { %p1384_p5 = pnand %p1084_p2, %p1071_p4  ;;  %s351_s16 = sshll.u32 %s1283_s15, 4  ;;  %s352_s16 = int_to_ptr.vmem [resolvable:$true] %s351_s16 }
   0xb   : > { %s361_s23 = sshll.u32 %s1523_s10, 4  ;;  %s1284_s25 = smov [#allocation7]   ;;  %s362_s23 = int_to_ptr.hbm [resolvable:$true] %s361_s23 }
   0xc   : > { %1077 = dma.hbm_to_vmem [thread:$0]  (!%p1384_p5), %s338_s20, 16, %s340_s24, [#allocation5]  }
   0xd   : > { %1074 = dma.hbm_to_vmem [thread:$0]  (!%p1384_p5), %s323_s27, 16, %s325_s14, [#allocation3]  }
   0xe   : > { %1080 = dma.hbm_to_vmem [thread:$0]  (!%p1384_p5), %s350_s30, 16, %s352_s16, [#allocation5]  }
   0xf   : > { %s363_s26 = sshll.u32 %s1284_s25, 4  ;;  %396 = sbr.rel (%p1370_p3) target bundleno = 1622 (0x656), region = 64  ;;  %s364_s26 = int_to_ptr.vmem [resolvable:$true] %s363_s26 }
  0x10   : > { %1083 = dma.hbm_to_vmem [thread:$0]  (!%p1384_p5), %s362_s23, 16, %s364_s26, [#allocation8]  }
  0x14   : > { %1266 = dma.done.wait (%p1084_p2), [#allocation3], 16  }
  0x15   : > { %1268 = vsyncadd (%p1084_p2), [#allocation3], 4294967280 }
  0x16   : > { %1270 = dma.done.wait (%p1084_p2), [#allocation5], 32  }
  0x17   : > { %1272 = vsyncadd (%p1084_p2), [#allocation5], 4294967264 }
  0x18   : > { %1274 = dma.done.wait (%p1084_p2), [#allocation8], 16  }
  0x19   : > { %1276 = vsyncadd (%p1084_p2), [#allocation8], 4294967280  ;;  %p457_p6 = scmp.lt.s32.totalorder %s1365_s21, 1  ;;  %v1050_v0 = vld [vmem:[%s1515_s2 + $0x8] sm:$0xff]  ;;  %v1049_v2 = vld [vmem:[%s1515_s2] sm:$0xff]  ;;  %vm495_vm0 = vcmask 261120  }
  0x1a   : > { %v1052_v1 = vld [vmem:[%s1517_s4 + $0x8] sm:$0xff]  ;;  %505 = vmatpush.bf16.msra.mxu0 %v1050_v0  ;;  %v1051_v3 = vld [vmem:[%s1517_s4] sm:$0xff]  ;;  %vm555_vm1 = vcmask 64512   ;;  %s1285_s27 = smov 96   ;;  %s1286_s29 = smov 120   ;;  %vm595_vm2 = vcmask 1043456  }
  0x1b   : > { %s1528_s21 = smov (!%p457_p6, %s1365_s21), 1  ;;  %541 = vmatpush.bf16.msra.mxu1 %v1052_v1  ;;  %v1115_v6 = vld [vmem:[%s1516_s3] ss:$0 sm:$0xff]  ;;  %s1287_s30 = smov 112   ;;  %vm796_vm3 = vcmask 130048   ;;  %vm798_vm4 = vcmask 195584  }
  0x1c   : > { %s1424_s28 = sshll.u32 %s1528_s21, 2  ;;  %s467_s16 = scalar_lea.vmem %s1521_s8, %s1528_s21  ;;  %v1116_v7 = vld [vmem:[#allocation2] ss:$0 sm:$0xff]  ;;  %vm879_vm9 = vcmask 257024  }
  0x1d   : > { %s460_s23 = scalar_lea.vmem %s1513_s0, %s1424_s28  ;;  %s464_s20 = scalar_lea.vmem %s1514_s1, %s1424_s28  ;;  %v1117_v30 = vld [vmem:[%s467_s16] ss:$0 sm:$0xff] }
  0x1e   : > { %506 = vmatpush.bf16.msra.mxu0 %v1049_v2  ;;  %v1444_v4 = vld [vmem:[%s460_s23] sm:$0xf]  ;;  %s1288_s12 = smov 104   ;;  %s1289_s21 = smov 88  }
  0x1f   : > { %542 = vmatpush.bf16.msra.mxu1 %v1051_v3  ;;  %v474_v5 = vld [vmem:[%s464_s20] sm:$0xf]  ;;  %s1290_s15 = smov 80   ;;  %s1291_s16 = smov 72  }
  0x20   : > { %s1292_s18 = smov 8   ;;  %s1293_s19 = smov 16  }
  0x21   : > { %1020 = vmatmul.msk.bf16.vlgmr.msra.gmra.mxu0 %vm495_vm0, %v1444_v4  ;;  %s1294_s23 = smov 24  }
  0x22   : > { %1029 = vmatmul.msk.bf16.vlgmr.msra.gmra.mxu1 %vm495_vm0, %v474_v5 }
  0x9e   : > { %v508_v8 = vpop.f32.mrf.mxu0 }
  0x9f   : > { %v544_v9 = vpop.f32.mrf.mxu1  ;;  %v509_v10 = vadd.f32 %v1115_v6, %v508_v8 }
  0xa0   : > { %v545_v11 = vadd.f32 %v1116_v7, %v544_v9 }
  0xa1   : > { %v549_v12 = vmul.f32 0.35355338, %v509_v10 }
  0xa2   : > { %v551_v13 = vpack.c.bf16 %v545_v11, %v545_v11 }
  0xa3   : > { %v550_v14 = vpack.c.bf16 %v549_v12, %v549_v12 }
  0xa4   : > { %v588_v15 = vunpack.c.l.b16 %v551_v13  ;;  %v560_v16 = vsel %vm555_vm1, %v551_v13, 0 }
  0xa5   : > { %569 = vmatpush.bf16.xpose.msra.mxu2 %v560_v16  ;;  %v613_v17 = vunpack.c.l.b16 %v550_v14 }
  0xa6   : > { %v1453_v18 = vpack.c.b16 %v588_v15, %v588_v15  ;;  %v510_v19 = vpop.f32.mrf.mxu0 }
  0xa7   : > { %v546_v20 = vpop.f32.mrf.mxu1  ;;  %v614_v21 = vpack.c.b16 %v613_v17, %v613_v17 }
  0xa8   : > { %590 = vrot.lane.b32.xlu1 %v1453_v18, %s1285_s27 }
  0xa9   : > { %615 = vrot.lane.b32.xlu2 %v614_v21, %s1286_s29 }
  0xac   : > { %1030 = vmatmul.msk.bf16.vlgmr.msra.gmra.mxu2 %vm555_vm1, %v550_v14 }
  0xb0   : > { %617 = vrot.lane.b32.xlu1 %v1453_v18, %s1286_s29  ;;  %s471_s29 = scalar_lea.vmem %s1524_s11, %s1424_s28 }
  0xb1   : > { %673 = vrot.lane.b32.xlu2 %v1453_v18, %s1287_s30 }
  0xb8   : > { %671 = vrot.lane.b32.xlu1 %v614_v21, %s1287_s30 }
  0xb9   : > { %727 = vrot.lane.b32.xlu2 %v614_v21, %s1288_s12 }
 0x103   : > { %v616_v22 = vpop.permute.xlu2 %615 }
 0x10b   : > { %v674_v23 = vpop.permute.xlu2 %673 }
 0x10c   : > { %v679_v24 = vsel %vm555_vm1, %v674_v23, 0 }
 0x10d   : > { %688 = vmatpush.bf16.xpose.msrb.mxu1 %v679_v24 }
 0x113   : > { %v728_v44 = vpop.permute.xlu2 %727 }
 0x11a   : > { %v591_v25 = vpop.permute.xlu1 %590 }
 0x11b   : > { %v597_v26 = vsel %vm595_vm2, %v591_v25, 0 }
 0x11c   : > { %606 = vmatpush.bf16.msra.mxu3 %v597_v26 }
 0x122   : > { %v618_v27 = vpop.permute.xlu1 %617 }
 0x123   : > { %v623_v28 = vsel %vm555_vm1, %v618_v27, 0 }
 0x124   : > { %632 = vmatpush.bf16.xpose.msrb.mxu3 %v623_v28 }
 0x12a   : > { %v672_v29 = vpop.permute.xlu1 %671 }
 0x12b   : > { %1034 = vmatmul.msk.bf16.vlgmr.msrb.gmra.mxu1 %vm555_vm1, %v672_v29 }
 0x12f   : > { %v571_v31 = vpop.f32.mrf.mxu2 }
 0x130   : > { %v572_v32 = vadd.f32 %v1117_v30, %v571_v31 }
 0x132   : > { %v575_v33 = vsel %vm555_vm1, %v572_v32, -inf }
 0x133   : > { %576 = vmax.xlane.f32.xlu0 %v575_v33 }
 0x137   : > { %v573_v34 = vpop.f32.mrf.mxu2 }
 0x1a6   : > { %v577_v35 = vpop.xlane.xlu0 %576 }
 0x1a7   : > { %v578_v36 = vsub.f32 %v572_v32, %v577_v35 }
 0x1a8   : > { %v690_v37 = vpop.f32.mrf.mxu1 }
 0x1a9   : > { %v579_v38 = vmul.f32 1.442695, %v578_v36  ;;  %v691_v39 = vadd.f32 %v1117_v30, %v690_v37  ;;  %v1054_v37 = vld [vmem:[%s1519_s6 + $0x8] sm:$0xff] }
 0x1aa   : > { %830 = vmatpush.bf16.msra.mxu1 %v1054_v37 }
 0x1ab   : > { %1121 = vpow2.f32 %v579_v38  ;;  %v694_v40 = vsel %vm555_vm1, %v691_v39, -inf  ;;  %v1053_v38 = vld [vmem:[%s1519_s6] sm:$0xff] }
 0x1ac   : > { %695 = vmax.xlane.f32.xlu2 %v694_v40 }
 0x1ae   : > { %831 = vmatpush.bf16.msra.mxu1 %v1053_v38 }
 0x1b0   : > { %v692_v41 = vpop.f32.mrf.mxu1 }
 0x1b1   : > { %v1122_v42 = vpop.eup %1121 }
 0x1b2   : > { %v581_v43 = vsel %vm555_vm1, %v1122_v42, 0.0 }
 0x1b3   : > { %582 = vadd.xlane.f32.xlu0 %v581_v43 }
 0x1c7   : > { %729 = vrot.lane.b32.xlu0 %v1453_v18, %s1288_s12 }
 0x21f   : > { %v696_v45 = vpop.xlane.xlu2 %695 }
 0x220   : > { %v697_v46 = vsub.f32 %v691_v39, %v696_v45 }
 0x222   : > { %v698_v47 = vmul.f32 1.442695, %v697_v46  ;;  %v1118_v46 = vld [vmem:[#allocation4] ss:$0 sm:$0xff] }
 0x224   : > { %1123 = vpow2.f32 %v698_v47  ;;  %v837_v47 = vunpack.c.l.bf16 %v1444_v4 }
 0x226   : > { %v583_v48 = vpop.xlane.xlu0 %582 }
 0x227   : > { %1125 = vrcp.f32 %v583_v48 }
 0x22a   : > { %v1124_v49 = vpop.eup %1123 }
 0x22b   : > { %v700_v50 = vsel %vm555_vm1, %v1124_v49, 0.0 }
 0x22c   : > { %701 = vadd.xlane.f32.xlu2 %v700_v50 }
 0x22d   : > { %v1126_v51 = vpop.eup %1125 }
 0x22e   : > { %v585_v52 = vmul.f32 %v1126_v51, %v1122_v42 }
 0x230   : > { %v586_v53 = vpack.c.bf16 %v585_v52, %v585_v52 }
 0x232   : > { %1031 = vmatmul.msk.bf16.vlgmr.msra.gmra.mxu3 %vm555_vm1, %v586_v53  ;;  %v1295_v53 = vmov 32.0  }
 0x239   : > { %v730_v54 = vpop.permute.xlu0 %729 }
 0x23a   : > { %v735_v55 = vsel %vm555_vm1, %v730_v54, 0 }
 0x23b   : > { %744 = vmatpush.bf16.xpose.msra.mxu3 %v735_v55 }
 0x242   : > { %1032 = vmatmul.msk.bf16.vlgmr.msrb.gmra.mxu3 %vm555_vm1, %v616_v22 }
 0x252   : > { %1036 = vmatmul.msk.bf16.vlgmr.msra.gmra.mxu3 %vm555_vm1, %v728_v44 }
 0x29f   : > { %v702_v15 = vpop.xlane.xlu2 %701 }
 0x2b5   : > { %v1479_v56 = vpop.f32.mrf.mxu3 }
 0x2bd   : > { %v610_v57 = vpop.f32.mrf.mxu3 }
 0x2c5   : > { %v634_v58 = vpop.f32.mrf.mxu3 }
 0x2c6   : > { %v635_v59 = vadd.f32 %v1117_v30, %v634_v58 }
 0x2c8   : > { %v638_v60 = vsel %vm555_vm1, %v635_v59, -inf }
 0x2c9   : > { %639 = vmax.xlane.f32.xlu1 %v638_v60 }
 0x2cd   : > { %v636_v61 = vpop.f32.mrf.mxu3 }
 0x2d5   : > { %v746_v62 = vpop.f32.mrf.mxu3 }
 0x2d6   : > { %v747_v63 = vadd.f32 %v1117_v30, %v746_v62 }
 0x2d8   : > { %v750_v0 = vsel %vm555_vm1, %v747_v63, -inf }
 0x2d9   : > { %751 = vmax.xlane.f32.xlu0 %v750_v0 }
 0x2dd   : > { %v748_v1 = vpop.f32.mrf.mxu3 }
 0x2e2   : > { %650 = vrot.lane.b32.xlu1 %v1453_v18, %s1289_s21 }
 0x33c   : > { %v640_v2 = vpop.xlane.xlu1 %639 }
 0x33d   : > { %v641_v3 = vsub.f32 %v635_v59, %v640_v2 }
 0x33f   : > { %v642_v5 = vmul.f32 1.442695, %v641_v3 }
 0x341   : > { %1127 = vpow2.f32 %v642_v5 }
 0x347   : > { %v1128_v6 = vpop.eup %1127 }
 0x348   : > { %v644_v7 = vsel %vm555_vm1, %v1128_v6, 0.0 }
 0x349   : > { %645 = vadd.xlane.f32.xlu2 %v644_v7 }
 0x34c   : > { %v752_v8 = vpop.xlane.xlu0 %751 }
 0x34d   : > { %v753_v9 = vsub.f32 %v747_v63, %v752_v8 }
 0x34f   : > { %v754_v10 = vmul.f32 1.442695, %v753_v9 }
 0x351   : > { %1129 = vpow2.f32 %v754_v10  ;;  %v1119_v10 = vld [vmem:[#allocation6] ss:$0 sm:$0xff] }
 0x352   : > { %1131 = vrcp.f32 %v702_v15 }
 0x354   : > { %v651_v11 = vpop.permute.xlu1 %650 }
 0x355   : > { %v656_v12 = vsel %vm595_vm2, %v651_v11, 0 }
 0x356   : > { %665 = vmatpush.bf16.msrb.mxu0 %v656_v12  ;;  %v1120_v12 = vld [vmem:[#allocation7] ss:$0 sm:$0xff] }
 0x357   : > { %v1130_v13 = vpop.eup %1129 }
 0x358   : > { %v756_v14 = vsel %vm555_vm1, %v1130_v13, 0.0  ;;  %v1132_v17 = vpop.eup %1131 }
 0x359   : > { %757 = vadd.xlane.f32.xlu0 %v756_v14  ;;  %v704_v20 = vmul.f32 %v1132_v17, %v1124_v49 }
 0x35b   : > { %v705_v25 = vpack.c.bf16 %v704_v20, %v704_v20 }
 0x361   : > { %706 = vrot.lane.b32.xlu2 %v1453_v18, %s1290_s15 }
 0x36d   : > { %762 = vrot.lane.b32.xlu0 %v1453_v18, %s1291_s16 }
 0x3bc   : > { %v646_v16 = vpop.xlane.xlu2 %645 }
 0x3bd   : > { %1133 = vrcp.f32 %v646_v16 }
 0x3c3   : > { %v1134_v19 = vpop.eup %1133 }
 0x3c4   : > { %v648_v21 = vmul.f32 %v1134_v19, %v1128_v6  ;;  %v707_v22 = vpop.permute.xlu2 %706 }
 0x3c5   : > { %v712_v23 = vsel %vm595_vm2, %v707_v22, 0 }
 0x3c6   : > { %721 = vmatpush.bf16.msrb.mxu2 %v712_v23  ;;  %v649_v24 = vpack.c.bf16 %v648_v21, %v648_v21 }
 0x3c8   : > { %1033 = vmatmul.msk.bf16.vlgmr.msrb.gmra.mxu0 %vm555_vm1, %v649_v24 }
 0x3c9   : > { %1035 = vmatmul.msk.bf16.vlgmr.msrb.gmra.mxu2 %vm555_vm1, %v705_v25 }
 0x3cc   : > { %v758_v26 = vpop.xlane.xlu0 %757 }
 0x3cd   : > { %1135 = vrcp.f32 %v758_v26 }
 0x3ce   : > { %1137 = vrcp.f32 %v1295_v53 }
 0x3d3   : > { %v1136_v18 = vpop.eup %1135 }
 0x3d4   : > { %v760_v27 = vmul.f32 %v1136_v18, %v1130_v13  ;;  %v1138_v54 = vpop.eup %1137 }
 0x3d5   : > { %v845_v55 = vmul.f32 32.0, %v1138_v54  ;;  %vm849_vm5 = vweird.f32 %v1138_v54 }
 0x3d6   : > { %v761_v30 = vpack.c.bf16 %v760_v27, %v760_v27 }
 0x3df   : > { %v763_v28 = vpop.permute.xlu0 %762 }
 0x3e0   : > { %v768_v29 = vsel %vm595_vm2, %v763_v28, 0 }
 0x3e1   : > { %777 = vmatpush.bf16.msra.mxu0 %v768_v29 }
 0x3e4   : > { %1037 = vmatmul.msk.bf16.vlgmr.msra.gmra.mxu0 %vm555_vm1, %v761_v30 }
 0x445   : > { %v667_v31 = vpop.f32.mrf.mxu0 }
 0x446   : > { %784 = vrot.lane.b32.xlu1 %v667_v31, %s1292_s18 }
 0x44c   : > { %v723_v32 = vpop.f32.mrf.mxu2 }
 0x44d   : > { %v669_v33 = vpop.f32.mrf.mxu0 }
 0x44e   : > { %788 = vrot.lane.b32.xlu1 %v723_v32, %s1293_s19 }
 0x454   : > { %v725_v34 = vpop.f32.mrf.mxu2 }
 0x461   : > { %v779_v35 = vpop.f32.mrf.mxu0 }
 0x462   : > { %792 = vrot.lane.b32.xlu2 %v779_v35, %s1294_s23 }
 0x469   : > { %v781_v36 = vpop.f32.mrf.mxu0 }
 0x4b8   : > { %v785_v39 = vpop.permute.xlu1 %784 }
 0x4b9   : > { %v795_v40 = vsel %vm555_vm1, %v1479_v56, %v785_v39  ;;  %v846_v56 = vsub.f32 1.0, %v845_v55 }
 0x4bb   : > { %v847_v57 = vmul.f32 %v1138_v54, %v846_v56 }
 0x4bc   : > { %v793_v42 = vpop.permute.xlu2 %792 }
 0x4bd   : > { %v848_v58 = vadd.f32 %v1138_v54, %v847_v57 }
 0x4bf   : > { %v850_v59 = vsel %vm849_vm5, %v1138_v54, %v848_v58 }
 0x4c0   : > { %v789_v41 = vpop.permute.xlu1 %788 }
 0x4c1   : > { %v797_v43 = vsel %vm796_vm3, %v795_v40, %v789_v41 }
 0x4c2   : > { %v799_v44 = vsel %vm798_vm4, %v797_v43, %v793_v42 }
 0x4c3   : > { %v800_v45 = vpack.c.bf16 %v799_v44, %v799_v44 }
 0x4c5   : > { %1046 = vmatmul.msk.bf16.vlgmr.msra.gmra.mxu1 %vm495_vm0, %v800_v45 }
 0x542   : > { %v833_v48 = vpop.f32.mrf.mxu1 }
 0x543   : > { %v834_v49 = vadd.f32 %v1118_v46, %v833_v48 }
 0x545   : > { %v838_v50 = vadd.f32 %v837_v47, %v834_v49 }
 0x547   : > { %v841_v51 = vsel %vm495_vm0, %v838_v50, 0.0 }
 0x548   : > { %842 = vadd.xlane.f32.xlu0 %v841_v51 }
 0x54a   : > { %v835_v52 = vpop.f32.mrf.mxu1 }
 0x5bb   : > { %v843_v60 = vpop.xlane.xlu0 %842 }
 0x5bc   : > { %v851_v61 = vmul.f32 %v850_v59, %v843_v60 }
 0x5be   : > { %v852_v62 = vsub.f32 %v838_v50, %v851_v61 }
 0x5c0   : > { %v853_v4 = vmul.f32 %v852_v62, %v852_v62 }
 0x5c2   : > { %v854_v63 = vsel %vm495_vm0, %v853_v4, 0.0 }
 0x5c3   : > { %855 = vadd.xlane.f32.xlu1 %v854_v63 }
 0x636   : > { %v856_v0 = vpop.xlane.xlu1 %855 }
 0x637   : > { %v857_v1 = vmul.f32 %v856_v0, %v850_v59 }
 0x639   : > { %v858_v2 = vadd.f32 1e-05, %v857_v1 }
 0x63b   : > { %1139 = vrsqrt.f32 %v858_v2  ;;  %vm865_vm7 = vweird.f32 %v858_v2 }
 0x641   : > { %v1140_v3 = vpop.eup %1139 }
 0x642   : > { %v860_v5 = vmul.f32 %v1140_v3, %v858_v2  ;;  %vm866_vm6 = vweird.f32 %v1140_v3 }
 0x643   : > { %vm867_vm8 = vmor %vm865_vm7, %vm866_vm6 }
 0x644   : > { %v861_v6 = vmul.f32 %v1140_v3, %v860_v5 }
 0x646   : > { %v862_v7 = vmul.f32 0.5, %v861_v6 }
 0x648   : > { %v863_v8 = vsub.f32 1.5, %v862_v7 }
 0x64a   : > { %v864_v9 = vmul.f32 %v1140_v3, %v863_v8 }
 0x64c   : > { %v868_v11 = vsel %vm867_vm8, %v1140_v3, %v864_v9 }
 0x64d   : > { %v869_v13 = vmul.f32 %v868_v11, %v852_v62 }
 0x64f   : > { %v873_v14 = vmul.f32 %v1119_v10, %v869_v13 }
 0x651   : > { %v877_v15 = vadd.f32 %v1120_v12, %v873_v14 }
 0x653   : > { %v878_v16 = vpack.c.bf16 %v877_v15, %v877_v15 }
 0x655   : > { %880 = vst.msk [vmem:[%s471_s29] sm:$0xf] %vm879_vm9, %v878_v16 }
 0x656 PF: > { %s24_s17 = sadd.s32 1, %s1279_s17  }
 0x657   : > { %p21_p7 = scmp.ge.s32.totalorder %s24_s17, 4  }
 0x659   :  { %23 = sbr.rel (!%p21_p7) target bundleno = 3 (0x3), region = 117 }
 0x65e   :  { %900 = vsyncpa [#allocation3], 1 }
 0x65f   :  { %902 = vsyncpa [#allocation3 + $0x1], 1 }
 0x660   :  { %903 = vsyncpa [#allocation5], 1 }
 0x661   :  { %904 = vsyncpa [#allocation8], 1 }

// kernel: forward.25
= control target key start
LH: loop header
LB: loop body
LE: loop exit
PB: predicated region body
PF: predicated region fallthrough
CT: control target
= control target key end

     0   :  { %s447_s12 = smov 0   ;;  %s449_s13 = smov 0   ;;  %s486_s0 = inlined_call_operand.vmem [shape: bf16[16,32], index: 0, kind: input, shape index: {}]   ;;  %s487_s1 = inlined_call_operand.vmem [shape: bf16[32,128], index: 1, kind: input, shape index: {}]   ;;  %s488_s2 = inlined_call_operand.vmem [shape: f32[1,128], index: 2, kind: input, shape index: {}]   ;;  %s489_s3 = inlined_call_operand.vmem [shape: f32[16,128], index: 3, kind: output, shape index: {}]  }
   0x1   :  { %s451_s14 = smov 0  }
   0x2 LB: > { %s25_s15 = sadd.s32 1, %s421_s13  ;;  %p362_p0 = scmp.ge.s32.totalorder %s425_s14, 1  ;;  %s425_s14 = sphi %s451_s14, %s13_s14   ;;  %s421_s13 = sphi %s449_s13, %s491_s13   ;;  %s417_s12 = sphi %s447_s12, %s490_s12  }
   0x3   : > { %p27_p1 = scmp.ge.s32.totalorder %s25_s15, 2  ;;  %p167_p2 = scmp.lt.s32.totalorder %s425_s14, 3 }
   0x5   : > { %s493_s15 = smov (%p27_p1, %s25_s15), 0  ;;  %p168_p3 = pnand %p362_p0, %p167_p2 }
   0x6   : > { %p199_p4 = scmp.lt.s32.totalorder (!%p168_p3), %s417_s12, 1 }
   0x7   : > { %171 = sbr.rel (%p168_p3) target bundleno = 154 (0x9a), region = 32 }
   0xc   : > { %v377_v0 = vld [vmem:[%s487_s1 + $0x8] sm:$0xff]  ;;  %v376_v1 = vld [vmem:[%s487_s1] sm:$0xff]  ;;  %s495_s12 = smov (!%p199_p4, %s417_s12), 1  ;;  %vm239_vm0 = vcmask 261120  }
   0xd   : > { %249 = vmatpush.bf16.msra.mxu0 %v377_v0  ;;  %s363_s20 = sshll.u32 %s495_s12, 2  ;;  %s364_s24 = sshll.u32 %s495_s12, 3  ;;  %v402_v3 = vld [vmem:[%s488_s2] ss:$0 sm:$0xff] }
   0xe   : > { %s202_s23 = scalar_lea.vmem %s486_s0, %s363_s20  ;;  %s216_s29 = scalar_lea.vmem %s489_s3, %s364_s24 }
   0xf   : > { %v218_v2 = vld [vmem:[%s202_s23] sm:$0xf] }
  0x11   : > { %250 = vmatpush.bf16.msra.mxu0 %v376_v1 }
  0x14   : > { %373 = vmatmul.msk.bf16.vlgmr.msra.gmra.mxu0 %vm239_vm0, %v218_v2 }
  0x91   : > { %v252_v4 = vpop.f32.mrf.mxu0 }
  0x92   : > { %v253_v5 = vadd.f32 %v402_v3, %v252_v4 }
  0x94   : > { %256 = vst [vmem:[%s216_s29] sm:$0xff] %v253_v5 }
  0x99   : > { %v254_v6 = vpop.f32.mrf.mxu0 }
  0x9a PF: > { %s13_s14 = sadd.s32 1, %s425_s14   ;;  %s490_s12 = smov %s421_s13 }
  0x9b   : > { %p10_p5 = scmp.ge.s32.totalorder %s13_s14, 4   ;;  %s491_s13 = smov %s493_s15 }
  0x9d   :  { %12 = sbr.rel (!%p10_p5) target bundleno = 2 (0x2), region = 68 }

</bundles_post_ra>
